<compile_context>
chip_gen: v6e
topology: v6e:2x2x1
jax: 0.10.0
libtpu: 0.0.40
codegen_flags: <defaults>
</compile_context>

<pallas_src>
import functools

import numpy as np
import jax
import jax.numpy as jnp
from jax.experimental import pallas as pl
from jax.experimental.pallas import tpu as pltpu


# ----------------------------------------------------------------------------
# Model configuration (deterministic synthetic init, no checkpoints)
# ----------------------------------------------------------------------------
CFG = dict(
    human_num=3,
    obs_num=2,
    spatial_feat_dim=12,          # obs_space_dict['spatial_edges'].shape[1]
    obs_feat_dim=8,               # obs_space_dict['obstacle_vertices'].shape[1]
    seq_length=4,                 # config.ppo.num_steps
    num_processes=2,              # config.training.num_processes
    num_mini_batch=1,             # config.ppo.num_mini_batch
    human_node_rnn_size=32,
    human_human_edge_rnn_size=32,
    human_node_output_size=16,
    human_node_embedding_size=16,
    human_human_edge_embedding_size=16,
    human_node_input_size=7,
    hr_attention_size=16,
)
CFG["num_edges"] = CFG["human_num"] + 1 + CFG["obs_num"]

EMB = CFG["human_human_edge_embedding_size"]     # 16
NEMB = CFG["human_node_embedding_size"]          # 16
R = CFG["human_human_edge_rnn_size"]             # 32
RN = CFG["human_node_rnn_size"]                  # 32
ATT = CFG["hr_attention_size"]                   # 16
OUT = CFG["human_node_output_size"]              # 16
SPAT_IN = CFG["spatial_feat_dim"] + CFG["obs_feat_dim"] + 1   # 21 (padded)
NODE_IN = CFG["human_node_input_size"]           # 7

# Slab packing assumptions (hold for this config).
assert R == RN, "gate slab packing assumes equal edge/node GRU sizes"
assert EMB == NEMB == ATT, "enc slab packing assumes equal embed/attn sizes"


def _offsets(spec):
    off, out = 0, {}
    for name, rows in spec:
        out[name] = (off, off + rows)
        off += rows
    return out, off


# GRU gate slab (width 3*R = 96): x-side / h-side gate matrices + bias rows.
GOF, GATE_ROWS = _offsets([
    ("t_x", EMB), ("t_h", R), ("s_x", EMB), ("s_h", R),
    ("n_x1", NEMB), ("n_x2", NEMB), ("n_h", RN),
    ("b_tx", 1), ("b_th", 1), ("b_sx", 1), ("b_sh", 1), ("b_nx", 1), ("b_nh", 1),
])
# Encoder / attention slab (width 16). Per-step-read blocks first (aligned).
EOF, ENC_ROWS = _offsets([
    ("at", R), ("as", R), ("natt_t", R), ("natt_w", R),
    ("t_enc", 2), ("s_enc", SPAT_IN), ("n_enc", NODE_IN),
    ("at_b", 1), ("as_b", 1), ("natt_b", 1),
    ("t_enc_b", 1), ("s_enc_b", 1), ("n_enc_b", 1),
])
# Actor/critic head slab (width 2*OUT = 32).
HOF, HEAD_ROWS = _offsets([
    ("ac1", RN), ("ac2", 2 * OUT), ("cl", 2 * OUT),
    ("b_ac1", 1), ("b_ac2", 1), ("b_cl", 1),
])


# ----------------------------------------------------------------------------
# Fused Pallas kernel
# ----------------------------------------------------------------------------
def _gru_update(gx, gh, h, H):
    """PyTorch GRU (gate order r,z,n), gx = x-side pre-activations (+bih),
    gh = h-side pre-activations (+bhh); single sigmoid over fused r|z lanes."""
    rz = jax.nn.sigmoid(gx[:, :2 * H] + gh[:, :2 * H])
    r = rz[:, :H]
    z = rz[:, H:2 * H]
    n = jnp.tanh(gx[:, 2 * H:3 * H] + r * gh[:, 2 * H:3 * H])
    return (1.0 - z) * n + z * h


def _dsrnn_fused_kernel(robot_ref, tedge_ref, spat_ref, mask_ref, h0_ref,
                        gw_ref, ew_ref, hw_ref,
                        ac_ref, val_ref, hout_ref,
                        *, S, N, E, H, temperature):
    NE = N * E
    f32 = jnp.float32

    def rows(ref, rng):                       # static sub-block of a slab ref
        lo, hi = rng
        return ref[lo:hi, :]

    def mm(a, b):
        return jnp.dot(a, b, preferred_element_type=f32)

    # ---- h-independent precompute for ALL timesteps (hoisted out of loop) --
    enc_t = jnp.maximum(
        mm(tedge_ref[...], rows(ew_ref, EOF["t_enc"])) + rows(ew_ref, EOF["t_enc_b"]), 0.0)
    gx_t_all = mm(enc_t, rows(gw_ref, GOF["t_x"])) + rows(gw_ref, GOF["b_tx"])      # (S*N, 3H)

    enc_s = jnp.maximum(
        mm(spat_ref[...], rows(ew_ref, EOF["s_enc"])) + rows(ew_ref, EOF["s_enc_b"]), 0.0)
    gx_s_all = mm(enc_s, rows(gw_ref, GOF["s_x"])) + rows(gw_ref, GOF["b_sx"])      # (S*NE, 3H)

    e1_all = jnp.maximum(
        mm(robot_ref[...], rows(ew_ref, EOF["n_enc"])) + rows(ew_ref, EOF["n_enc_b"]), 0.0)
    gx_n1_all = mm(e1_all, rows(gw_ref, GOF["n_x1"])) + rows(gw_ref, GOF["b_nx"])   # (S*N, 3H)

    h0 = h0_ref[...]
    h_t = h0[0:N, :]                    # temporal-edge hidden  (N, H)
    h_s = h0[N:N + NE, :]               # spatial-edge hidden   (NE, H)
    h_n = h0[N + NE:N + NE + N, :]      # node hidden           (N, H)

    # Block-diagonal attention validity mask: env n attends to its own E edges.
    row_id = jax.lax.broadcasted_iota(jnp.int32, (N, NE), 0)
    col_id = jax.lax.broadcasted_iota(jnp.int32, (N, NE), 1)
    valid = (col_id >= row_id * E) & (col_id < (row_id + 1) * E)

    hn_steps = []
    # Fully-unrolled in-kernel time loop (seq_len is tiny and static).
    for t in range(S):
        m = mask_ref[t]                 # (N + NE, 1)
        m_n = m[0:N, :]
        m_s = m[N:N + NE, :]

        # ---- temporal edge GRU -------------------------------------------
        h = h_t * m_n
        gh = mm(h, rows(gw_ref, GOF["t_h"])) + rows(gw_ref, GOF["b_th"])
        h_t = _gru_update(gx_t_all[t * N:(t + 1) * N, :], gh, h, H)

        # ---- spatial edge GRU (human_linear already folded in encoder) ----
        h = h_s * m_s
        gh = mm(h, rows(gw_ref, GOF["s_h"])) + rows(gw_ref, GOF["b_sh"])
        h_s = _gru_update(gx_s_all[t * NE:(t + 1) * NE, :], gh, h, H)

        # ---- edge attention (vectorized over envs) ------------------------
        te = mm(h_t, rows(ew_ref, EOF["at"])) + rows(ew_ref, EOF["at_b"])    # (N, A)
        se = mm(h_s, rows(ew_ref, EOF["as"])) + rows(ew_ref, EOF["as_b"])    # (NE, A)
        scores = jax.lax.dot_general(
            te, se, (((1,), (1,)), ((), ())),
            preferred_element_type=f32) * temperature                        # (N, NE)
        scores = jnp.where(valid, scores, -1e30)
        scores = scores - jnp.max(scores, axis=1, keepdims=True)
        p = jnp.where(valid, jnp.exp(scores), 0.0)
        inv = pl.reciprocal(jnp.sum(p, axis=1, keepdims=True), approx=True)
        weighted = mm(p * inv, h_s)                                          # (N, H)

        # ---- node GRU (edge_attention_embed split: no [h_t|weighted] concat)
        e2 = jnp.maximum(
            mm(h_t, rows(ew_ref, EOF["natt_t"]))
            + mm(weighted, rows(ew_ref, EOF["natt_w"]))
            + rows(ew_ref, EOF["natt_b"]), 0.0)                              # (N, 16)
        h = h_n * m_n
        gh = mm(h, rows(gw_ref, GOF["n_h"])) + rows(gw_ref, GOF["b_nh"])
        gx = gx_n1_all[t * N:(t + 1) * N, :] + mm(e2, rows(gw_ref, GOF["n_x2"]))
        h_n = _gru_update(gx, gh, h, H)

        hn_steps.append(h_n)

    # ---- actor / critic heads, batched over all timesteps (post-loop) -----
    h_all = jnp.concatenate(hn_steps, axis=0)                                # (S*N, H)
    h1 = jnp.tanh(mm(h_all, rows(hw_ref, HOF["ac1"])) + rows(hw_ref, HOF["b_ac1"]))
    h2 = jnp.tanh(mm(h1, rows(hw_ref, HOF["ac2"])) + rows(hw_ref, HOF["b_ac2"]))
    v = mm(h2, rows(hw_ref, HOF["cl"])) + rows(hw_ref, HOF["b_cl"])          # value in col 0

    ac_ref[...] = h2                                  # cols 0:OUT = actor output
    val_ref[...] = v[:, 0:1]
    hout_ref[0:N, :] = h_t
    hout_ref[N:N + NE, :] = h_s
    hout_ref[N + NE:N + NE + N, :] = h_n


# ----------------------------------------------------------------------------
# Parameters (deterministic synthetic init)
# ----------------------------------------------------------------------------
def _dense(key, fan_in, fan_out):
    k1, k2 = jax.random.split(key)
    w = jax.random.normal(k1, (fan_in, fan_out), jnp.float32) / np.sqrt(fan_in)
    b = jax.random.normal(k2, (fan_out,), jnp.float32) * 0.01
    return w, b


def _gru_params(key, in_size, hidden):
    k1, k2, k3, k4 = jax.random.split(key, 4)
    s_i = 1.0 / np.sqrt(in_size)
    s_h = 1.0 / np.sqrt(hidden)
    return dict(
        wih=jax.random.normal(k1, (in_size, 3 * hidden), jnp.float32) * s_i,
        whh=jax.random.normal(k2, (hidden, 3 * hidden), jnp.float32) * s_h,
        bih=jax.random.normal(k3, (3 * hidden,), jnp.float32) * 0.01,
        bhh=jax.random.normal(k4, (3 * hidden,), jnp.float32) * 0.01,
    )


def init_params(seed=42):
    c = CFG
    keys = jax.random.split(jax.random.PRNGKey(seed), 16)
    p = {}
    p["human_linear"] = _dense(keys[0], c["spatial_feat_dim"], c["obs_feat_dim"])
    p["temp_enc"] = _dense(keys[1], 2, EMB)
    p["temp_gru"] = _gru_params(keys[2], EMB, R)
    p["spat_enc"] = _dense(keys[3], 8, EMB)
    p["spat_gru"] = _gru_params(keys[4], EMB, R)
    p["attn_temporal"] = _dense(keys[5], R, ATT)
    p["attn_spatial"] = _dense(keys[6], R, ATT)
    p["node_enc"] = _dense(keys[7], NODE_IN, NEMB)
    p["edge_attn_embed"] = _dense(keys[8], 2 * R, NEMB)
    p["node_gru"] = _gru_params(keys[9], 2 * NEMB, RN)
    p["actor1"] = _dense(keys[10], RN, OUT)
    p["actor2"] = _dense(keys[11], OUT, OUT)
    p["critic1"] = _dense(keys[12], RN, OUT)
    p["critic2"] = _dense(keys[13], OUT, OUT)
    p["critic_linear"] = _dense(keys[14], OUT, 1)
    return p


def _prepare_weights(params):
    """Pack all module weights into three VMEM slabs (+ bias rows appended)."""
    f32 = jnp.float32
    tg, sg, ng = params["temp_gru"], params["spat_gru"], params["node_gru"]

    # --- GRU gate slab (width 3H): [r|z|n] columns, x-side and h-side rows --
    gate_slab = jnp.concatenate([
        tg["wih"], tg["whh"],
        sg["wih"], sg["whh"],
        ng["wih"][:NEMB, :], ng["wih"][NEMB:, :], ng["whh"],
        tg["bih"][None, :], tg["bhh"][None, :],
        sg["bih"][None, :], sg["bhh"][None, :],
        ng["bih"][None, :], ng["bhh"][None, :],
    ], axis=0).astype(f32)
    assert gate_slab.shape == (GATE_ROWS, 3 * R)

    # --- encoder / attention slab (width 16) --------------------------------
    # human_linear (a bare Linear, no activation) is folded exactly into the
    # spatial encoder via the padded [human(12) | obs(8) | is_human(1)] layout.
    hl_w, hl_b = params["human_linear"]
    se_w, se_b = params["spat_enc"]
    te_w, te_b = params["temp_enc"]
    ne_w, ne_b = params["node_enc"]
    ae_w, ae_b = params["edge_attn_embed"]
    at_w, at_b = params["attn_temporal"]
    as_w, as_b = params["attn_spatial"]
    s_enc_folded = jnp.concatenate(
        [hl_w @ se_w, se_w, (hl_b @ se_w)[None, :]], axis=0)          # (21, 16)
    enc_slab = jnp.concatenate([
        at_w, as_w, ae_w[:R, :], ae_w[R:, :],
        te_w, s_enc_folded, ne_w,
        at_b[None, :], as_b[None, :], ae_b[None, :],
        te_b[None, :], se_b[None, :], ne_b[None, :],
    ], axis=0).astype(f32)
    assert enc_slab.shape == (ENC_ROWS, EMB)

    # --- actor / critic head slab (width 2*OUT = 32) -------------------------
    a1_w, a1_b = params["actor1"]
    a2_w, a2_b = params["actor2"]
    c1_w, c1_b = params["critic1"]
    c2_w, c2_b = params["critic2"]
    cl_w, cl_b = params["critic_linear"]
    f = jnp.float32
    w_ac1 = jnp.concatenate([a1_w, c1_w], axis=1)                     # (RN, 2*OUT)
    w_ac2 = (jnp.zeros((2 * OUT, 2 * OUT), f)
             .at[:OUT, :OUT].set(a2_w).at[OUT:, OUT:].set(c2_w))
    w_cl = jnp.zeros((2 * OUT, 2 * OUT), f).at[OUT:, 0:1].set(cl_w)   # value in col 0
    b_ac1 = jnp.concatenate([a1_b, c1_b])[None, :]
    b_ac2 = jnp.concatenate([a2_b, c2_b])[None, :]
    b_cl = jnp.zeros((1, 2 * OUT), f).at[0, 0].set(cl_b[0])
    head_slab = jnp.concatenate([w_ac1, w_ac2, w_cl, b_ac1, b_ac2, b_cl],
                                axis=0).astype(f32)
    assert head_slab.shape == (HEAD_ROWS, 2 * OUT)

    return gate_slab, enc_slab, head_slab


# ----------------------------------------------------------------------------
# Forward pass (mirrors DSRNN_obs_vertex.forward)
# ----------------------------------------------------------------------------
def reshapeT(x, seq_length, nenv):
    return x.reshape((seq_length, nenv) + x.shape[1:])


def dsrnn_forward(inputs, rnn_hxs, masks, params, infer=False):
    c = CFG
    if infer:
        S, N = 1, c["num_processes"]
    else:
        S = c["seq_length"]
        N = c["num_processes"] // c["num_mini_batch"]
    hn_, on_ = c["human_num"], c["obs_num"]
    E = hn_ + on_                      # number of spatial edges
    NE = N * E
    f32 = jnp.float32

    robot = reshapeT(inputs["robot_node"], S, N).reshape(S * N, -1).astype(f32)
    tedge = reshapeT(inputs["temporal_edges"], S, N).reshape(S * N, -1).astype(f32)
    human = reshapeT(inputs["spatial_edges"], S, N).astype(f32)       # (S,N,hn,12)
    obs = reshapeT(inputs["obstacle_vertices"], S, N).astype(f32)     # (S,N,on,8)

    # Padded 21-feature spatial-encoder input (see _prepare_weights).
    fh, fo = human.shape[-1], obs.shape[-1]
    human_p = jnp.concatenate(
        [human, jnp.zeros(human.shape[:-1] + (fo,), f32),
         jnp.ones(human.shape[:-1] + (1,), f32)], axis=-1)
    obs_p = jnp.concatenate(
        [jnp.zeros(obs.shape[:-1] + (fh,), f32), obs,
         jnp.zeros(obs.shape[:-1] + (1,), f32)], axis=-1)
    spat = jnp.concatenate([human_p, obs_p], axis=-2).reshape(S * NE, fh + fo + 1)

    masks_r = reshapeT(masks, S, N).astype(f32)                       # (S, N, 1)
    mask_s = jnp.repeat(masks_r, E, axis=1)                           # (S, NE, 1)
    mask_pack = jnp.concatenate([masks_r, mask_s], axis=1)            # (S, N+NE, 1)

    h_n0 = rnn_hxs["human_node_rnn"].astype(f32).reshape(N, RN)
    h_edge = rnn_hxs["human_human_edge_rnn"].astype(f32)              # (N, 1+E, R)
    h_t0 = h_edge[:, 0, :]
    h_s0 = h_edge[:, 1:, :].reshape(NE, R)
    h0_pack = jnp.concatenate([h_t0, h_s0, h_n0], axis=0)             # (2N+NE, R)

    gate_slab, enc_slab, head_slab = _prepare_weights(params)
    temperature = float(E) / float(np.sqrt(ATT))

    vspec = pl.BlockSpec(memory_space=pltpu.MemorySpace.VMEM)
    ac, value, h_out = pl.pallas_call(
        functools.partial(_dsrnn_fused_kernel, S=S, N=N, E=E, H=R,
                          temperature=temperature),
        out_shape=[
            jax.ShapeDtypeStruct((S * N, 2 * OUT), f32),   # [actor | critic-hidden]
            jax.ShapeDtypeStruct((S * N, 1), f32),         # value
            jax.ShapeDtypeStruct((2 * N + NE, R), f32),    # packed final hiddens
        ],
        in_specs=[vspec] * 8,
        out_specs=[vspec] * 3,
    )(robot, tedge, spat, mask_pack, h0_pack, gate_slab, enc_slab, head_slab)

    actor_out = ac[:, :OUT]
    h_t_T = h_out[0:N]
    h_s_T = h_out[N:N + NE].reshape(N, E, R)
    h_n_T = h_out[N + NE:]

    new_rnn_hxs = {
        "human_node_rnn": h_n_T.reshape(N, 1, RN),
        "human_human_edge_rnn": jnp.concatenate(
            [h_t_T.reshape(N, 1, R), h_s_T], axis=1),
    }
    if infer:
        return (value.reshape(S, N, 1)[0],
                actor_out.reshape(S, N, OUT)[0],
                new_rnn_hxs)
    return value, actor_out, new_rnn_hxs


# ----------------------------------------------------------------------------
if __name__ == "__main__":
    c = CFG
    S, N = c["seq_length"], c["num_processes"] // c["num_mini_batch"]
    key = jax.random.PRNGKey(0)
    ks = jax.random.split(key, 8)

    inputs = {
        "robot_node": jax.random.normal(
            ks[0], (S * N, 1, c["human_node_input_size"]), jnp.float32),
        "temporal_edges": jax.random.normal(ks[1], (S * N, 1, 2), jnp.float32),
        "spatial_edges": jax.random.normal(
            ks[2], (S * N, c["human_num"], c["spatial_feat_dim"]), jnp.float32),
        "obstacle_vertices": jax.random.normal(
            ks[3], (S * N, c["obs_num"], c["obs_feat_dim"]), jnp.float32),
    }
    rnn_hxs = {
        "human_node_rnn": jax.random.normal(
            ks[4], (N, 1, c["human_node_rnn_size"]), jnp.float32),
        "human_human_edge_rnn": jax.random.normal(
            ks[5], (N, c["num_edges"], c["human_human_edge_rnn_size"]),
            jnp.float32),
    }
    masks = (jax.random.uniform(ks[6], (S * N, 1)) > 0.2).astype(jnp.float32)

    params = init_params(seed=42)

    fwd = jax.jit(functools.partial(dsrnn_forward, infer=False))
    value, actor_out, new_hxs = fwd(inputs, rnn_hxs, masks, params)
    jax.block_until_ready((value, actor_out, new_hxs))

    assert value.shape == (S * N, 1)
    assert actor_out.shape == (S * N, c["human_node_output_size"])
    assert new_hxs["human_node_rnn"].shape == (N, 1, c["human_node_rnn_size"])
    assert new_hxs["human_human_edge_rnn"].shape == (
        N, c["num_edges"], c["human_human_edge_rnn_size"])
    assert bool(jnp.all(jnp.isfinite(value)))
    assert bool(jnp.all(jnp.isfinite(actor_out)))
    print("KERNEL_OK")
</pallas_src>

<mosaic_0001>
module attributes {stable_mosaic.version = 11 : i64} {
  func.func @_dsrnn_fused_kernel(%arg0: memref<8x7xf32, #tpu.memory_space<vmem>>, %arg1: memref<8x2xf32, #tpu.memory_space<vmem>>, %arg2: memref<40x21xf32, #tpu.memory_space<vmem>>, %arg3: memref<4x12x1xf32, #tpu.memory_space<vmem>>, %arg4: memref<14x32xf32, #tpu.memory_space<vmem>>, %arg5: memref<166x96xf32, #tpu.memory_space<vmem>>, %arg6: memref<164x16xf32, #tpu.memory_space<vmem>>, %arg7: memref<99x32xf32, #tpu.memory_space<vmem>>, %arg8: memref<8x32xf32, #tpu.memory_space<vmem>>, %arg9: memref<8x1xf32, #tpu.memory_space<vmem>>, %arg10: memref<14x32xf32, #tpu.memory_space<vmem>>) attributes {dimension_semantics = [], scalar_prefetch = 0 : i64, scratch_operands = 0 : i64, tpu.core_type = #tpu.core_type<tc>} {
    %c0 = arith.constant 0 : index
    %c0_0 = arith.constant 0 : index
    %0 = vector.load %arg1[%c0, %c0_0] : memref<8x2xf32, #tpu.memory_space<vmem>>, vector<8x2xf32>
    %c128 = arith.constant 128 : index
    %c0_1 = arith.constant 0 : index
    %1 = vector.load %arg6[%c128, %c0_1] : memref<164x16xf32, #tpu.memory_space<vmem>>, vector<2x16xf32>
    %cst = arith.constant dense<0.000000e+00> : vector<8x16xf32>
    %2 = tpu.matmul %0, %1, %cst {dimension_numbers = #tpu.dot_dimension_numbers<[1], [0], [0], [1], [0, 0, 1, 1], [], []>} : vector<8x2xf32>, vector<2x16xf32>, vector<8x16xf32> -> vector<8x16xf32>
    %c161 = arith.constant 161 : index
    %c0_2 = arith.constant 0 : index
    %3 = vector.load %arg6[%c161, %c0_2] : memref<164x16xf32, #tpu.memory_space<vmem>>, vector<1x16xf32>
    %4 = vector.broadcast %3 : vector<1x16xf32> to vector<8x16xf32>
    %5 = arith.addf %2, %4 : vector<8x16xf32>
    %cst_3 = arith.constant 0.000000e+00 : f32
    %6 = vector.broadcast %cst_3 : f32 to vector<8x16xf32>
    %7 = arith.maximumf %5, %6 : vector<8x16xf32>
    %c0_4 = arith.constant 0 : index
    %c0_5 = arith.constant 0 : index
    %8 = vector.load %arg5[%c0_4, %c0_5] : memref<166x96xf32, #tpu.memory_space<vmem>>, vector<16x96xf32>
    %cst_6 = arith.constant dense<0.000000e+00> : vector<8x96xf32>
    %9 = tpu.matmul %7, %8, %cst_6 {dimension_numbers = #tpu.dot_dimension_numbers<[1], [0], [0], [1], [0, 0, 1, 1], [], []>} : vector<8x16xf32>, vector<16x96xf32>, vector<8x96xf32> -> vector<8x96xf32>
    %c160 = arith.constant 160 : index
    %c0_7 = arith.constant 0 : index
    %10 = vector.load %arg5[%c160, %c0_7] : memref<166x96xf32, #tpu.memory_space<vmem>>, vector<1x96xf32>
    %11 = vector.broadcast %10 : vector<1x96xf32> to vector<8x96xf32>
    %12 = arith.addf %9, %11 : vector<8x96xf32>
    %c0_8 = arith.constant 0 : index
    %c0_9 = arith.constant 0 : index
    %13 = vector.load %arg2[%c0_8, %c0_9] : memref<40x21xf32, #tpu.memory_space<vmem>>, vector<40x21xf32>
    %c130 = arith.constant 130 : index
    %c0_10 = arith.constant 0 : index
    %14 = vector.load %arg6[%c130, %c0_10] : memref<164x16xf32, #tpu.memory_space<vmem>>, vector<21x16xf32>
    %cst_11 = arith.constant dense<0.000000e+00> : vector<40x16xf32>
    %15 = tpu.matmul %13, %14, %cst_11 {dimension_numbers = #tpu.dot_dimension_numbers<[1], [0], [0], [1], [0, 0, 1, 1], [], []>} : vector<40x21xf32>, vector<21x16xf32>, vector<40x16xf32> -> vector<40x16xf32>
    %c162 = arith.constant 162 : index
    %c0_12 = arith.constant 0 : index
    %16 = vector.load %arg6[%c162, %c0_12] : memref<164x16xf32, #tpu.memory_space<vmem>>, vector<1x16xf32>
    %17 = vector.broadcast %16 : vector<1x16xf32> to vector<40x16xf32>
    %18 = arith.addf %15, %17 : vector<40x16xf32>
    %cst_13 = arith.constant 0.000000e+00 : f32
    %19 = vector.broadcast %cst_13 : f32 to vector<40x16xf32>
    %20 = arith.maximumf %18, %19 : vector<40x16xf32>
    %c48 = arith.constant 48 : index
    %c0_14 = arith.constant 0 : index
    %21 = vector.load %arg5[%c48, %c0_14] : memref<166x96xf32, #tpu.memory_space<vmem>>, vector<16x96xf32>
    %cst_15 = arith.constant dense<0.000000e+00> : vector<40x96xf32>
    %22 = tpu.matmul %20, %21, %cst_15 {dimension_numbers = #tpu.dot_dimension_numbers<[1], [0], [0], [1], [0, 0, 1, 1], [], []>} : vector<40x16xf32>, vector<16x96xf32>, vector<40x96xf32> -> vector<40x96xf32>
    %c162_16 = arith.constant 162 : index
    %c0_17 = arith.constant 0 : index
    %23 = vector.load %arg5[%c162_16, %c0_17] : memref<166x96xf32, #tpu.memory_space<vmem>>, vector<1x96xf32>
    %24 = vector.broadcast %23 : vector<1x96xf32> to vector<40x96xf32>
    %25 = arith.addf %22, %24 : vector<40x96xf32>
    %c0_18 = arith.constant 0 : index
    %c0_19 = arith.constant 0 : index
    %26 = vector.load %arg0[%c0_18, %c0_19] : memref<8x7xf32, #tpu.memory_space<vmem>>, vector<8x7xf32>
    %c151 = arith.constant 151 : index
    %c0_20 = arith.constant 0 : index
    %27 = vector.load %arg6[%c151, %c0_20] : memref<164x16xf32, #tpu.memory_space<vmem>>, vector<7x16xf32>
    %cst_21 = arith.constant dense<0.000000e+00> : vector<8x16xf32>
    %28 = tpu.matmul %26, %27, %cst_21 {dimension_numbers = #tpu.dot_dimension_numbers<[1], [0], [0], [1], [0, 0, 1, 1], [], []>} : vector<8x7xf32>, vector<7x16xf32>, vector<8x16xf32> -> vector<8x16xf32>
    %c163 = arith.constant 163 : index
    %c0_22 = arith.constant 0 : index
    %29 = vector.load %arg6[%c163, %c0_22] : memref<164x16xf32, #tpu.memory_space<vmem>>, vector<1x16xf32>
    %30 = vector.broadcast %29 : vector<1x16xf32> to vector<8x16xf32>
    %31 = arith.addf %28, %30 : vector<8x16xf32>
    %cst_23 = arith.constant 0.000000e+00 : f32
    %32 = vector.broadcast %cst_23 : f32 to vector<8x16xf32>
    %33 = arith.maximumf %31, %32 : vector<8x16xf32>
    %c96 = arith.constant 96 : index
    %c0_24 = arith.constant 0 : index
    %34 = vector.load %arg5[%c96, %c0_24] : memref<166x96xf32, #tpu.memory_space<vmem>>, vector<16x96xf32>
    %cst_25 = arith.constant dense<0.000000e+00> : vector<8x96xf32>
    %35 = tpu.matmul %33, %34, %cst_25 {dimension_numbers = #tpu.dot_dimension_numbers<[1], [0], [0], [1], [0, 0, 1, 1], [], []>} : vector<8x16xf32>, vector<16x96xf32>, vector<8x96xf32> -> vector<8x96xf32>
    %c164 = arith.constant 164 : index
    %c0_26 = arith.constant 0 : index
    %36 = vector.load %arg5[%c164, %c0_26] : memref<166x96xf32, #tpu.memory_space<vmem>>, vector<1x96xf32>
    %37 = vector.broadcast %36 : vector<1x96xf32> to vector<8x96xf32>
    %38 = arith.addf %35, %37 : vector<8x96xf32>
    %c0_27 = arith.constant 0 : index
    %c0_28 = arith.constant 0 : index
    %39 = vector.load %arg4[%c0_27, %c0_28] : memref<14x32xf32, #tpu.memory_space<vmem>>, vector<14x32xf32>
    %40 = vector.extract_strided_slice %39 {offsets = [0, 0], sizes = [2, 32], strides = [1, 1]} : vector<14x32xf32> to vector<2x32xf32>
    %41 = vector.extract_strided_slice %39 {offsets = [2, 0], sizes = [10, 32], strides = [1, 1]} : vector<14x32xf32> to vector<10x32xf32>
    %42 = vector.extract_strided_slice %39 {offsets = [12, 0], sizes = [2, 32], strides = [1, 1]} : vector<14x32xf32> to vector<2x32xf32>
    %43 = tpu.iota {dimensions = array<i32: 0>} : vector<2x10xi32>
    %44 = tpu.iota {dimensions = array<i32: 1>} : vector<2x10xi32>
    %c5_i32 = arith.constant 5 : i32
    %45 = vector.broadcast %c5_i32 : i32 to vector<2x10xi32>
    %46 = arith.muli %43, %45 : vector<2x10xi32>
    %47 = arith.cmpi sge, %44, %46 : vector<2x10xi32>
    %c1_i32 = arith.constant 1 : i32
    %48 = vector.broadcast %c1_i32 : i32 to vector<2x10xi32>
    %49 = arith.addi %43, %48 : vector<2x10xi32>
    %c5_i32_29 = arith.constant 5 : i32
    %50 = vector.broadcast %c5_i32_29 : i32 to vector<2x10xi32>
    %51 = arith.muli %49, %50 : vector<2x10xi32>
    %52 = arith.cmpi slt, %44, %51 : vector<2x10xi32>
    %53 = arith.andi %47, %52 : vector<2x10xi1>
    %c0_30 = arith.constant 0 : index
    %c0_31 = arith.constant 0 : index
    %c0_32 = arith.constant 0 : index
    %54 = vector.load %arg3[%c0_30, %c0_31, %c0_32] : memref<4x12x1xf32, #tpu.memory_space<vmem>>, vector<1x12x1xf32>
    %55 = vector.shape_cast %54 : vector<1x12x1xf32> to vector<12x1xf32>
    %56 = vector.extract_strided_slice %55 {offsets = [0, 0], sizes = [2, 1], strides = [1, 1]} : vector<12x1xf32> to vector<2x1xf32>
    %57 = vector.extract_strided_slice %55 {offsets = [2, 0], sizes = [10, 1], strides = [1, 1]} : vector<12x1xf32> to vector<10x1xf32>
    %58 = vector.broadcast %56 : vector<2x1xf32> to vector<2x32xf32>
    %59 = arith.mulf %40, %58 : vector<2x32xf32>
    %c16 = arith.constant 16 : index
    %c0_33 = arith.constant 0 : index
    %60 = vector.load %arg5[%c16, %c0_33] : memref<166x96xf32, #tpu.memory_space<vmem>>, vector<32x96xf32>
    %cst_34 = arith.constant dense<0.000000e+00> : vector<2x96xf32>
    %61 = tpu.matmul %59, %60, %cst_34 {dimension_numbers = #tpu.dot_dimension_numbers<[1], [0], [0], [1], [0, 0, 1, 1], [], []>} : vector<2x32xf32>, vector<32x96xf32>, vector<2x96xf32> -> vector<2x96xf32>
    %c161_35 = arith.constant 161 : index
    %c0_36 = arith.constant 0 : index
    %62 = vector.load %arg5[%c161_35, %c0_36] : memref<166x96xf32, #tpu.memory_space<vmem>>, vector<1x96xf32>
    %63 = vector.broadcast %62 : vector<1x96xf32> to vector<2x96xf32>
    %64 = arith.addf %61, %63 : vector<2x96xf32>
    %65 = vector.extract_strided_slice %12 {offsets = [0, 0], sizes = [2, 96], strides = [1, 1]} : vector<8x96xf32> to vector<2x96xf32>
    %66 = vector.extract_strided_slice %65 {offsets = [0, 0], sizes = [2, 64], strides = [1, 1]} : vector<2x96xf32> to vector<2x64xf32>
    %67 = vector.extract_strided_slice %64 {offsets = [0, 0], sizes = [2, 64], strides = [1, 1]} : vector<2x96xf32> to vector<2x64xf32>
    %68 = arith.addf %66, %67 : vector<2x64xf32>
    %69 = arith.negf %68 : vector<2x64xf32>
    %70 = math.exp %69 : vector<2x64xf32>
    %cst_37 = arith.constant 1.000000e+00 : f32
    %71 = vector.broadcast %cst_37 : f32 to vector<2x64xf32>
    %72 = arith.addf %71, %70 : vector<2x64xf32>
    %73 = arith.divf %71, %72 : vector<2x64xf32>
    %74 = vector.extract_strided_slice %73 {offsets = [0, 0], sizes = [2, 32], strides = [1, 1]} : vector<2x64xf32> to vector<2x32xf32>
    %75 = vector.extract_strided_slice %73 {offsets = [0, 32], sizes = [2, 32], strides = [1, 1]} : vector<2x64xf32> to vector<2x32xf32>
    %76 = vector.extract_strided_slice %65 {offsets = [0, 64], sizes = [2, 32], strides = [1, 1]} : vector<2x96xf32> to vector<2x32xf32>
    %77 = vector.extract_strided_slice %64 {offsets = [0, 64], sizes = [2, 32], strides = [1, 1]} : vector<2x96xf32> to vector<2x32xf32>
    %78 = arith.mulf %74, %77 : vector<2x32xf32>
    %79 = arith.addf %76, %78 : vector<2x32xf32>
    %80 = math.tanh %79 : vector<2x32xf32>
    %cst_38 = arith.constant 1.000000e+00 : f32
    %81 = vector.broadcast %cst_38 : f32 to vector<2x32xf32>
    %82 = arith.subf %81, %75 : vector<2x32xf32>
    %83 = arith.mulf %82, %80 : vector<2x32xf32>
    %84 = arith.mulf %75, %59 : vector<2x32xf32>
    %85 = arith.addf %83, %84 : vector<2x32xf32>
    %86 = vector.broadcast %57 : vector<10x1xf32> to vector<10x32xf32>
    %87 = arith.mulf %41, %86 : vector<10x32xf32>
    %c64 = arith.constant 64 : index
    %c0_39 = arith.constant 0 : index
    %88 = vector.load %arg5[%c64, %c0_39] : memref<166x96xf32, #tpu.memory_space<vmem>>, vector<32x96xf32>
    %cst_40 = arith.constant dense<0.000000e+00> : vector<10x96xf32>
    %89 = tpu.matmul %87, %88, %cst_40 {dimension_numbers = #tpu.dot_dimension_numbers<[1], [0], [0], [1], [0, 0, 1, 1], [], []>} : vector<10x32xf32>, vector<32x96xf32>, vector<10x96xf32> -> vector<10x96xf32>
    %c163_41 = arith.constant 163 : index
    %c0_42 = arith.constant 0 : index
    %90 = vector.load %arg5[%c163_41, %c0_42] : memref<166x96xf32, #tpu.memory_space<vmem>>, vector<1x96xf32>
    %91 = vector.broadcast %90 : vector<1x96xf32> to vector<10x96xf32>
    %92 = arith.addf %89, %91 : vector<10x96xf32>
    %93 = vector.extract_strided_slice %25 {offsets = [0, 0], sizes = [10, 96], strides = [1, 1]} : vector<40x96xf32> to vector<10x96xf32>
    %94 = vector.extract_strided_slice %93 {offsets = [0, 0], sizes = [10, 64], strides = [1, 1]} : vector<10x96xf32> to vector<10x64xf32>
    %95 = vector.extract_strided_slice %92 {offsets = [0, 0], sizes = [10, 64], strides = [1, 1]} : vector<10x96xf32> to vector<10x64xf32>
    %96 = arith.addf %94, %95 : vector<10x64xf32>
    %97 = arith.negf %96 : vector<10x64xf32>
    %98 = math.exp %97 : vector<10x64xf32>
    %cst_43 = arith.constant 1.000000e+00 : f32
    %99 = vector.broadcast %cst_43 : f32 to vector<10x64xf32>
    %100 = arith.addf %99, %98 : vector<10x64xf32>
    %101 = arith.divf %99, %100 : vector<10x64xf32>
    %102 = vector.extract_strided_slice %101 {offsets = [0, 0], sizes = [10, 32], strides = [1, 1]} : vector<10x64xf32> to vector<10x32xf32>
    %103 = vector.extract_strided_slice %101 {offsets = [0, 32], sizes = [10, 32], strides = [1, 1]} : vector<10x64xf32> to vector<10x32xf32>
    %104 = vector.extract_strided_slice %93 {offsets = [0, 64], sizes = [10, 32], strides = [1, 1]} : vector<10x96xf32> to vector<10x32xf32>
    %105 = vector.extract_strided_slice %92 {offsets = [0, 64], sizes = [10, 32], strides = [1, 1]} : vector<10x96xf32> to vector<10x32xf32>
    %106 = arith.mulf %102, %105 : vector<10x32xf32>
    %107 = arith.addf %104, %106 : vector<10x32xf32>
    %108 = math.tanh %107 : vector<10x32xf32>
    %cst_44 = arith.constant 1.000000e+00 : f32
    %109 = vector.broadcast %cst_44 : f32 to vector<10x32xf32>
    %110 = arith.subf %109, %103 : vector<10x32xf32>
    %111 = arith.mulf %110, %108 : vector<10x32xf32>
    %112 = arith.mulf %103, %87 : vector<10x32xf32>
    %113 = arith.addf %111, %112 : vector<10x32xf32>
    %c0_45 = arith.constant 0 : index
    %c0_46 = arith.constant 0 : index
    %114 = vector.load %arg6[%c0_45, %c0_46] : memref<164x16xf32, #tpu.memory_space<vmem>>, vector<32x16xf32>
    %cst_47 = arith.constant dense<0.000000e+00> : vector<2x16xf32>
    %115 = tpu.matmul %85, %114, %cst_47 {dimension_numbers = #tpu.dot_dimension_numbers<[1], [0], [0], [1], [0, 0, 1, 1], [], []>} : vector<2x32xf32>, vector<32x16xf32>, vector<2x16xf32> -> vector<2x16xf32>
    %c158 = arith.constant 158 : index
    %c0_48 = arith.constant 0 : index
    %116 = vector.load %arg6[%c158, %c0_48] : memref<164x16xf32, #tpu.memory_space<vmem>>, vector<1x16xf32>
    %117 = vector.broadcast %116 : vector<1x16xf32> to vector<2x16xf32>
    %118 = arith.addf %115, %117 : vector<2x16xf32>
    %c32 = arith.constant 32 : index
    %c0_49 = arith.constant 0 : index
    %119 = vector.load %arg6[%c32, %c0_49] : memref<164x16xf32, #tpu.memory_space<vmem>>, vector<32x16xf32>
    %cst_50 = arith.constant dense<0.000000e+00> : vector<10x16xf32>
    %120 = tpu.matmul %113, %119, %cst_50 {dimension_numbers = #tpu.dot_dimension_numbers<[1], [0], [0], [1], [0, 0, 1, 1], [], []>} : vector<10x32xf32>, vector<32x16xf32>, vector<10x16xf32> -> vector<10x16xf32>
    %c159 = arith.constant 159 : index
    %c0_51 = arith.constant 0 : index
    %121 = vector.load %arg6[%c159, %c0_51] : memref<164x16xf32, #tpu.memory_space<vmem>>, vector<1x16xf32>
    %122 = vector.broadcast %121 : vector<1x16xf32> to vector<10x16xf32>
    %123 = arith.addf %120, %122 : vector<10x16xf32>
    %cst_52 = arith.constant dense<0.000000e+00> : vector<2x10xf32>
    %124 = tpu.matmul %118, %123, %cst_52 {dimension_numbers = #tpu.dot_dimension_numbers<[1], [1], [0], [0], [0, 0, 1, 0], [], []>} : vector<2x16xf32>, vector<10x16xf32>, vector<2x10xf32> -> vector<2x10xf32>
    %cst_53 = arith.constant 1.250000e+00 : f32
    %125 = vector.broadcast %cst_53 : f32 to vector<2x10xf32>
    %126 = arith.mulf %124, %125 : vector<2x10xf32>
    %cst_54 = arith.constant -1.000000e+30 : f32
    %127 = vector.broadcast %cst_54 : f32 to vector<2x10xf32>
    %128 = arith.select %53, %126, %127 : vector<2x10xi1>, vector<2x10xf32>
    %cst_55 = arith.constant dense<0xFF800000> : vector<2xf32>
    %129 = vector.multi_reduction <maximumf>, %128, %cst_55 [1] : vector<2x10xf32> to vector<2xf32>
    %130 = vector.shape_cast %129 : vector<2xf32> to vector<2x1xf32>
    %131 = vector.broadcast %130 : vector<2x1xf32> to vector<2x10xf32>
    %132 = arith.subf %128, %131 : vector<2x10xf32>
    %133 = math.exp %132 : vector<2x10xf32>
    %cst_56 = arith.constant 0.000000e+00 : f32
    %134 = vector.broadcast %cst_56 : f32 to vector<2x10xf32>
    %135 = arith.select %53, %133, %134 : vector<2x10xi1>, vector<2x10xf32>
    %cst_57 = arith.constant dense<0.000000e+00> : vector<2xf32>
    %136 = vector.multi_reduction <add>, %135, %cst_57 [1] : vector<2x10xf32> to vector<2xf32>
    %137 = vector.shape_cast %136 : vector<2xf32> to vector<2x1xf32>
    %138 = tpu.reciprocal %137 {approx = true} : vector<2x1xf32> -> vector<2x1xf32>
    %139 = vector.broadcast %138 : vector<2x1xf32> to vector<2x10xf32>
    %140 = arith.mulf %135, %139 : vector<2x10xf32>
    %cst_58 = arith.constant dense<0.000000e+00> : vector<2x32xf32>
    %141 = tpu.matmul %140, %113, %cst_58 {dimension_numbers = #tpu.dot_dimension_numbers<[1], [0], [0], [1], [0, 0, 1, 1], [], []>} : vector<2x10xf32>, vector<10x32xf32>, vector<2x32xf32> -> vector<2x32xf32>
    %c64_59 = arith.constant 64 : index
    %c0_60 = arith.constant 0 : index
    %142 = vector.load %arg6[%c64_59, %c0_60] : memref<164x16xf32, #tpu.memory_space<vmem>>, vector<32x16xf32>
    %cst_61 = arith.constant dense<0.000000e+00> : vector<2x16xf32>
    %143 = tpu.matmul %85, %142, %cst_61 {dimension_numbers = #tpu.dot_dimension_numbers<[1], [0], [0], [1], [0, 0, 1, 1], [], []>} : vector<2x32xf32>, vector<32x16xf32>, vector<2x16xf32> -> vector<2x16xf32>
    %c96_62 = arith.constant 96 : index
    %c0_63 = arith.constant 0 : index
    %144 = vector.load %arg6[%c96_62, %c0_63] : memref<164x16xf32, #tpu.memory_space<vmem>>, vector<32x16xf32>
    %cst_64 = arith.constant dense<0.000000e+00> : vector<2x16xf32>
    %145 = tpu.matmul %141, %144, %cst_64 {dimension_numbers = #tpu.dot_dimension_numbers<[1], [0], [0], [1], [0, 0, 1, 1], [], []>} : vector<2x32xf32>, vector<32x16xf32>, vector<2x16xf32> -> vector<2x16xf32>
    %146 = arith.addf %143, %145 : vector<2x16xf32>
    %c160_65 = arith.constant 160 : index
    %c0_66 = arith.constant 0 : index
    %147 = vector.load %arg6[%c160_65, %c0_66] : memref<164x16xf32, #tpu.memory_space<vmem>>, vector<1x16xf32>
    %148 = vector.broadcast %147 : vector<1x16xf32> to vector<2x16xf32>
    %149 = arith.addf %146, %148 : vector<2x16xf32>
    %cst_67 = arith.constant 0.000000e+00 : f32
    %150 = vector.broadcast %cst_67 : f32 to vector<2x16xf32>
    %151 = arith.maximumf %149, %150 : vector<2x16xf32>
    %152 = vector.broadcast %56 : vector<2x1xf32> to vector<2x32xf32>
    %153 = arith.mulf %42, %152 : vector<2x32xf32>
    %c128_68 = arith.constant 128 : index
    %c0_69 = arith.constant 0 : index
    %154 = vector.load %arg5[%c128_68, %c0_69] : memref<166x96xf32, #tpu.memory_space<vmem>>, vector<32x96xf32>
    %cst_70 = arith.constant dense<0.000000e+00> : vector<2x96xf32>
    %155 = tpu.matmul %153, %154, %cst_70 {dimension_numbers = #tpu.dot_dimension_numbers<[1], [0], [0], [1], [0, 0, 1, 1], [], []>} : vector<2x32xf32>, vector<32x96xf32>, vector<2x96xf32> -> vector<2x96xf32>
    %c165 = arith.constant 165 : index
    %c0_71 = arith.constant 0 : index
    %156 = vector.load %arg5[%c165, %c0_71] : memref<166x96xf32, #tpu.memory_space<vmem>>, vector<1x96xf32>
    %157 = vector.broadcast %156 : vector<1x96xf32> to vector<2x96xf32>
    %158 = arith.addf %155, %157 : vector<2x96xf32>
    %159 = vector.extract_strided_slice %38 {offsets = [0, 0], sizes = [2, 96], strides = [1, 1]} : vector<8x96xf32> to vector<2x96xf32>
    %c112 = arith.constant 112 : index
    %c0_72 = arith.constant 0 : index
    %160 = vector.load %arg5[%c112, %c0_72] : memref<166x96xf32, #tpu.memory_space<vmem>>, vector<16x96xf32>
    %cst_73 = arith.constant dense<0.000000e+00> : vector<2x96xf32>
    %161 = tpu.matmul %151, %160, %cst_73 {dimension_numbers = #tpu.dot_dimension_numbers<[1], [0], [0], [1], [0, 0, 1, 1], [], []>} : vector<2x16xf32>, vector<16x96xf32>, vector<2x96xf32> -> vector<2x96xf32>
    %162 = arith.addf %159, %161 : vector<2x96xf32>
    %163 = vector.extract_strided_slice %162 {offsets = [0, 0], sizes = [2, 64], strides = [1, 1]} : vector<2x96xf32> to vector<2x64xf32>
    %164 = vector.extract_strided_slice %158 {offsets = [0, 0], sizes = [2, 64], strides = [1, 1]} : vector<2x96xf32> to vector<2x64xf32>
    %165 = arith.addf %163, %164 : vector<2x64xf32>
    %166 = arith.negf %165 : vector<2x64xf32>
    %167 = math.exp %166 : vector<2x64xf32>
    %cst_74 = arith.constant 1.000000e+00 : f32
    %168 = vector.broadcast %cst_74 : f32 to vector<2x64xf32>
    %169 = arith.addf %168, %167 : vector<2x64xf32>
    %170 = arith.divf %168, %169 : vector<2x64xf32>
    %171 = vector.extract_strided_slice %170 {offsets = [0, 0], sizes = [2, 32], strides = [1, 1]} : vector<2x64xf32> to vector<2x32xf32>
    %172 = vector.extract_strided_slice %170 {offsets = [0, 32], sizes = [2, 32], strides = [1, 1]} : vector<2x64xf32> to vector<2x32xf32>
    %173 = vector.extract_strided_slice %162 {offsets = [0, 64], sizes = [2, 32], strides = [1, 1]} : vector<2x96xf32> to vector<2x32xf32>
    %174 = vector.extract_strided_slice %158 {offsets = [0, 64], sizes = [2, 32], strides = [1, 1]} : vector<2x96xf32> to vector<2x32xf32>
    %175 = arith.mulf %171, %174 : vector<2x32xf32>
    %176 = arith.addf %173, %175 : vector<2x32xf32>
    %177 = math.tanh %176 : vector<2x32xf32>
    %cst_75 = arith.constant 1.000000e+00 : f32
    %178 = vector.broadcast %cst_75 : f32 to vector<2x32xf32>
    %179 = arith.subf %178, %172 : vector<2x32xf32>
    %180 = arith.mulf %179, %177 : vector<2x32xf32>
    %181 = arith.mulf %172, %153 : vector<2x32xf32>
    %182 = arith.addf %180, %181 : vector<2x32xf32>
    %c1 = arith.constant 1 : index
    %c0_76 = arith.constant 0 : index
    %c0_77 = arith.constant 0 : index
    %183 = vector.load %arg3[%c1, %c0_76, %c0_77] : memref<4x12x1xf32, #tpu.memory_space<vmem>>, vector<1x12x1xf32>
    %184 = vector.shape_cast %183 : vector<1x12x1xf32> to vector<12x1xf32>
    %185 = vector.extract_strided_slice %184 {offsets = [0, 0], sizes = [2, 1], strides = [1, 1]} : vector<12x1xf32> to vector<2x1xf32>
    %186 = vector.extract_strided_slice %184 {offsets = [2, 0], sizes = [10, 1], strides = [1, 1]} : vector<12x1xf32> to vector<10x1xf32>
    %187 = vector.broadcast %185 : vector<2x1xf32> to vector<2x32xf32>
    %188 = arith.mulf %85, %187 : vector<2x32xf32>
    %c16_78 = arith.constant 16 : index
    %c0_79 = arith.constant 0 : index
    %189 = vector.load %arg5[%c16_78, %c0_79] : memref<166x96xf32, #tpu.memory_space<vmem>>, vector<32x96xf32>
    %cst_80 = arith.constant dense<0.000000e+00> : vector<2x96xf32>
    %190 = tpu.matmul %188, %189, %cst_80 {dimension_numbers = #tpu.dot_dimension_numbers<[1], [0], [0], [1], [0, 0, 1, 1], [], []>} : vector<2x32xf32>, vector<32x96xf32>, vector<2x96xf32> -> vector<2x96xf32>
    %c161_81 = arith.constant 161 : index
    %c0_82 = arith.constant 0 : index
    %191 = vector.load %arg5[%c161_81, %c0_82] : memref<166x96xf32, #tpu.memory_space<vmem>>, vector<1x96xf32>
    %192 = vector.broadcast %191 : vector<1x96xf32> to vector<2x96xf32>
    %193 = arith.addf %190, %192 : vector<2x96xf32>
    %194 = vector.extract_strided_slice %12 {offsets = [2, 0], sizes = [2, 96], strides = [1, 1]} : vector<8x96xf32> to vector<2x96xf32>
    %195 = vector.extract_strided_slice %194 {offsets = [0, 0], sizes = [2, 64], strides = [1, 1]} : vector<2x96xf32> to vector<2x64xf32>
    %196 = vector.extract_strided_slice %193 {offsets = [0, 0], sizes = [2, 64], strides = [1, 1]} : vector<2x96xf32> to vector<2x64xf32>
    %197 = arith.addf %195, %196 : vector<2x64xf32>
    %198 = arith.negf %197 : vector<2x64xf32>
    %199 = math.exp %198 : vector<2x64xf32>
    %cst_83 = arith.constant 1.000000e+00 : f32
    %200 = vector.broadcast %cst_83 : f32 to vector<2x64xf32>
    %201 = arith.addf %200, %199 : vector<2x64xf32>
    %202 = arith.divf %200, %201 : vector<2x64xf32>
    %203 = vector.extract_strided_slice %202 {offsets = [0, 0], sizes = [2, 32], strides = [1, 1]} : vector<2x64xf32> to vector<2x32xf32>
    %204 = vector.extract_strided_slice %202 {offsets = [0, 32], sizes = [2, 32], strides = [1, 1]} : vector<2x64xf32> to vector<2x32xf32>
    %205 = vector.extract_strided_slice %194 {offsets = [0, 64], sizes = [2, 32], strides = [1, 1]} : vector<2x96xf32> to vector<2x32xf32>
    %206 = vector.extract_strided_slice %193 {offsets = [0, 64], sizes = [2, 32], strides = [1, 1]} : vector<2x96xf32> to vector<2x32xf32>
    %207 = arith.mulf %203, %206 : vector<2x32xf32>
    %208 = arith.addf %205, %207 : vector<2x32xf32>
    %209 = math.tanh %208 : vector<2x32xf32>
    %cst_84 = arith.constant 1.000000e+00 : f32
    %210 = vector.broadcast %cst_84 : f32 to vector<2x32xf32>
    %211 = arith.subf %210, %204 : vector<2x32xf32>
    %212 = arith.mulf %211, %209 : vector<2x32xf32>
    %213 = arith.mulf %204, %188 : vector<2x32xf32>
    %214 = arith.addf %212, %213 : vector<2x32xf32>
    %215 = vector.broadcast %186 : vector<10x1xf32> to vector<10x32xf32>
    %216 = arith.mulf %113, %215 : vector<10x32xf32>
    %c64_85 = arith.constant 64 : index
    %c0_86 = arith.constant 0 : index
    %217 = vector.load %arg5[%c64_85, %c0_86] : memref<166x96xf32, #tpu.memory_space<vmem>>, vector<32x96xf32>
    %cst_87 = arith.constant dense<0.000000e+00> : vector<10x96xf32>
    %218 = tpu.matmul %216, %217, %cst_87 {dimension_numbers = #tpu.dot_dimension_numbers<[1], [0], [0], [1], [0, 0, 1, 1], [], []>} : vector<10x32xf32>, vector<32x96xf32>, vector<10x96xf32> -> vector<10x96xf32>
    %c163_88 = arith.constant 163 : index
    %c0_89 = arith.constant 0 : index
    %219 = vector.load %arg5[%c163_88, %c0_89] : memref<166x96xf32, #tpu.memory_space<vmem>>, vector<1x96xf32>
    %220 = vector.broadcast %219 : vector<1x96xf32> to vector<10x96xf32>
    %221 = arith.addf %218, %220 : vector<10x96xf32>
    %222 = vector.extract_strided_slice %25 {offsets = [10, 0], sizes = [10, 96], strides = [1, 1]} : vector<40x96xf32> to vector<10x96xf32>
    %223 = vector.extract_strided_slice %222 {offsets = [0, 0], sizes = [10, 64], strides = [1, 1]} : vector<10x96xf32> to vector<10x64xf32>
    %224 = vector.extract_strided_slice %221 {offsets = [0, 0], sizes = [10, 64], strides = [1, 1]} : vector<10x96xf32> to vector<10x64xf32>
    %225 = arith.addf %223, %224 : vector<10x64xf32>
    %226 = arith.negf %225 : vector<10x64xf32>
    %227 = math.exp %226 : vector<10x64xf32>
    %cst_90 = arith.constant 1.000000e+00 : f32
    %228 = vector.broadcast %cst_90 : f32 to vector<10x64xf32>
    %229 = arith.addf %228, %227 : vector<10x64xf32>
    %230 = arith.divf %228, %229 : vector<10x64xf32>
    %231 = vector.extract_strided_slice %230 {offsets = [0, 0], sizes = [10, 32], strides = [1, 1]} : vector<10x64xf32> to vector<10x32xf32>
    %232 = vector.extract_strided_slice %230 {offsets = [0, 32], sizes = [10, 32], strides = [1, 1]} : vector<10x64xf32> to vector<10x32xf32>
    %233 = vector.extract_strided_slice %222 {offsets = [0, 64], sizes = [10, 32], strides = [1, 1]} : vector<10x96xf32> to vector<10x32xf32>
    %234 = vector.extract_strided_slice %221 {offsets = [0, 64], sizes = [10, 32], strides = [1, 1]} : vector<10x96xf32> to vector<10x32xf32>
    %235 = arith.mulf %231, %234 : vector<10x32xf32>
    %236 = arith.addf %233, %235 : vector<10x32xf32>
    %237 = math.tanh %236 : vector<10x32xf32>
    %cst_91 = arith.constant 1.000000e+00 : f32
    %238 = vector.broadcast %cst_91 : f32 to vector<10x32xf32>
    %239 = arith.subf %238, %232 : vector<10x32xf32>
    %240 = arith.mulf %239, %237 : vector<10x32xf32>
    %241 = arith.mulf %232, %216 : vector<10x32xf32>
    %242 = arith.addf %240, %241 : vector<10x32xf32>
    %c0_92 = arith.constant 0 : index
    %c0_93 = arith.constant 0 : index
    %243 = vector.load %arg6[%c0_92, %c0_93] : memref<164x16xf32, #tpu.memory_space<vmem>>, vector<32x16xf32>
    %cst_94 = arith.constant dense<0.000000e+00> : vector<2x16xf32>
    %244 = tpu.matmul %214, %243, %cst_94 {dimension_numbers = #tpu.dot_dimension_numbers<[1], [0], [0], [1], [0, 0, 1, 1], [], []>} : vector<2x32xf32>, vector<32x16xf32>, vector<2x16xf32> -> vector<2x16xf32>
    %c158_95 = arith.constant 158 : index
    %c0_96 = arith.constant 0 : index
    %245 = vector.load %arg6[%c158_95, %c0_96] : memref<164x16xf32, #tpu.memory_space<vmem>>, vector<1x16xf32>
    %246 = vector.broadcast %245 : vector<1x16xf32> to vector<2x16xf32>
    %247 = arith.addf %244, %246 : vector<2x16xf32>
    %c32_97 = arith.constant 32 : index
    %c0_98 = arith.constant 0 : index
    %248 = vector.load %arg6[%c32_97, %c0_98] : memref<164x16xf32, #tpu.memory_space<vmem>>, vector<32x16xf32>
    %cst_99 = arith.constant dense<0.000000e+00> : vector<10x16xf32>
    %249 = tpu.matmul %242, %248, %cst_99 {dimension_numbers = #tpu.dot_dimension_numbers<[1], [0], [0], [1], [0, 0, 1, 1], [], []>} : vector<10x32xf32>, vector<32x16xf32>, vector<10x16xf32> -> vector<10x16xf32>
    %c159_100 = arith.constant 159 : index
    %c0_101 = arith.constant 0 : index
    %250 = vector.load %arg6[%c159_100, %c0_101] : memref<164x16xf32, #tpu.memory_space<vmem>>, vector<1x16xf32>
    %251 = vector.broadcast %250 : vector<1x16xf32> to vector<10x16xf32>
    %252 = arith.addf %249, %251 : vector<10x16xf32>
    %cst_102 = arith.constant dense<0.000000e+00> : vector<2x10xf32>
    %253 = tpu.matmul %247, %252, %cst_102 {dimension_numbers = #tpu.dot_dimension_numbers<[1], [1], [0], [0], [0, 0, 1, 0], [], []>} : vector<2x16xf32>, vector<10x16xf32>, vector<2x10xf32> -> vector<2x10xf32>
    %cst_103 = arith.constant 1.250000e+00 : f32
    %254 = vector.broadcast %cst_103 : f32 to vector<2x10xf32>
    %255 = arith.mulf %253, %254 : vector<2x10xf32>
    %cst_104 = arith.constant -1.000000e+30 : f32
    %256 = vector.broadcast %cst_104 : f32 to vector<2x10xf32>
    %257 = arith.select %53, %255, %256 : vector<2x10xi1>, vector<2x10xf32>
    %cst_105 = arith.constant dense<0xFF800000> : vector<2xf32>
    %258 = vector.multi_reduction <maximumf>, %257, %cst_105 [1] : vector<2x10xf32> to vector<2xf32>
    %259 = vector.shape_cast %258 : vector<2xf32> to vector<2x1xf32>
    %260 = vector.broadcast %259 : vector<2x1xf32> to vector<2x10xf32>
    %261 = arith.subf %257, %260 : vector<2x10xf32>
    %262 = math.exp %261 : vector<2x10xf32>
    %cst_106 = arith.constant 0.000000e+00 : f32
    %263 = vector.broadcast %cst_106 : f32 to vector<2x10xf32>
    %264 = arith.select %53, %262, %263 : vector<2x10xi1>, vector<2x10xf32>
    %cst_107 = arith.constant dense<0.000000e+00> : vector<2xf32>
    %265 = vector.multi_reduction <add>, %264, %cst_107 [1] : vector<2x10xf32> to vector<2xf32>
    %266 = vector.shape_cast %265 : vector<2xf32> to vector<2x1xf32>
    %267 = tpu.reciprocal %266 {approx = true} : vector<2x1xf32> -> vector<2x1xf32>
    %268 = vector.broadcast %267 : vector<2x1xf32> to vector<2x10xf32>
    %269 = arith.mulf %264, %268 : vector<2x10xf32>
    %cst_108 = arith.constant dense<0.000000e+00> : vector<2x32xf32>
    %270 = tpu.matmul %269, %242, %cst_108 {dimension_numbers = #tpu.dot_dimension_numbers<[1], [0], [0], [1], [0, 0, 1, 1], [], []>} : vector<2x10xf32>, vector<10x32xf32>, vector<2x32xf32> -> vector<2x32xf32>
    %c64_109 = arith.constant 64 : index
    %c0_110 = arith.constant 0 : index
    %271 = vector.load %arg6[%c64_109, %c0_110] : memref<164x16xf32, #tpu.memory_space<vmem>>, vector<32x16xf32>
    %cst_111 = arith.constant dense<0.000000e+00> : vector<2x16xf32>
    %272 = tpu.matmul %214, %271, %cst_111 {dimension_numbers = #tpu.dot_dimension_numbers<[1], [0], [0], [1], [0, 0, 1, 1], [], []>} : vector<2x32xf32>, vector<32x16xf32>, vector<2x16xf32> -> vector<2x16xf32>
    %c96_112 = arith.constant 96 : index
    %c0_113 = arith.constant 0 : index
    %273 = vector.load %arg6[%c96_112, %c0_113] : memref<164x16xf32, #tpu.memory_space<vmem>>, vector<32x16xf32>
    %cst_114 = arith.constant dense<0.000000e+00> : vector<2x16xf32>
    %274 = tpu.matmul %270, %273, %cst_114 {dimension_numbers = #tpu.dot_dimension_numbers<[1], [0], [0], [1], [0, 0, 1, 1], [], []>} : vector<2x32xf32>, vector<32x16xf32>, vector<2x16xf32> -> vector<2x16xf32>
    %275 = arith.addf %272, %274 : vector<2x16xf32>
    %c160_115 = arith.constant 160 : index
    %c0_116 = arith.constant 0 : index
    %276 = vector.load %arg6[%c160_115, %c0_116] : memref<164x16xf32, #tpu.memory_space<vmem>>, vector<1x16xf32>
    %277 = vector.broadcast %276 : vector<1x16xf32> to vector<2x16xf32>
    %278 = arith.addf %275, %277 : vector<2x16xf32>
    %cst_117 = arith.constant 0.000000e+00 : f32
    %279 = vector.broadcast %cst_117 : f32 to vector<2x16xf32>
    %280 = arith.maximumf %278, %279 : vector<2x16xf32>
    %281 = vector.broadcast %185 : vector<2x1xf32> to vector<2x32xf32>
    %282 = arith.mulf %182, %281 : vector<2x32xf32>
    %c128_118 = arith.constant 128 : index
    %c0_119 = arith.constant 0 : index
    %283 = vector.load %arg5[%c128_118, %c0_119] : memref<166x96xf32, #tpu.memory_space<vmem>>, vector<32x96xf32>
    %cst_120 = arith.constant dense<0.000000e+00> : vector<2x96xf32>
    %284 = tpu.matmul %282, %283, %cst_120 {dimension_numbers = #tpu.dot_dimension_numbers<[1], [0], [0], [1], [0, 0, 1, 1], [], []>} : vector<2x32xf32>, vector<32x96xf32>, vector<2x96xf32> -> vector<2x96xf32>
    %c165_121 = arith.constant 165 : index
    %c0_122 = arith.constant 0 : index
    %285 = vector.load %arg5[%c165_121, %c0_122] : memref<166x96xf32, #tpu.memory_space<vmem>>, vector<1x96xf32>
    %286 = vector.broadcast %285 : vector<1x96xf32> to vector<2x96xf32>
    %287 = arith.addf %284, %286 : vector<2x96xf32>
    %288 = vector.extract_strided_slice %38 {offsets = [2, 0], sizes = [2, 96], strides = [1, 1]} : vector<8x96xf32> to vector<2x96xf32>
    %c112_123 = arith.constant 112 : index
    %c0_124 = arith.constant 0 : index
    %289 = vector.load %arg5[%c112_123, %c0_124] : memref<166x96xf32, #tpu.memory_space<vmem>>, vector<16x96xf32>
    %cst_125 = arith.constant dense<0.000000e+00> : vector<2x96xf32>
    %290 = tpu.matmul %280, %289, %cst_125 {dimension_numbers = #tpu.dot_dimension_numbers<[1], [0], [0], [1], [0, 0, 1, 1], [], []>} : vector<2x16xf32>, vector<16x96xf32>, vector<2x96xf32> -> vector<2x96xf32>
    %291 = arith.addf %288, %290 : vector<2x96xf32>
    %292 = vector.extract_strided_slice %291 {offsets = [0, 0], sizes = [2, 64], strides = [1, 1]} : vector<2x96xf32> to vector<2x64xf32>
    %293 = vector.extract_strided_slice %287 {offsets = [0, 0], sizes = [2, 64], strides = [1, 1]} : vector<2x96xf32> to vector<2x64xf32>
    %294 = arith.addf %292, %293 : vector<2x64xf32>
    %295 = arith.negf %294 : vector<2x64xf32>
    %296 = math.exp %295 : vector<2x64xf32>
    %cst_126 = arith.constant 1.000000e+00 : f32
    %297 = vector.broadcast %cst_126 : f32 to vector<2x64xf32>
    %298 = arith.addf %297, %296 : vector<2x64xf32>
    %299 = arith.divf %297, %298 : vector<2x64xf32>
    %300 = vector.extract_strided_slice %299 {offsets = [0, 0], sizes = [2, 32], strides = [1, 1]} : vector<2x64xf32> to vector<2x32xf32>
    %301 = vector.extract_strided_slice %299 {offsets = [0, 32], sizes = [2, 32], strides = [1, 1]} : vector<2x64xf32> to vector<2x32xf32>
    %302 = vector.extract_strided_slice %291 {offsets = [0, 64], sizes = [2, 32], strides = [1, 1]} : vector<2x96xf32> to vector<2x32xf32>
    %303 = vector.extract_strided_slice %287 {offsets = [0, 64], sizes = [2, 32], strides = [1, 1]} : vector<2x96xf32> to vector<2x32xf32>
    %304 = arith.mulf %300, %303 : vector<2x32xf32>
    %305 = arith.addf %302, %304 : vector<2x32xf32>
    %306 = math.tanh %305 : vector<2x32xf32>
    %cst_127 = arith.constant 1.000000e+00 : f32
    %307 = vector.broadcast %cst_127 : f32 to vector<2x32xf32>
    %308 = arith.subf %307, %301 : vector<2x32xf32>
    %309 = arith.mulf %308, %306 : vector<2x32xf32>
    %310 = arith.mulf %301, %282 : vector<2x32xf32>
    %311 = arith.addf %309, %310 : vector<2x32xf32>
    %c2 = arith.constant 2 : index
    %c0_128 = arith.constant 0 : index
    %c0_129 = arith.constant 0 : index
    %312 = vector.load %arg3[%c2, %c0_128, %c0_129] : memref<4x12x1xf32, #tpu.memory_space<vmem>>, vector<1x12x1xf32>
    %313 = vector.shape_cast %312 : vector<1x12x1xf32> to vector<12x1xf32>
    %314 = vector.extract_strided_slice %313 {offsets = [0, 0], sizes = [2, 1], strides = [1, 1]} : vector<12x1xf32> to vector<2x1xf32>
    %315 = vector.extract_strided_slice %313 {offsets = [2, 0], sizes = [10, 1], strides = [1, 1]} : vector<12x1xf32> to vector<10x1xf32>
    %316 = vector.broadcast %314 : vector<2x1xf32> to vector<2x32xf32>
    %317 = arith.mulf %214, %316 : vector<2x32xf32>
    %c16_130 = arith.constant 16 : index
    %c0_131 = arith.constant 0 : index
    %318 = vector.load %arg5[%c16_130, %c0_131] : memref<166x96xf32, #tpu.memory_space<vmem>>, vector<32x96xf32>
    %cst_132 = arith.constant dense<0.000000e+00> : vector<2x96xf32>
    %319 = tpu.matmul %317, %318, %cst_132 {dimension_numbers = #tpu.dot_dimension_numbers<[1], [0], [0], [1], [0, 0, 1, 1], [], []>} : vector<2x32xf32>, vector<32x96xf32>, vector<2x96xf32> -> vector<2x96xf32>
    %c161_133 = arith.constant 161 : index
    %c0_134 = arith.constant 0 : index
    %320 = vector.load %arg5[%c161_133, %c0_134] : memref<166x96xf32, #tpu.memory_space<vmem>>, vector<1x96xf32>
    %321 = vector.broadcast %320 : vector<1x96xf32> to vector<2x96xf32>
    %322 = arith.addf %319, %321 : vector<2x96xf32>
    %323 = vector.extract_strided_slice %12 {offsets = [4, 0], sizes = [2, 96], strides = [1, 1]} : vector<8x96xf32> to vector<2x96xf32>
    %324 = vector.extract_strided_slice %323 {offsets = [0, 0], sizes = [2, 64], strides = [1, 1]} : vector<2x96xf32> to vector<2x64xf32>
    %325 = vector.extract_strided_slice %322 {offsets = [0, 0], sizes = [2, 64], strides = [1, 1]} : vector<2x96xf32> to vector<2x64xf32>
    %326 = arith.addf %324, %325 : vector<2x64xf32>
    %327 = arith.negf %326 : vector<2x64xf32>
    %328 = math.exp %327 : vector<2x64xf32>
    %cst_135 = arith.constant 1.000000e+00 : f32
    %329 = vector.broadcast %cst_135 : f32 to vector<2x64xf32>
    %330 = arith.addf %329, %328 : vector<2x64xf32>
    %331 = arith.divf %329, %330 : vector<2x64xf32>
    %332 = vector.extract_strided_slice %331 {offsets = [0, 0], sizes = [2, 32], strides = [1, 1]} : vector<2x64xf32> to vector<2x32xf32>
    %333 = vector.extract_strided_slice %331 {offsets = [0, 32], sizes = [2, 32], strides = [1, 1]} : vector<2x64xf32> to vector<2x32xf32>
    %334 = vector.extract_strided_slice %323 {offsets = [0, 64], sizes = [2, 32], strides = [1, 1]} : vector<2x96xf32> to vector<2x32xf32>
    %335 = vector.extract_strided_slice %322 {offsets = [0, 64], sizes = [2, 32], strides = [1, 1]} : vector<2x96xf32> to vector<2x32xf32>
    %336 = arith.mulf %332, %335 : vector<2x32xf32>
    %337 = arith.addf %334, %336 : vector<2x32xf32>
    %338 = math.tanh %337 : vector<2x32xf32>
    %cst_136 = arith.constant 1.000000e+00 : f32
    %339 = vector.broadcast %cst_136 : f32 to vector<2x32xf32>
    %340 = arith.subf %339, %333 : vector<2x32xf32>
    %341 = arith.mulf %340, %338 : vector<2x32xf32>
    %342 = arith.mulf %333, %317 : vector<2x32xf32>
    %343 = arith.addf %341, %342 : vector<2x32xf32>
    %344 = vector.broadcast %315 : vector<10x1xf32> to vector<10x32xf32>
    %345 = arith.mulf %242, %344 : vector<10x32xf32>
    %c64_137 = arith.constant 64 : index
    %c0_138 = arith.constant 0 : index
    %346 = vector.load %arg5[%c64_137, %c0_138] : memref<166x96xf32, #tpu.memory_space<vmem>>, vector<32x96xf32>
    %cst_139 = arith.constant dense<0.000000e+00> : vector<10x96xf32>
    %347 = tpu.matmul %345, %346, %cst_139 {dimension_numbers = #tpu.dot_dimension_numbers<[1], [0], [0], [1], [0, 0, 1, 1], [], []>} : vector<10x32xf32>, vector<32x96xf32>, vector<10x96xf32> -> vector<10x96xf32>
    %c163_140 = arith.constant 163 : index
    %c0_141 = arith.constant 0 : index
    %348 = vector.load %arg5[%c163_140, %c0_141] : memref<166x96xf32, #tpu.memory_space<vmem>>, vector<1x96xf32>
    %349 = vector.broadcast %348 : vector<1x96xf32> to vector<10x96xf32>
    %350 = arith.addf %347, %349 : vector<10x96xf32>
    %351 = vector.extract_strided_slice %25 {offsets = [20, 0], sizes = [10, 96], strides = [1, 1]} : vector<40x96xf32> to vector<10x96xf32>
    %352 = vector.extract_strided_slice %351 {offsets = [0, 0], sizes = [10, 64], strides = [1, 1]} : vector<10x96xf32> to vector<10x64xf32>
    %353 = vector.extract_strided_slice %350 {offsets = [0, 0], sizes = [10, 64], strides = [1, 1]} : vector<10x96xf32> to vector<10x64xf32>
    %354 = arith.addf %352, %353 : vector<10x64xf32>
    %355 = arith.negf %354 : vector<10x64xf32>
    %356 = math.exp %355 : vector<10x64xf32>
    %cst_142 = arith.constant 1.000000e+00 : f32
    %357 = vector.broadcast %cst_142 : f32 to vector<10x64xf32>
    %358 = arith.addf %357, %356 : vector<10x64xf32>
    %359 = arith.divf %357, %358 : vector<10x64xf32>
    %360 = vector.extract_strided_slice %359 {offsets = [0, 0], sizes = [10, 32], strides = [1, 1]} : vector<10x64xf32> to vector<10x32xf32>
    %361 = vector.extract_strided_slice %359 {offsets = [0, 32], sizes = [10, 32], strides = [1, 1]} : vector<10x64xf32> to vector<10x32xf32>
    %362 = vector.extract_strided_slice %351 {offsets = [0, 64], sizes = [10, 32], strides = [1, 1]} : vector<10x96xf32> to vector<10x32xf32>
    %363 = vector.extract_strided_slice %350 {offsets = [0, 64], sizes = [10, 32], strides = [1, 1]} : vector<10x96xf32> to vector<10x32xf32>
    %364 = arith.mulf %360, %363 : vector<10x32xf32>
    %365 = arith.addf %362, %364 : vector<10x32xf32>
    %366 = math.tanh %365 : vector<10x32xf32>
    %cst_143 = arith.constant 1.000000e+00 : f32
    %367 = vector.broadcast %cst_143 : f32 to vector<10x32xf32>
    %368 = arith.subf %367, %361 : vector<10x32xf32>
    %369 = arith.mulf %368, %366 : vector<10x32xf32>
    %370 = arith.mulf %361, %345 : vector<10x32xf32>
    %371 = arith.addf %369, %370 : vector<10x32xf32>
    %c0_144 = arith.constant 0 : index
    %c0_145 = arith.constant 0 : index
    %372 = vector.load %arg6[%c0_144, %c0_145] : memref<164x16xf32, #tpu.memory_space<vmem>>, vector<32x16xf32>
    %cst_146 = arith.constant dense<0.000000e+00> : vector<2x16xf32>
    %373 = tpu.matmul %343, %372, %cst_146 {dimension_numbers = #tpu.dot_dimension_numbers<[1], [0], [0], [1], [0, 0, 1, 1], [], []>} : vector<2x32xf32>, vector<32x16xf32>, vector<2x16xf32> -> vector<2x16xf32>
    %c158_147 = arith.constant 158 : index
    %c0_148 = arith.constant 0 : index
    %374 = vector.load %arg6[%c158_147, %c0_148] : memref<164x16xf32, #tpu.memory_space<vmem>>, vector<1x16xf32>
    %375 = vector.broadcast %374 : vector<1x16xf32> to vector<2x16xf32>
    %376 = arith.addf %373, %375 : vector<2x16xf32>
    %c32_149 = arith.constant 32 : index
    %c0_150 = arith.constant 0 : index
    %377 = vector.load %arg6[%c32_149, %c0_150] : memref<164x16xf32, #tpu.memory_space<vmem>>, vector<32x16xf32>
    %cst_151 = arith.constant dense<0.000000e+00> : vector<10x16xf32>
    %378 = tpu.matmul %371, %377, %cst_151 {dimension_numbers = #tpu.dot_dimension_numbers<[1], [0], [0], [1], [0, 0, 1, 1], [], []>} : vector<10x32xf32>, vector<32x16xf32>, vector<10x16xf32> -> vector<10x16xf32>
    %c159_152 = arith.constant 159 : index
    %c0_153 = arith.constant 0 : index
    %379 = vector.load %arg6[%c159_152, %c0_153] : memref<164x16xf32, #tpu.memory_space<vmem>>, vector<1x16xf32>
    %380 = vector.broadcast %379 : vector<1x16xf32> to vector<10x16xf32>
    %381 = arith.addf %378, %380 : vector<10x16xf32>
    %cst_154 = arith.constant dense<0.000000e+00> : vector<2x10xf32>
    %382 = tpu.matmul %376, %381, %cst_154 {dimension_numbers = #tpu.dot_dimension_numbers<[1], [1], [0], [0], [0, 0, 1, 0], [], []>} : vector<2x16xf32>, vector<10x16xf32>, vector<2x10xf32> -> vector<2x10xf32>
    %cst_155 = arith.constant 1.250000e+00 : f32
    %383 = vector.broadcast %cst_155 : f32 to vector<2x10xf32>
    %384 = arith.mulf %382, %383 : vector<2x10xf32>
    %cst_156 = arith.constant -1.000000e+30 : f32
    %385 = vector.broadcast %cst_156 : f32 to vector<2x10xf32>
    %386 = arith.select %53, %384, %385 : vector<2x10xi1>, vector<2x10xf32>
    %cst_157 = arith.constant dense<0xFF800000> : vector<2xf32>
    %387 = vector.multi_reduction <maximumf>, %386, %cst_157 [1] : vector<2x10xf32> to vector<2xf32>
    %388 = vector.shape_cast %387 : vector<2xf32> to vector<2x1xf32>
    %389 = vector.broadcast %388 : vector<2x1xf32> to vector<2x10xf32>
    %390 = arith.subf %386, %389 : vector<2x10xf32>
    %391 = math.exp %390 : vector<2x10xf32>
    %cst_158 = arith.constant 0.000000e+00 : f32
    %392 = vector.broadcast %cst_158 : f32 to vector<2x10xf32>
    %393 = arith.select %53, %391, %392 : vector<2x10xi1>, vector<2x10xf32>
    %cst_159 = arith.constant dense<0.000000e+00> : vector<2xf32>
    %394 = vector.multi_reduction <add>, %393, %cst_159 [1] : vector<2x10xf32> to vector<2xf32>
    %395 = vector.shape_cast %394 : vector<2xf32> to vector<2x1xf32>
    %396 = tpu.reciprocal %395 {approx = true} : vector<2x1xf32> -> vector<2x1xf32>
    %397 = vector.broadcast %396 : vector<2x1xf32> to vector<2x10xf32>
    %398 = arith.mulf %393, %397 : vector<2x10xf32>
    %cst_160 = arith.constant dense<0.000000e+00> : vector<2x32xf32>
    %399 = tpu.matmul %398, %371, %cst_160 {dimension_numbers = #tpu.dot_dimension_numbers<[1], [0], [0], [1], [0, 0, 1, 1], [], []>} : vector<2x10xf32>, vector<10x32xf32>, vector<2x32xf32> -> vector<2x32xf32>
    %c64_161 = arith.constant 64 : index
    %c0_162 = arith.constant 0 : index
    %400 = vector.load %arg6[%c64_161, %c0_162] : memref<164x16xf32, #tpu.memory_space<vmem>>, vector<32x16xf32>
    %cst_163 = arith.constant dense<0.000000e+00> : vector<2x16xf32>
    %401 = tpu.matmul %343, %400, %cst_163 {dimension_numbers = #tpu.dot_dimension_numbers<[1], [0], [0], [1], [0, 0, 1, 1], [], []>} : vector<2x32xf32>, vector<32x16xf32>, vector<2x16xf32> -> vector<2x16xf32>
    %c96_164 = arith.constant 96 : index
    %c0_165 = arith.constant 0 : index
    %402 = vector.load %arg6[%c96_164, %c0_165] : memref<164x16xf32, #tpu.memory_space<vmem>>, vector<32x16xf32>
    %cst_166 = arith.constant dense<0.000000e+00> : vector<2x16xf32>
    %403 = tpu.matmul %399, %402, %cst_166 {dimension_numbers = #tpu.dot_dimension_numbers<[1], [0], [0], [1], [0, 0, 1, 1], [], []>} : vector<2x32xf32>, vector<32x16xf32>, vector<2x16xf32> -> vector<2x16xf32>
    %404 = arith.addf %401, %403 : vector<2x16xf32>
    %c160_167 = arith.constant 160 : index
    %c0_168 = arith.constant 0 : index
    %405 = vector.load %arg6[%c160_167, %c0_168] : memref<164x16xf32, #tpu.memory_space<vmem>>, vector<1x16xf32>
    %406 = vector.broadcast %405 : vector<1x16xf32> to vector<2x16xf32>
    %407 = arith.addf %404, %406 : vector<2x16xf32>
    %cst_169 = arith.constant 0.000000e+00 : f32
    %408 = vector.broadcast %cst_169 : f32 to vector<2x16xf32>
    %409 = arith.maximumf %407, %408 : vector<2x16xf32>
    %410 = vector.broadcast %314 : vector<2x1xf32> to vector<2x32xf32>
    %411 = arith.mulf %311, %410 : vector<2x32xf32>
    %c128_170 = arith.constant 128 : index
    %c0_171 = arith.constant 0 : index
    %412 = vector.load %arg5[%c128_170, %c0_171] : memref<166x96xf32, #tpu.memory_space<vmem>>, vector<32x96xf32>
    %cst_172 = arith.constant dense<0.000000e+00> : vector<2x96xf32>
    %413 = tpu.matmul %411, %412, %cst_172 {dimension_numbers = #tpu.dot_dimension_numbers<[1], [0], [0], [1], [0, 0, 1, 1], [], []>} : vector<2x32xf32>, vector<32x96xf32>, vector<2x96xf32> -> vector<2x96xf32>
    %c165_173 = arith.constant 165 : index
    %c0_174 = arith.constant 0 : index
    %414 = vector.load %arg5[%c165_173, %c0_174] : memref<166x96xf32, #tpu.memory_space<vmem>>, vector<1x96xf32>
    %415 = vector.broadcast %414 : vector<1x96xf32> to vector<2x96xf32>
    %416 = arith.addf %413, %415 : vector<2x96xf32>
    %417 = vector.extract_strided_slice %38 {offsets = [4, 0], sizes = [2, 96], strides = [1, 1]} : vector<8x96xf32> to vector<2x96xf32>
    %c112_175 = arith.constant 112 : index
    %c0_176 = arith.constant 0 : index
    %418 = vector.load %arg5[%c112_175, %c0_176] : memref<166x96xf32, #tpu.memory_space<vmem>>, vector<16x96xf32>
    %cst_177 = arith.constant dense<0.000000e+00> : vector<2x96xf32>
    %419 = tpu.matmul %409, %418, %cst_177 {dimension_numbers = #tpu.dot_dimension_numbers<[1], [0], [0], [1], [0, 0, 1, 1], [], []>} : vector<2x16xf32>, vector<16x96xf32>, vector<2x96xf32> -> vector<2x96xf32>
    %420 = arith.addf %417, %419 : vector<2x96xf32>
    %421 = vector.extract_strided_slice %420 {offsets = [0, 0], sizes = [2, 64], strides = [1, 1]} : vector<2x96xf32> to vector<2x64xf32>
    %422 = vector.extract_strided_slice %416 {offsets = [0, 0], sizes = [2, 64], strides = [1, 1]} : vector<2x96xf32> to vector<2x64xf32>
    %423 = arith.addf %421, %422 : vector<2x64xf32>
    %424 = arith.negf %423 : vector<2x64xf32>
    %425 = math.exp %424 : vector<2x64xf32>
    %cst_178 = arith.constant 1.000000e+00 : f32
    %426 = vector.broadcast %cst_178 : f32 to vector<2x64xf32>
    %427 = arith.addf %426, %425 : vector<2x64xf32>
    %428 = arith.divf %426, %427 : vector<2x64xf32>
    %429 = vector.extract_strided_slice %428 {offsets = [0, 0], sizes = [2, 32], strides = [1, 1]} : vector<2x64xf32> to vector<2x32xf32>
    %430 = vector.extract_strided_slice %428 {offsets = [0, 32], sizes = [2, 32], strides = [1, 1]} : vector<2x64xf32> to vector<2x32xf32>
    %431 = vector.extract_strided_slice %420 {offsets = [0, 64], sizes = [2, 32], strides = [1, 1]} : vector<2x96xf32> to vector<2x32xf32>
    %432 = vector.extract_strided_slice %416 {offsets = [0, 64], sizes = [2, 32], strides = [1, 1]} : vector<2x96xf32> to vector<2x32xf32>
    %433 = arith.mulf %429, %432 : vector<2x32xf32>
    %434 = arith.addf %431, %433 : vector<2x32xf32>
    %435 = math.tanh %434 : vector<2x32xf32>
    %cst_179 = arith.constant 1.000000e+00 : f32
    %436 = vector.broadcast %cst_179 : f32 to vector<2x32xf32>
    %437 = arith.subf %436, %430 : vector<2x32xf32>
    %438 = arith.mulf %437, %435 : vector<2x32xf32>
    %439 = arith.mulf %430, %411 : vector<2x32xf32>
    %440 = arith.addf %438, %439 : vector<2x32xf32>
    %c3 = arith.constant 3 : index
    %c0_180 = arith.constant 0 : index
    %c0_181 = arith.constant 0 : index
    %441 = vector.load %arg3[%c3, %c0_180, %c0_181] : memref<4x12x1xf32, #tpu.memory_space<vmem>>, vector<1x12x1xf32>
    %442 = vector.shape_cast %441 : vector<1x12x1xf32> to vector<12x1xf32>
    %443 = vector.extract_strided_slice %442 {offsets = [0, 0], sizes = [2, 1], strides = [1, 1]} : vector<12x1xf32> to vector<2x1xf32>
    %444 = vector.extract_strided_slice %442 {offsets = [2, 0], sizes = [10, 1], strides = [1, 1]} : vector<12x1xf32> to vector<10x1xf32>
    %445 = vector.broadcast %443 : vector<2x1xf32> to vector<2x32xf32>
    %446 = arith.mulf %343, %445 : vector<2x32xf32>
    %c16_182 = arith.constant 16 : index
    %c0_183 = arith.constant 0 : index
    %447 = vector.load %arg5[%c16_182, %c0_183] : memref<166x96xf32, #tpu.memory_space<vmem>>, vector<32x96xf32>
    %cst_184 = arith.constant dense<0.000000e+00> : vector<2x96xf32>
    %448 = tpu.matmul %446, %447, %cst_184 {dimension_numbers = #tpu.dot_dimension_numbers<[1], [0], [0], [1], [0, 0, 1, 1], [], []>} : vector<2x32xf32>, vector<32x96xf32>, vector<2x96xf32> -> vector<2x96xf32>
    %c161_185 = arith.constant 161 : index
    %c0_186 = arith.constant 0 : index
    %449 = vector.load %arg5[%c161_185, %c0_186] : memref<166x96xf32, #tpu.memory_space<vmem>>, vector<1x96xf32>
    %450 = vector.broadcast %449 : vector<1x96xf32> to vector<2x96xf32>
    %451 = arith.addf %448, %450 : vector<2x96xf32>
    %452 = vector.extract_strided_slice %12 {offsets = [6, 0], sizes = [2, 96], strides = [1, 1]} : vector<8x96xf32> to vector<2x96xf32>
    %453 = vector.extract_strided_slice %452 {offsets = [0, 0], sizes = [2, 64], strides = [1, 1]} : vector<2x96xf32> to vector<2x64xf32>
    %454 = vector.extract_strided_slice %451 {offsets = [0, 0], sizes = [2, 64], strides = [1, 1]} : vector<2x96xf32> to vector<2x64xf32>
    %455 = arith.addf %453, %454 : vector<2x64xf32>
    %456 = arith.negf %455 : vector<2x64xf32>
    %457 = math.exp %456 : vector<2x64xf32>
    %cst_187 = arith.constant 1.000000e+00 : f32
    %458 = vector.broadcast %cst_187 : f32 to vector<2x64xf32>
    %459 = arith.addf %458, %457 : vector<2x64xf32>
    %460 = arith.divf %458, %459 : vector<2x64xf32>
    %461 = vector.extract_strided_slice %460 {offsets = [0, 0], sizes = [2, 32], strides = [1, 1]} : vector<2x64xf32> to vector<2x32xf32>
    %462 = vector.extract_strided_slice %460 {offsets = [0, 32], sizes = [2, 32], strides = [1, 1]} : vector<2x64xf32> to vector<2x32xf32>
    %463 = vector.extract_strided_slice %452 {offsets = [0, 64], sizes = [2, 32], strides = [1, 1]} : vector<2x96xf32> to vector<2x32xf32>
    %464 = vector.extract_strided_slice %451 {offsets = [0, 64], sizes = [2, 32], strides = [1, 1]} : vector<2x96xf32> to vector<2x32xf32>
    %465 = arith.mulf %461, %464 : vector<2x32xf32>
    %466 = arith.addf %463, %465 : vector<2x32xf32>
    %467 = math.tanh %466 : vector<2x32xf32>
    %cst_188 = arith.constant 1.000000e+00 : f32
    %468 = vector.broadcast %cst_188 : f32 to vector<2x32xf32>
    %469 = arith.subf %468, %462 : vector<2x32xf32>
    %470 = arith.mulf %469, %467 : vector<2x32xf32>
    %471 = arith.mulf %462, %446 : vector<2x32xf32>
    %472 = arith.addf %470, %471 : vector<2x32xf32>
    %473 = vector.broadcast %444 : vector<10x1xf32> to vector<10x32xf32>
    %474 = arith.mulf %371, %473 : vector<10x32xf32>
    %c64_189 = arith.constant 64 : index
    %c0_190 = arith.constant 0 : index
    %475 = vector.load %arg5[%c64_189, %c0_190] : memref<166x96xf32, #tpu.memory_space<vmem>>, vector<32x96xf32>
    %cst_191 = arith.constant dense<0.000000e+00> : vector<10x96xf32>
    %476 = tpu.matmul %474, %475, %cst_191 {dimension_numbers = #tpu.dot_dimension_numbers<[1], [0], [0], [1], [0, 0, 1, 1], [], []>} : vector<10x32xf32>, vector<32x96xf32>, vector<10x96xf32> -> vector<10x96xf32>
    %c163_192 = arith.constant 163 : index
    %c0_193 = arith.constant 0 : index
    %477 = vector.load %arg5[%c163_192, %c0_193] : memref<166x96xf32, #tpu.memory_space<vmem>>, vector<1x96xf32>
    %478 = vector.broadcast %477 : vector<1x96xf32> to vector<10x96xf32>
    %479 = arith.addf %476, %478 : vector<10x96xf32>
    %480 = vector.extract_strided_slice %25 {offsets = [30, 0], sizes = [10, 96], strides = [1, 1]} : vector<40x96xf32> to vector<10x96xf32>
    %481 = vector.extract_strided_slice %480 {offsets = [0, 0], sizes = [10, 64], strides = [1, 1]} : vector<10x96xf32> to vector<10x64xf32>
    %482 = vector.extract_strided_slice %479 {offsets = [0, 0], sizes = [10, 64], strides = [1, 1]} : vector<10x96xf32> to vector<10x64xf32>
    %483 = arith.addf %481, %482 : vector<10x64xf32>
    %484 = arith.negf %483 : vector<10x64xf32>
    %485 = math.exp %484 : vector<10x64xf32>
    %cst_194 = arith.constant 1.000000e+00 : f32
    %486 = vector.broadcast %cst_194 : f32 to vector<10x64xf32>
    %487 = arith.addf %486, %485 : vector<10x64xf32>
    %488 = arith.divf %486, %487 : vector<10x64xf32>
    %489 = vector.extract_strided_slice %488 {offsets = [0, 0], sizes = [10, 32], strides = [1, 1]} : vector<10x64xf32> to vector<10x32xf32>
    %490 = vector.extract_strided_slice %488 {offsets = [0, 32], sizes = [10, 32], strides = [1, 1]} : vector<10x64xf32> to vector<10x32xf32>
    %491 = vector.extract_strided_slice %480 {offsets = [0, 64], sizes = [10, 32], strides = [1, 1]} : vector<10x96xf32> to vector<10x32xf32>
    %492 = vector.extract_strided_slice %479 {offsets = [0, 64], sizes = [10, 32], strides = [1, 1]} : vector<10x96xf32> to vector<10x32xf32>
    %493 = arith.mulf %489, %492 : vector<10x32xf32>
    %494 = arith.addf %491, %493 : vector<10x32xf32>
    %495 = math.tanh %494 : vector<10x32xf32>
    %cst_195 = arith.constant 1.000000e+00 : f32
    %496 = vector.broadcast %cst_195 : f32 to vector<10x32xf32>
    %497 = arith.subf %496, %490 : vector<10x32xf32>
    %498 = arith.mulf %497, %495 : vector<10x32xf32>
    %499 = arith.mulf %490, %474 : vector<10x32xf32>
    %500 = arith.addf %498, %499 : vector<10x32xf32>
    %c0_196 = arith.constant 0 : index
    %c0_197 = arith.constant 0 : index
    %501 = vector.load %arg6[%c0_196, %c0_197] : memref<164x16xf32, #tpu.memory_space<vmem>>, vector<32x16xf32>
    %cst_198 = arith.constant dense<0.000000e+00> : vector<2x16xf32>
    %502 = tpu.matmul %472, %501, %cst_198 {dimension_numbers = #tpu.dot_dimension_numbers<[1], [0], [0], [1], [0, 0, 1, 1], [], []>} : vector<2x32xf32>, vector<32x16xf32>, vector<2x16xf32> -> vector<2x16xf32>
    %c158_199 = arith.constant 158 : index
    %c0_200 = arith.constant 0 : index
    %503 = vector.load %arg6[%c158_199, %c0_200] : memref<164x16xf32, #tpu.memory_space<vmem>>, vector<1x16xf32>
    %504 = vector.broadcast %503 : vector<1x16xf32> to vector<2x16xf32>
    %505 = arith.addf %502, %504 : vector<2x16xf32>
    %c32_201 = arith.constant 32 : index
    %c0_202 = arith.constant 0 : index
    %506 = vector.load %arg6[%c32_201, %c0_202] : memref<164x16xf32, #tpu.memory_space<vmem>>, vector<32x16xf32>
    %cst_203 = arith.constant dense<0.000000e+00> : vector<10x16xf32>
    %507 = tpu.matmul %500, %506, %cst_203 {dimension_numbers = #tpu.dot_dimension_numbers<[1], [0], [0], [1], [0, 0, 1, 1], [], []>} : vector<10x32xf32>, vector<32x16xf32>, vector<10x16xf32> -> vector<10x16xf32>
    %c159_204 = arith.constant 159 : index
    %c0_205 = arith.constant 0 : index
    %508 = vector.load %arg6[%c159_204, %c0_205] : memref<164x16xf32, #tpu.memory_space<vmem>>, vector<1x16xf32>
    %509 = vector.broadcast %508 : vector<1x16xf32> to vector<10x16xf32>
    %510 = arith.addf %507, %509 : vector<10x16xf32>
    %cst_206 = arith.constant dense<0.000000e+00> : vector<2x10xf32>
    %511 = tpu.matmul %505, %510, %cst_206 {dimension_numbers = #tpu.dot_dimension_numbers<[1], [1], [0], [0], [0, 0, 1, 0], [], []>} : vector<2x16xf32>, vector<10x16xf32>, vector<2x10xf32> -> vector<2x10xf32>
    %cst_207 = arith.constant 1.250000e+00 : f32
    %512 = vector.broadcast %cst_207 : f32 to vector<2x10xf32>
    %513 = arith.mulf %511, %512 : vector<2x10xf32>
    %cst_208 = arith.constant -1.000000e+30 : f32
    %514 = vector.broadcast %cst_208 : f32 to vector<2x10xf32>
    %515 = arith.select %53, %513, %514 : vector<2x10xi1>, vector<2x10xf32>
    %cst_209 = arith.constant dense<0xFF800000> : vector<2xf32>
    %516 = vector.multi_reduction <maximumf>, %515, %cst_209 [1] : vector<2x10xf32> to vector<2xf32>
    %517 = vector.shape_cast %516 : vector<2xf32> to vector<2x1xf32>
    %518 = vector.broadcast %517 : vector<2x1xf32> to vector<2x10xf32>
    %519 = arith.subf %515, %518 : vector<2x10xf32>
    %520 = math.exp %519 : vector<2x10xf32>
    %cst_210 = arith.constant 0.000000e+00 : f32
    %521 = vector.broadcast %cst_210 : f32 to vector<2x10xf32>
    %522 = arith.select %53, %520, %521 : vector<2x10xi1>, vector<2x10xf32>
    %cst_211 = arith.constant dense<0.000000e+00> : vector<2xf32>
    %523 = vector.multi_reduction <add>, %522, %cst_211 [1] : vector<2x10xf32> to vector<2xf32>
    %524 = vector.shape_cast %523 : vector<2xf32> to vector<2x1xf32>
    %525 = tpu.reciprocal %524 {approx = true} : vector<2x1xf32> -> vector<2x1xf32>
    %526 = vector.broadcast %525 : vector<2x1xf32> to vector<2x10xf32>
    %527 = arith.mulf %522, %526 : vector<2x10xf32>
    %cst_212 = arith.constant dense<0.000000e+00> : vector<2x32xf32>
    %528 = tpu.matmul %527, %500, %cst_212 {dimension_numbers = #tpu.dot_dimension_numbers<[1], [0], [0], [1], [0, 0, 1, 1], [], []>} : vector<2x10xf32>, vector<10x32xf32>, vector<2x32xf32> -> vector<2x32xf32>
    %c64_213 = arith.constant 64 : index
    %c0_214 = arith.constant 0 : index
    %529 = vector.load %arg6[%c64_213, %c0_214] : memref<164x16xf32, #tpu.memory_space<vmem>>, vector<32x16xf32>
    %cst_215 = arith.constant dense<0.000000e+00> : vector<2x16xf32>
    %530 = tpu.matmul %472, %529, %cst_215 {dimension_numbers = #tpu.dot_dimension_numbers<[1], [0], [0], [1], [0, 0, 1, 1], [], []>} : vector<2x32xf32>, vector<32x16xf32>, vector<2x16xf32> -> vector<2x16xf32>
    %c96_216 = arith.constant 96 : index
    %c0_217 = arith.constant 0 : index
    %531 = vector.load %arg6[%c96_216, %c0_217] : memref<164x16xf32, #tpu.memory_space<vmem>>, vector<32x16xf32>
    %cst_218 = arith.constant dense<0.000000e+00> : vector<2x16xf32>
    %532 = tpu.matmul %528, %531, %cst_218 {dimension_numbers = #tpu.dot_dimension_numbers<[1], [0], [0], [1], [0, 0, 1, 1], [], []>} : vector<2x32xf32>, vector<32x16xf32>, vector<2x16xf32> -> vector<2x16xf32>
    %533 = arith.addf %530, %532 : vector<2x16xf32>
    %c160_219 = arith.constant 160 : index
    %c0_220 = arith.constant 0 : index
    %534 = vector.load %arg6[%c160_219, %c0_220] : memref<164x16xf32, #tpu.memory_space<vmem>>, vector<1x16xf32>
    %535 = vector.broadcast %534 : vector<1x16xf32> to vector<2x16xf32>
    %536 = arith.addf %533, %535 : vector<2x16xf32>
    %cst_221 = arith.constant 0.000000e+00 : f32
    %537 = vector.broadcast %cst_221 : f32 to vector<2x16xf32>
    %538 = arith.maximumf %536, %537 : vector<2x16xf32>
    %539 = vector.broadcast %443 : vector<2x1xf32> to vector<2x32xf32>
    %540 = arith.mulf %440, %539 : vector<2x32xf32>
    %c128_222 = arith.constant 128 : index
    %c0_223 = arith.constant 0 : index
    %541 = vector.load %arg5[%c128_222, %c0_223] : memref<166x96xf32, #tpu.memory_space<vmem>>, vector<32x96xf32>
    %cst_224 = arith.constant dense<0.000000e+00> : vector<2x96xf32>
    %542 = tpu.matmul %540, %541, %cst_224 {dimension_numbers = #tpu.dot_dimension_numbers<[1], [0], [0], [1], [0, 0, 1, 1], [], []>} : vector<2x32xf32>, vector<32x96xf32>, vector<2x96xf32> -> vector<2x96xf32>
    %c165_225 = arith.constant 165 : index
    %c0_226 = arith.constant 0 : index
    %543 = vector.load %arg5[%c165_225, %c0_226] : memref<166x96xf32, #tpu.memory_space<vmem>>, vector<1x96xf32>
    %544 = vector.broadcast %543 : vector<1x96xf32> to vector<2x96xf32>
    %545 = arith.addf %542, %544 : vector<2x96xf32>
    %546 = vector.extract_strided_slice %38 {offsets = [6, 0], sizes = [2, 96], strides = [1, 1]} : vector<8x96xf32> to vector<2x96xf32>
    %c112_227 = arith.constant 112 : index
    %c0_228 = arith.constant 0 : index
    %547 = vector.load %arg5[%c112_227, %c0_228] : memref<166x96xf32, #tpu.memory_space<vmem>>, vector<16x96xf32>
    %cst_229 = arith.constant dense<0.000000e+00> : vector<2x96xf32>
    %548 = tpu.matmul %538, %547, %cst_229 {dimension_numbers = #tpu.dot_dimension_numbers<[1], [0], [0], [1], [0, 0, 1, 1], [], []>} : vector<2x16xf32>, vector<16x96xf32>, vector<2x96xf32> -> vector<2x96xf32>
    %549 = arith.addf %546, %548 : vector<2x96xf32>
    %550 = vector.extract_strided_slice %549 {offsets = [0, 0], sizes = [2, 64], strides = [1, 1]} : vector<2x96xf32> to vector<2x64xf32>
    %551 = vector.extract_strided_slice %545 {offsets = [0, 0], sizes = [2, 64], strides = [1, 1]} : vector<2x96xf32> to vector<2x64xf32>
    %552 = arith.addf %550, %551 : vector<2x64xf32>
    %553 = arith.negf %552 : vector<2x64xf32>
    %554 = math.exp %553 : vector<2x64xf32>
    %cst_230 = arith.constant 1.000000e+00 : f32
    %555 = vector.broadcast %cst_230 : f32 to vector<2x64xf32>
    %556 = arith.addf %555, %554 : vector<2x64xf32>
    %557 = arith.divf %555, %556 : vector<2x64xf32>
    %558 = vector.extract_strided_slice %557 {offsets = [0, 0], sizes = [2, 32], strides = [1, 1]} : vector<2x64xf32> to vector<2x32xf32>
    %559 = vector.extract_strided_slice %557 {offsets = [0, 32], sizes = [2, 32], strides = [1, 1]} : vector<2x64xf32> to vector<2x32xf32>
    %560 = vector.extract_strided_slice %549 {offsets = [0, 64], sizes = [2, 32], strides = [1, 1]} : vector<2x96xf32> to vector<2x32xf32>
    %561 = vector.extract_strided_slice %545 {offsets = [0, 64], sizes = [2, 32], strides = [1, 1]} : vector<2x96xf32> to vector<2x32xf32>
    %562 = arith.mulf %558, %561 : vector<2x32xf32>
    %563 = arith.addf %560, %562 : vector<2x32xf32>
    %564 = math.tanh %563 : vector<2x32xf32>
    %cst_231 = arith.constant 1.000000e+00 : f32
    %565 = vector.broadcast %cst_231 : f32 to vector<2x32xf32>
    %566 = arith.subf %565, %559 : vector<2x32xf32>
    %567 = arith.mulf %566, %564 : vector<2x32xf32>
    %568 = arith.mulf %559, %540 : vector<2x32xf32>
    %569 = arith.addf %567, %568 : vector<2x32xf32>
    %570 = tpu.concatenate %182, %311, %440, %569 in 0 : vector<2x32xf32>, vector<2x32xf32>, vector<2x32xf32>, vector<2x32xf32> -> vector<8x32xf32>
    %c0_232 = arith.constant 0 : index
    %c0_233 = arith.constant 0 : index
    %571 = vector.load %arg7[%c0_232, %c0_233] : memref<99x32xf32, #tpu.memory_space<vmem>>, vector<32x32xf32>
    %cst_234 = arith.constant dense<0.000000e+00> : vector<8x32xf32>
    %572 = tpu.matmul %570, %571, %cst_234 {dimension_numbers = #tpu.dot_dimension_numbers<[1], [0], [0], [1], [0, 0, 1, 1], [], []>} : vector<8x32xf32>, vector<32x32xf32>, vector<8x32xf32> -> vector<8x32xf32>
    %c96_235 = arith.constant 96 : index
    %c0_236 = arith.constant 0 : index
    %573 = vector.load %arg7[%c96_235, %c0_236] : memref<99x32xf32, #tpu.memory_space<vmem>>, vector<1x32xf32>
    %574 = vector.broadcast %573 : vector<1x32xf32> to vector<8x32xf32>
    %575 = arith.addf %572, %574 : vector<8x32xf32>
    %576 = math.tanh %575 : vector<8x32xf32>
    %c32_237 = arith.constant 32 : index
    %c0_238 = arith.constant 0 : index
    %577 = vector.load %arg7[%c32_237, %c0_238] : memref<99x32xf32, #tpu.memory_space<vmem>>, vector<32x32xf32>
    %cst_239 = arith.constant dense<0.000000e+00> : vector<8x32xf32>
    %578 = tpu.matmul %576, %577, %cst_239 {dimension_numbers = #tpu.dot_dimension_numbers<[1], [0], [0], [1], [0, 0, 1, 1], [], []>} : vector<8x32xf32>, vector<32x32xf32>, vector<8x32xf32> -> vector<8x32xf32>
    %c97 = arith.constant 97 : index
    %c0_240 = arith.constant 0 : index
    %579 = vector.load %arg7[%c97, %c0_240] : memref<99x32xf32, #tpu.memory_space<vmem>>, vector<1x32xf32>
    %580 = vector.broadcast %579 : vector<1x32xf32> to vector<8x32xf32>
    %581 = arith.addf %578, %580 : vector<8x32xf32>
    %582 = math.tanh %581 : vector<8x32xf32>
    %c64_241 = arith.constant 64 : index
    %c0_242 = arith.constant 0 : index
    %583 = vector.load %arg7[%c64_241, %c0_242] : memref<99x32xf32, #tpu.memory_space<vmem>>, vector<32x32xf32>
    %cst_243 = arith.constant dense<0.000000e+00> : vector<8x32xf32>
    %584 = tpu.matmul %582, %583, %cst_243 {dimension_numbers = #tpu.dot_dimension_numbers<[1], [0], [0], [1], [0, 0, 1, 1], [], []>} : vector<8x32xf32>, vector<32x32xf32>, vector<8x32xf32> -> vector<8x32xf32>
    %c98 = arith.constant 98 : index
    %c0_244 = arith.constant 0 : index
    %585 = vector.load %arg7[%c98, %c0_244] : memref<99x32xf32, #tpu.memory_space<vmem>>, vector<1x32xf32>
    %586 = vector.broadcast %585 : vector<1x32xf32> to vector<8x32xf32>
    %587 = arith.addf %584, %586 : vector<8x32xf32>
    %c0_245 = arith.constant 0 : index
    %c0_246 = arith.constant 0 : index
    %588 = vector.load %arg8[%c0_245, %c0_246] : memref<8x32xf32, #tpu.memory_space<vmem>>, vector<8x32xf32>
    tpu.vector_store %arg8[%c0_245, %c0_246], %582 {strides = array<i32>} : memref<8x32xf32, #tpu.memory_space<vmem>>, vector<8x32xf32>,
    %589 = vector.extract_strided_slice %587 {offsets = [0, 0], sizes = [8, 1], strides = [1, 1]} : vector<8x32xf32> to vector<8x1xf32>
    %c0_247 = arith.constant 0 : index
    %c0_248 = arith.constant 0 : index
    %590 = vector.load %arg9[%c0_247, %c0_248] : memref<8x1xf32, #tpu.memory_space<vmem>>, vector<8x1xf32>
    tpu.vector_store %arg9[%c0_247, %c0_248], %589 {strides = array<i32>} : memref<8x1xf32, #tpu.memory_space<vmem>>, vector<8x1xf32>,
    %c0_249 = arith.constant 0 : index
    %c0_250 = arith.constant 0 : index
    %591 = vector.load %arg10[%c0_249, %c0_250] : memref<14x32xf32, #tpu.memory_space<vmem>>, vector<2x32xf32>
    tpu.vector_store %arg10[%c0_249, %c0_250], %472 {strides = array<i32>} : memref<14x32xf32, #tpu.memory_space<vmem>>, vector<2x32xf32>,
    %c2_251 = arith.constant 2 : index
    %c0_252 = arith.constant 0 : index
    %592 = vector.load %arg10[%c2_251, %c0_252] : memref<14x32xf32, #tpu.memory_space<vmem>>, vector<10x32xf32>
    tpu.vector_store %arg10[%c2_251, %c0_252], %500 {strides = array<i32>} : memref<14x32xf32, #tpu.memory_space<vmem>>, vector<10x32xf32>,
    %c12 = arith.constant 12 : index
    %c0_253 = arith.constant 0 : index
    %593 = vector.load %arg10[%c12, %c0_253] : memref<14x32xf32, #tpu.memory_space<vmem>>, vector<2x32xf32>
    tpu.vector_store %arg10[%c12, %c0_253], %569 {strides = array<i32>} : memref<14x32xf32, #tpu.memory_space<vmem>>, vector<2x32xf32>,
    return
  }
}

</mosaic_0001>

<bundles_post_ra>
// kernel: dsrnn_forward.1
= control target key start
LH: loop header
LB: loop body
LE: loop exit
PB: predicated region body
PF: predicated region fallthrough
CT: control target
= control target key end

     0   :  { %vm44_vm0 = vcmask 1041408   ;;  %v5711_v2 = vmov 0   ;;  %v5712_v3 = vmov 0.0   ;;  %vm40_vm1 = vcmask 15360   ;;  %s7111_s0 = inlined_call_operand.vmem [shape: f32[8,7], index: 0, kind: input, shape index: {}]   ;;  %s7112_s1 = inlined_call_operand.vmem [shape: f32[8,2], index: 1, kind: input, shape index: {}]   ;;  %s7113_s2 = inlined_call_operand.vmem [shape: f32[40,21], index: 2, kind: input, shape index: {}]   ;;  %s7114_s3 = inlined_call_operand.vmem [shape: f32[4,12,1], index: 3, kind: input, shape index: {}]   ;;  %s7115_s4 = inlined_call_operand.vmem [shape: f32[14,32], index: 4, kind: input, shape index: {}]   ;;  %s7116_s5 = inlined_call_operand.vmem [shape: f32[166,96], index: 5, kind: input, shape index: {}]   ;;  %s7117_s6 = inlined_call_operand.vmem [shape: f32[164,16], index: 6, kind: input, shape index: {}]   ;;  %s7118_s7 = inlined_call_operand.vmem [shape: f32[99,32], index: 7, kind: input, shape index: {}]   ;;  %s7119_s8 = inlined_call_operand.hbm [shape: f32[8,32], index: 8, kind: output, shape index: {0}]   ;;  %s7120_s9 = inlined_call_operand.vmem [shape: f32[8,1], index: 9, kind: output, shape index: {1}]   ;;  %s7121_s10 = inlined_call_operand.vmem [shape: f32[14,32], index: 10, kind: output, shape index: {2}]  }
   0x1   :  { %v618_v0 = vld [vmem:[%s7114_s3] sm:$0xff]  ;;  %5535 = vset.pattern.permute.xlu0 %v5711_v2  ;;  %5039 = vmatprep.subr.mxu0 %v5712_v3  ;;  %v207_v5 = vld [vmem:[%s7117_s6 + $0x92] sm:$0x1f]  ;;  %vm229_vm2 = vcmask 1044480   ;;  %vm5713_vm3 = vmmov 0   ;;  %v206_v6 = vld [vmem:[%s7117_s6 + $0x8a] sm:$0xff] }
   0x2   :  { %v34_v1 = vld [vmem:[%s7117_s6 + $0x80] sm:$0x3]  ;;  %622 = vperm.xlu0 %5535, %v618_v0   ;;  %5041 = vmatprep.mubr.msk.f32.mxu0 %vm5713_vm3, %v5712_v3  ;;  %v205_v7 = vld [vmem:[%s7117_s6 + $0x82] sm:$0xff] }
   0x3   :  { %v33_v4 = vld [vmem:[%s7112_s1] sm:$0xff]  ;;  %5040 = vmatpush3.msk.msra.mxu0 %vm44_vm0, %v34_v1  ;;  %5044 = vmatprep.subr.mxu1 %v5712_v3 }
   0x4   :  { %5051 = vmatprep.subr.mxu0 %v5712_v3  ;;  %5042 = vmatmul.mubr.msk.f32.vlgmr.msra.gmra.mxu0 %vm40_vm1, %v33_v4 }
   0x5   :  { %5052 = vmatpush3.msk.msra.mxu0 %vm229_vm2, %v207_v5  ;;  %5057 = vmatprep.mubr.msk.f32.mxu0 %vm5713_vm3, %v5712_v3 }
   0x6   :  { %5053 = vmatprep.subr.mxu0 %v5712_v3  ;;  %5048 = vmatprep.mubr.msk.f32.mxu1 %vm5713_vm3, %v5712_v3 }
   0x7   :  { %16 = vsyncpa [#allocation3], 0  ;;  %5054 = vmatpush3.msra.mxu0 %v206_v6  ;;  %v200_v8 = vld [vmem:[%s7113_s2] sm:$0xff]  ;;  %vm213_vm4 = vcmask 171008   ;;  %5536 = vset.pattern.permute.xlu1 %v5711_v2  ;;  %v5809_v9 = vld [vmem:[%s7116_s5 + $0x28] sm:$0xff]  ;;  %vm635_vm5 = vcmask 261120  }
   0x8   :  { %5055 = vmatprep.subr.mxu0 %v5712_v3  ;;  %v5816_v10 = vld [vmem:[%s7116_s5 + $0x20] sm:$0xff]  ;;  %v201_v11 = vld [vmem:[%s7113_s2 + $0x8] sm:$0xff]  ;;  %v5828_v12 = vld [vmem:[%s7116_s5 + $0x18] sm:$0xff]  ;;  %vm126_vm6 = vcmask 130048   ;;  %vm451_vm7 = vcmask 1046528   ;;  %vm447_vm8 = vcmask 56320  }
   0x9   :  { %5056 = vmatpush3.msra.mxu0 %v205_v7  ;;  %v5836_v13 = vld [vmem:[%s7116_s5 + $0x10] sm:$0xff]  ;;  %v203_v15 = vld [vmem:[%s7113_s2 + $0x18] sm:$0xff]  ;;  %v204_v16 = vld [vmem:[%s7113_s2 + $0x20] sm:$0xff]  ;;  %s5714_s25 = smov 64   ;;  %vm754_vm9 = vcmask 1045504   ;;  %s5715_s21 = smov 32  }
   0xa   :  { %5058 = vmatmul.mubr.msk.f32.vlgmr.msra.gmra.mxu0 %vm213_vm4, %v200_v8  ;;  %5103 = vmatprep.subr.mxu0 %v5712_v3  ;;  %v202_v14 = vld [vmem:[%s7113_s2 + $0x10] sm:$0xff]  ;;  %v120_v17 = vld [vmem:[%s7116_s5 + $0x8] sm:$0xff]  ;;  %v119_v18 = vld [vmem:[%s7116_s5] sm:$0xff]  ;;  %vm1154_vm13 = vcmask 74752   ;;  %vm1168_vm14 = vcmask 80896   ;;  %vm2740_vm15 = vcmask 1043456  }
   0xb   :  { %5060 = vmatprep.mubr.msk.f32.mxu0 %vm5713_vm3, %v5712_v3  ;;  %5104 = vmatpush3.msra.mxu0 %v5809_v9  ;;  %v619_v19 = vld [vmem:[%s7114_s3 + $0x8] sm:$0xf]  ;;  %v606_v20 = vld [vmem:[%s7115_s4] sm:$0xff]  ;;  %v329_v28 = vld [vmem:[%s7116_s5 + $0x38] sm:$0xff] }
   0xc   :  { %5105 = vmatprep.subr.mxu0 %v5712_v3  ;;  %5045 = vmatpush3.msra.mxu1 %v120_v17  ;;  %v4698_v23 = vld [vmem:[%s7117_s6 + $0xa1] ss:$0 sm:$0xff]  ;;  %v4703_v29 = vld [vmem:[%s7117_s6 + $0xa2] ss:$0 sm:$0xff]  ;;  %v328_v30 = vld [vmem:[%s7116_s5 + $0x30] sm:$0xff] }
   0xd   :  { %5106 = vmatpush3.msra.mxu0 %v5816_v10  ;;  %5046 = vmatprep.subr.mxu1 %v5712_v3  ;;  %v441_v35 = vld [vmem:[%s7117_s6 + $0x97] sm:$0x7f]  ;;  %v440_v52 = vld [vmem:[%s7111_s0] sm:$0xff]  ;;  %v527_v53 = vld [vmem:[%s7116_s5 + $0x68] sm:$0xff]  ;;  %s5716_s0 = smov 96  }
   0xe   :  { %5061 = vmatmul.mubr.msk.f32.gmra.mxu0 %vm213_vm4, %v201_v11  ;;  %5107 = vmatprep.subr.mxu0 %v5712_v3  ;;  %v526_v54 = vld [vmem:[%s7116_s5 + $0x60] sm:$0xff]  ;;  %v5936_v55 = vld [vmem:[%s7116_s5 + $0x58] sm:$0xff]  ;;  %v5954_v11 = vld [vmem:[%s7115_s4 + $0x8] sm:$0x3f]  ;;  %s5717_s4 = smov [#allocation2]  }
   0xf   :  { %5063 = vmatprep.mubr.msk.f32.mxu0 %vm5713_vm3, %v5712_v3  ;;  %5108 = vmatpush3.msra.mxu0 %v5828_v12  ;;  %v5942_v56 = vld [vmem:[%s7116_s5 + $0xa1] ss:$0 sm:$0xff]  ;;  %v4710_v2 = vld [vmem:[%s7116_s5 + $0xa2] ss:$0 sm:$0xff]  ;;  %s4682_s12 = sshll.u32 %s5717_s4, 4  ;;  %s4683_s12 = int_to_ptr.vmem [resolvable:$true] %s4682_s12 }
  0x10   :  { %5109 = vmatprep.subr.mxu0 %v5712_v3  ;;  %5047 = vmatpush3.msra.mxu1 %v119_v18  ;;  %s5689_s13 = scalar_lea.vmem %s4683_s12, 128  ;;  %p5694_p1 = scmp.lt.s32.totalorder %s4683_s12, %s4683_s12 }
  0x11   :  { %5110 = vmatpush3.msra.mxu0 %v5836_v13  ;;  %5072 = vmatprep.subr.mxu1 %v5712_v3  ;;  %p5690_p0 = scmp.ne.s32.totalorder %s4683_s12, %s5689_s13  ;;  %p5695_p2 = scmp.lt.s32.totalorder %s5689_s13, %s5689_s13 }
  0x12   :  { %5064 = vmatmul.mubr.msk.f32.gmra.mxu0 %vm213_vm4, %v202_v14  ;;  %5125 = vmatprep.subr.mxu0 %v5712_v3 }
  0x13   :  { %5066 = vmatprep.mubr.msk.f32.mxu0 %vm5713_vm3, %v5712_v3  ;;  %740 = vperm.xlu0 %5535, %v619_v19   ;;  %p5696_p3 = por %p5695_p2, %p5694_p1 }
  0x15   :  { %p5697_p4 = pnand %p5696_p3, %p5690_p0 }
  0x16   :  { %5067 = vmatmul.mubr.msk.f32.gmra.mxu0 %vm213_vm4, %v203_v15 }
  0x17   :  { %5069 = vmatprep.mubr.msk.f32.mxu0 %vm5713_vm3, %v5712_v3 }
  0x1a   :  { %5070 = vmatmul.mubr.msk.f32.gmra.mxu0 %vm213_vm4, %v204_v16 }
  0x1b   :  { %5111 = vmatprep.mubr.msk.f32.mxu0 %vm5713_vm3, %v5712_v3 }
  0x7d   :  { %v5876_v21 = vpop.permute.xlu0 %622 }
  0x7e   :  { %v5879_v22 = vmul.f32 %v5876_v21, %v606_v20  ;;  %v4716_v20 = vld [vmem:[%s7117_s6 + $0xa3] ss:$0 sm:$0xff] }
  0x80   :  { %5112 = vmatmul.mubr.msk.f32.vlgmr.msra.gmra.mxu0 %vm635_vm5, %v5879_v22 }
  0x81   :  { %5133 = vmatprep.mubr.msk.f32.mxu0 %vm5713_vm3, %v5712_v3 }
  0x8e   :  { %v741_v8 = vpop.permute.xlu0 %740 }
  0x8f   :  { %v743_v16 = vmul.f32 %v741_v8, %v5954_v11 }
  0xc4   :  { %v114_v24 = vpop.f32.mrf.mxu0 }
  0xc5   :  { %v115_v25 = vadd.f32 %v4698_v23, %v114_v24  ;;  %v755_v23 = vrot.slane %v5879_v22, 2  ;;  %v5965_v24 = vrot.slane %v743_v16, 2 }
  0xc6   :  { %v5043_v26 = vpop.f32.mrf.mxu0 }
  0xc7   :  { %v118_v27 = vmax.f32 %v115_v25, 0.0 }
  0xc9   :  { %5049 = vmatmul.mubr.msk.f32.vlgmr.msra.gmra.mxu1 %vm126_vm6, %v118_v27 }
  0xca   :  { %v299_v31 = vpop.f32.mrf.mxu0  ;;  %5073 = vmatpush3.msra.mxu1 %v329_v28  ;;  %5076 = vmatprep.mubr.msk.f32.mxu1 %vm5713_vm3, %v5712_v3 }
  0xcb   :  { %v300_v32 = vadd.f32 %v4703_v29, %v299_v31  ;;  %5074 = vmatprep.subr.mxu1 %v5712_v3  ;;  %v5980_v31 = vld [vmem:[%s7116_s5 + $0x48] sm:$0xff] }
  0xcc   :  { %v5059_v33 = vpop.f32.mrf.mxu0  ;;  %5075 = vmatpush3.msra.mxu1 %v328_v30  ;;  %v5972_v30 = vld [vmem:[%s7116_s5 + $0x50] sm:$0xff] }
  0xcd   :  { %v323_v34 = vmax.f32 %v300_v32, 0.0  ;;  %5091 = vmatprep.subr.mxu1 %v5712_v3  ;;  %v5987_v32 = vld [vmem:[%s7116_s5 + $0x40] sm:$0xff] }
  0xce   :  { %v304_v36 = vpop.f32.mrf.mxu0 }
  0xcf   :  { %v305_v37 = vadd.f32 %v4703_v29, %v304_v36  ;;  %5077 = vmatmul.mubr.msk.f32.vlgmr.msra.gmra.mxu1 %vm126_vm6, %v323_v34  ;;  %v6000_v36 = vld [vmem:[%s7116_s5 + $0xa3] ss:$0 sm:$0xff] }
  0xd0   :  { %5092 = vmatpush3.msk.msra.mxu1 %vm451_vm7, %v441_v35  ;;  %v5062_v38 = vpop.f32.mrf.mxu0  ;;  %5079 = vmatprep.mubr.msk.f32.mxu1 %vm5713_vm3, %v5712_v3 }
  0xd1   :  { %v324_v39 = vmax.f32 %v305_v37, 0.0  ;;  %5096 = vmatprep.subr.mxu1 %v5712_v3 }
  0xd2   :  { %v309_v40 = vpop.f32.mrf.mxu0 }
  0xd3   :  { %v310_v41 = vadd.f32 %v4703_v29, %v309_v40  ;;  %5080 = vmatmul.mubr.msk.f32.gmra.mxu1 %vm126_vm6, %v324_v39  ;;  %v4701_v40 = vld [vmem:[%s7116_s5 + $0xa0] ss:$0 sm:$0xff] }
  0xd4   :  { %v5065_v42 = vpop.f32.mrf.mxu0  ;;  %5082 = vmatprep.mubr.msk.f32.mxu1 %vm5713_vm3, %v5712_v3 }
  0xd5   :  { %v325_v43 = vmax.f32 %v310_v41, 0.0 }
  0xd6   :  { %v314_v44 = vpop.f32.mrf.mxu0 }
  0xd7   :  { %v315_v45 = vadd.f32 %v4703_v29, %v314_v44  ;;  %5083 = vmatmul.mubr.msk.f32.gmra.mxu1 %vm126_vm6, %v325_v43 }
  0xd8   :  { %v5068_v46 = vpop.f32.mrf.mxu0  ;;  %5085 = vmatprep.mubr.msk.f32.mxu1 %vm5713_vm3, %v5712_v3 }
  0xd9   :  { %v326_v47 = vmax.f32 %v315_v45, 0.0 }
  0xda   :  { %v319_v48 = vpop.f32.mrf.mxu0 }
  0xdb   :  { %v320_v49 = vadd.f32 %v4703_v29, %v319_v48  ;;  %5086 = vmatmul.mubr.msk.f32.gmra.mxu1 %vm126_vm6, %v326_v47  ;;  %v757_v29 = vsel %vm754_vm9, %v755_v23, %v5965_v24 }
  0xdc   :  { %v5071_v50 = vpop.f32.mrf.mxu0  ;;  %5088 = vmatprep.mubr.msk.f32.mxu1 %vm5713_vm3, %v5712_v3 }
  0xdd   :  { %v327_v51 = vmax.f32 %v320_v49, 0.0 }
  0xdf   :  { %5089 = vmatmul.mubr.msk.f32.gmra.mxu1 %vm126_vm6, %v327_v51 }
  0xe0   :  { %5093 = vmatprep.mubr.msk.f32.mxu1 %vm5713_vm3, %v5712_v3 }
  0xe3   :  { %5094 = vmatmul.mubr.msk.f32.vlgmr.msra.gmra.mxu1 %vm447_vm8, %v440_v52 }
  0xe4   :  { %5100 = vmatprep.mubr.msk.f32.mxu1 %vm5713_vm3, %v5712_v3  ;;  %5097 = vmatpush3.msra.mxu1 %v527_v53 }
  0xe5   :  { %5098 = vmatprep.subr.mxu1 %v5712_v3 }
  0xe6   :  { %5099 = vmatpush3.msra.mxu1 %v526_v54 }
  0xe7   :  { %5114 = vmatprep.subr.mxu1 %v5936_v55 }
 0x140   :  { %v705_v57 = vpop.f32.mrf.mxu0 }
 0x141   :  { %v706_v58 = vadd.f32 %v5942_v56, %v705_v57 }
 0x142   :  { %v5113_v59 = vpop.f32.mrf.mxu0 }
 0x143   :  { %717 = vrot.lane.b32.xlu0 %v706_v58, %s5714_s25 }
 0x189   :  { %v196_v60 = vpop.f32.mrf.mxu1 }
 0x18a   :  { %v6009_v42 = vadd.f32 %v4701_v40, %v196_v60 }
 0x18b   :  { %v5050_v61 = vpop.f32.mrf.mxu1 }
 0x18c   :  { %v709_v45 = vadd.f32 %v706_v58, %v6009_v42 }
 0x18e   :  { %v4723_v48 = vmul.f32 -1.442695, %v709_v45 }
 0x18f   :  { %v416_v62 = vpop.f32.mrf.mxu1 }
 0x190   :  { %v417_v41 = vadd.f32 %v4710_v2, %v416_v62 }
 0x191   :  { %v5078_v63 = vpop.f32.mrf.mxu1 }
 0x193   :  { %v421_v0 = vpop.f32.mrf.mxu1 }
 0x194   :  { %v6011_v44 = vadd.f32 %v4710_v2, %v421_v0 }
 0x195   :  { %v5081_v1 = vpop.f32.mrf.mxu1 }
 0x197   :  { %v426_v4 = vpop.f32.mrf.mxu1 }
 0x198   :  { %v5949_v5 = vadd.f32 %v4710_v2, %v426_v4 }
 0x199   :  { %v5084_v6 = vpop.f32.mrf.mxu1 }
 0x19b   :  { %v431_v7 = vpop.f32.mrf.mxu1 }
 0x19c   :  { %v5956_v14 = vadd.f32 %v4710_v2, %v431_v7 }
 0x19d   :  { %v5087_v15 = vpop.f32.mrf.mxu1 }
 0x19f   :  { %v436_v17 = vpop.f32.mrf.mxu1 }
 0x1a0   :  { %v5959_v18 = vadd.f32 %v4710_v2, %v436_v17 }
 0x1a1   :  { %v5090_v19 = vpop.f32.mrf.mxu1 }
 0x1a2   :  { %v6031_v19 = vld [vmem:[%s7117_s6 + $0x38] sm:$0xff] }
 0x1a3   :  { %v521_v25 = vpop.f32.mrf.mxu1 }
 0x1a4   :  { %v522_v26 = vadd.f32 %v4716_v20, %v521_v25  ;;  %v6044_v20 = vld [vmem:[%s7117_s6 + $0x28] sm:$0xff]  ;;  %v6055_v25 = vld [vmem:[%s7117_s6 + $0x18] sm:$0xff] }
 0x1a5   :  { %v5095_v27 = vpop.f32.mrf.mxu1  ;;  %5126 = vmatpush3.msra.mxu0 %v6055_v25 }
 0x1a6   :  { %v525_v28 = vmax.f32 %v522_v26, 0.0  ;;  %v6060_v26 = vld [vmem:[%s7117_s6 + $0x20] sm:$0xff]  ;;  %v6065_v27 = vld [vmem:[%s7117_s6 + $0x10] sm:$0xff]  ;;  %5127 = vmatprep.subr.mxu0 %v5712_v3 }
 0x1a7   :  { %5128 = vmatpush3.msra.mxu0 %v6065_v27 }
 0x1a8   :  { %5101 = vmatmul.mubr.msk.f32.vlgmr.msra.gmra.mxu1 %vm126_vm6, %v525_v28  ;;  %5129 = vmatprep.subr.mxu0 %v5712_v3 }
 0x1a9   :  { %5115 = vmatpush3.msra.mxu1 %v5936_v55  ;;  %5122 = vmatprep.mubr.msk.f32.mxu1 %vm635_vm5, %v757_v29 }
 0x1aa   :  { %5116 = vmatprep.subr.mxu1 %v5972_v30 }
 0x1ab   :  { %5117 = vmatpush3.msra.mxu1 %v5972_v30 }
 0x1ac   :  { %5118 = vmatprep.subr.mxu1 %v5980_v31 }
 0x1ad   :  { %5119 = vmatpush3.msra.mxu1 %v5980_v31 }
 0x1ae   :  { %5120 = vmatprep.subr.mxu1 %v5987_v32 }
 0x1af   :  { %5121 = vmatpush3.msra.mxu1 %v5987_v32 }
 0x1b0   :  { %5123 = vmatmul.mubr.msk.f32.vlgmr.msra.gmra.mxu1 %vm635_vm5, %v5965_v24  ;;  %5136 = vmatprep.subr.mxu1 %v6031_v19 }
 0x1b1   :  { %5137 = vmatpush3.msra.mxu1 %v6031_v19 }
 0x1b5   :  { %v718_v61 = vpop.permute.xlu0 %717 }
 0x268   :  { %v5995_v33 = vpop.f32.mrf.mxu1 }
 0x26a   :  { %v5102_v34 = vpop.f32.mrf.mxu1 }
 0x270   :  { %v5124_v35 = vpop.f32.mrf.mxu1 }
 0x271   :  { %v834_v39 = vadd.f32 %v5124_v35, %v6000_v36  ;;  %v6084_v35 = vld [vmem:[%s7117_s6] sm:$0xff] }
 0x272   :  { %v828_v37 = vpop.f32.mrf.mxu1 }
 0x273   :  { %v829_v38 = vadd.f32 %v6000_v36, %v828_v37  ;;  %v838_v46 = vadd.f32 %v834_v39, %v6011_v44 }
 0x275   :  { %853 = vrot.lane.b32.xlu1 %v829_v38, %s5714_s25  ;;  %v837_v43 = vadd.f32 %v829_v38, %v417_v41  ;;  %v4728_v49 = vmul.f32 -1.442695, %v838_v46 }
 0x277   :  { %v4727_v47 = vmul.f32 -1.442695, %v837_v43 }
 0x279   :  { %855 = vrot.lane.b32.xlu1 %v834_v39, %s5714_s25  ;;  %5537 = vpow2.f32 %v4727_v47 }
 0x27a   :  { %5539 = vpow2.f32 %v4723_v48 }
 0x27b   :  { %5541 = vpow2.f32 %v4728_v49 }
 0x286   :  { %v5538_v50 = vpop.eup %5537 }
 0x287   :  { %v5540_v51 = vpop.eup %5539  ;;  %v845_v52 = vadd.f32 1.0, %v5538_v50 }
 0x288   :  { %v5542_v53 = vpop.eup %5541  ;;  %v713_v54 = vadd.f32 1.0, %v5540_v51 }
 0x289   :  { %v846_v57 = vadd.f32 1.0, %v5542_v53  ;;  %5543 = vrcp.f32 %v845_v52 }
 0x28a   :  { %5545 = vrcp.f32 %v713_v54 }
 0x28b   :  { %5547 = vrcp.f32 %v846_v57 }
 0x296   :  { %v5544_v59 = vpop.eup %5543 }
 0x297   :  { %v6015_v62 = vpop.eup %5545  ;;  %v873_v34 = vsub.f32 1.0, %v5544_v59 }
 0x298   :  { %v5548_v63 = vpop.eup %5547  ;;  %v720_v1 = vmul.f32 %v6015_v62, %v718_v61  ;;  %v727_v50 = vsub.f32 1.0, %v6015_v62 }
 0x299   :  { %v874_v43 = vsub.f32 1.0, %v5548_v63 }
 0x2e7   :  { %v854_v60 = vpop.permute.xlu1 %853 }
 0x2e8   :  { %v859_v58 = vmul.f32 %v5544_v59, %v854_v60 }
 0x2ea   :  { %863 = vrot.lane.b32.xlu1 %v859_v58, %s5714_s25  ;;  %v6115_v58 = vld [vmem:[%s7117_s6 + $0x9f] ss:$0 sm:$0xff] }
 0x2eb   :  { %v856_v0 = vpop.permute.xlu1 %855 }
 0x2ec   :  { %v860_v2 = vmul.f32 %v5548_v63, %v856_v0 }
 0x2ee   :  { %865 = vrot.lane.b32.xlu0 %v860_v2, %s5714_s25  ;;  %722 = vrot.lane.b32.xlu1 %v720_v1, %s5714_s25  ;;  %v6124_v2 = vld [vmem:[%s7117_s6 + $0x9e] ss:$0 sm:$0xff] }
 0x2f2   :  { %885 = vrot.lane.b32.xlu1 %v757_v29, %s5715_s21  ;;  %v6077_v29 = vld [vmem:[%s7117_s6 + $0x8] sm:$0xff] }
 0x2f3   :  { %5130 = vmatpush3.msra.mxu0 %v6077_v29 }
 0x2f4   :  { %5131 = vmatprep.subr.mxu0 %v5712_v3 }
 0x2f5   :  { %5132 = vmatpush3.msra.mxu0 %v6084_v35 }
 0x2f6   :  { %887 = vrot.lane.b32.xlu1 %v5965_v24, %s5715_s21  ;;  %5147 = vmatprep.subr.mxu0 %v5712_v3 }
 0x2fa   :  { %733 = vrot.lane.b32.xlu1 %v5879_v22, %s5715_s21  ;;  %v6036_v22 = vld [vmem:[%s7117_s6 + $0x30] sm:$0xff] }
 0x2fb   :  { %5138 = vmatprep.subr.mxu1 %v6036_v22 }
 0x2fc   :  { %5139 = vmatpush3.msra.mxu1 %v6036_v22 }
 0x2fd   :  { %5140 = vmatprep.subr.mxu1 %v6044_v20 }
 0x2fe   :  { %5141 = vmatpush3.msra.mxu1 %v6044_v20 }
 0x2ff   :  { %5142 = vmatprep.subr.mxu1 %v6060_v26 }
 0x300   :  { %5143 = vmatpush3.msra.mxu1 %v6060_v26 }
 0x301   :  { %5154 = vmatprep.subr.mxu1 %v5712_v3 }
 0x35c   :  { %v864_v4 = vpop.permute.xlu1 %863 }
 0x35d   :  { %v869_v6 = vadd.f32 %v864_v4, %v417_v41 }
 0x35f   :  { %5549 = vtanh.f32 %v869_v6 }
 0x360   :  { %v866_v7 = vpop.permute.xlu0 %865  ;;  %v723_v8 = vpop.permute.xlu1 %722 }
 0x361   :  { %v870_v15 = vadd.f32 %v866_v7, %v6011_v44  ;;  %v725_v16 = vadd.f32 %v723_v8, %v6009_v42  ;;  %v6132_v7 = vld [vmem:[%s7117_s6 + $0x58] sm:$0xff]  ;;  %v6138_v8 = vld [vmem:[%s7117_s6 + $0x50] sm:$0xff] }
 0x363   :  { %5551 = vtanh.f32 %v870_v15  ;;  %v6147_v15 = vld [vmem:[%s7117_s6 + $0x48] sm:$0xff] }
 0x364   :  { %5553 = vtanh.f32 %v725_v16  ;;  %v886_v28 = vpop.permute.xlu1 %885  ;;  %v6154_v16 = vld [vmem:[%s7117_s6 + $0x40] sm:$0xff] }
 0x365   :  { %v891_v39 = vmul.f32 %v5544_v59, %v886_v28 }
 0x368   :  { %v888_v37 = vpop.permute.xlu1 %887 }
 0x369   :  { %v892_v46 = vmul.f32 %v5548_v63, %v888_v37 }
 0x36c   :  { %v5550_v17 = vpop.eup %5549  ;;  %v734_v48 = vpop.permute.xlu1 %733 }
 0x36d   :  { %877 = vrot.lane.b32.xlu0 %v5550_v17, %s5716_s0  ;;  %v736_v52 = vmul.f32 %v6015_v62, %v734_v48  ;;  %v608_v17 = vlaneseq }
 0x36f   :  { %v611_v28 = vand.u32 127, %v608_v17 }
 0x370   :  { %v5552_v23 = vpop.eup %5551 }
 0x371   :  { %879 = vrot.lane.b32.xlu0 %v5552_v23, %s5716_s0  ;;  %v5554_v24 = vpop.eup %5553  ;;  %v609_v23 = vshrl.u32 %v608_v17, 7 }
 0x375   :  { %729 = vrot.lane.b32.xlu0 %v5554_v24, %s5716_s0  ;;  %v614_v24 = vadd.s32 1, %v609_v23 }
 0x377   :  { %v615_v37 = vmul.u32 5, %v614_v24 }
 0x379   :  { %vm616_vm11 = vcmp.lt.s32.totalorder %v611_v28, %v615_v37  ;;  %v6196_v37 = vld [vmem:[%s7117_s6 + $0x78] sm:$0xff] }
 0x3df   :  { %v878_v38 = vpop.permute.xlu0 %877 }
 0x3e0   :  { %v883_v40 = vmul.f32 %v878_v38, %v873_v34  ;;  %v612_v34 = vmul.u32 5, %v609_v23 }
 0x3e2   :  { %v6088_v41 = vadd.f32 %v891_v39, %v883_v40  ;;  %vm613_vm10 = vcmp.ge.s32.totalorder %v611_v28, %v612_v34 }
 0x3e3   :  { %v880_v45 = vpop.permute.xlu0 %879  ;;  %vm6163_vm12 = vmand %vm613_vm10, %vm616_vm11 }
 0x3e4   :  { %v884_v47 = vmul.f32 %v880_v45, %v874_v43  ;;  %990 = vrot.lane.b32.xlu0 %v6088_v41, %s5716_s0 }
 0x3e6   :  { %v6092_v49 = vadd.f32 %v892_v46, %v884_v47 }
 0x3e7   :  { %v730_v51 = vpop.permute.xlu0 %729 }
 0x3e8   :  { %v732_v53 = vmul.f32 %v730_v51, %v727_v50  ;;  %992 = vrot.lane.b32.xlu1 %v6092_v49, %s5716_s0  ;;  %v4747_v50 = vld [vmem:[%s7114_s3 + $0x18] sm:$0xf] }
 0x3ea   :  { %v6098_v54 = vadd.f32 %v736_v52, %v732_v53 }
 0x3ec   :  { %905 = vrot.lane.b32.xlu0 %v6098_v54, %s5716_s0 }
 0x456   :  { %v991_v57 = vpop.permute.xlu0 %990 }
 0x457   :  { %5144 = vmatprep.mubr.msk.f32.mxu1 %vm635_vm5, %v991_v57 }
 0x45a   :  { %v993_v59 = vpop.permute.xlu1 %992 }
 0x45b   :  { %5145 = vmatmul.mubr.msk.f32.vlgmr.msra.gmra.mxu1 %vm635_vm5, %v993_v59 }
 0x45c   :  { %5155 = vmatpush3.msk.msra.mxu1 %vm44_vm0, %v993_v59  ;;  %5158 = vmatprep.mubr.msk.f32.mxu1 %vm5713_vm3, %v5712_v3 }
 0x45d   :  { %5156 = vmatprep.subr.mxu1 %v5712_v3 }
 0x45e   :  { %5157 = vmatpush3.msra.mxu1 %v991_v57  ;;  %v906_v60 = vpop.permute.xlu0 %905 }
 0x45f   :  { %5134 = vmatmul.mubr.msk.f32.vlgmr.msra.gmra.mxu0 %vm635_vm5, %v906_v60  ;;  %5161 = vmatprep.subr.mxu1 %v5712_v3 }
 0x460   :  { %5151 = vmatprep.mubr.msk.f32.mxu0 %vm5713_vm3, %v5712_v3 }
 0x51b   :  { %v5146_v61 = vpop.f32.mrf.mxu1 }
 0x51c   :  { %v1070_v62 = vadd.f32 %v5146_v61, %v6115_v58 }
 0x51d   :  { %v1064_v63 = vpop.f32.mrf.mxu1 }
 0x51e   :  { %5148 = vmatpush3.xpose.msk.msra.mxu0 %vm126_vm6, %v1070_v62  ;;  %v1065_v1 = vadd.f32 %v6115_v58, %v1064_v63  ;;  %v4746_v62 = vld [vmem:[%s7114_s3 + $0x10] sm:$0xff] }
 0x51f   :  { %v975_v0 = vpop.f32.mrf.mxu0  ;;  %5149 = vmatprep.subr.mxu0 %v5712_v3 }
 0x520   :  { %v976_v6 = vadd.f32 %v6124_v2, %v975_v0 }
 0x521   :  { %v5135_v4 = vpop.f32.mrf.mxu0 }
 0x522   :  { %5150 = vmatpush3.xpose.msk.msra.mxu0 %vm126_vm6, %v1065_v1 }
 0x523   :  { %5172 = vmatprep.subr.mxu0 %v5712_v3 }
 0x525   :  { %5152 = vmatmul.mubr.msk.f32.vlgmr.msra.gmra.mxu0 %vm126_vm6, %v976_v6 }
 0x526   :  { %5173 = vmatpush3.msra.mxu0 %v6132_v7  ;;  %5180 = vmatprep.mubr.msk.f32.mxu0 %vm5713_vm3, %v5712_v3 }
 0x527   :  { %5174 = vmatprep.subr.mxu0 %v5712_v3 }
 0x528   :  { %5175 = vmatpush3.msra.mxu0 %v6138_v8 }
 0x529   :  { %5176 = vmatprep.subr.mxu0 %v5712_v3 }
 0x52a   :  { %5177 = vmatpush3.msra.mxu0 %v6147_v15 }
 0x52b   :  { %5178 = vmatprep.subr.mxu0 %v5712_v3 }
 0x52c   :  { %5179 = vmatpush3.msra.mxu0 %v6154_v16 }
 0x52d   :  { %5181 = vmatmul.mubr.msk.f32.vlgmr.msra.gmra.mxu0 %vm635_vm5, %v906_v60  ;;  %5194 = vmatprep.subr.mxu0 %v5712_v3 }
 0x52e   :  { %5198 = vmatprep.mubr.msk.f32.mxu0 %vm5713_vm3, %v5712_v3 }
 0x5e5   :  { %v1148_v38 = vpop.f32.mrf.mxu0 }
 0x5e6   :  { %v1152_v40 = vmul.f32 1.25, %v1148_v38 }
 0x5e7   :  { %v5153_v43 = vpop.f32.mrf.mxu0 }
 0x5e8   :  { %v1153_v45 = vsel %vm6163_vm12, %v1152_v40, -1e+30  ;;  %v6211_v40 = vld [vmem:[%s7117_s6 + $0x70] sm:$0xff]  ;;  %v6229_v43 = vld [vmem:[%s7117_s6 + $0x60] sm:$0xff] }
 0x5e9   :  { %v1155_v46 = vsel %vm1154_vm13, %v1153_v45, -inf }
 0x5ea   :  { %1156 = vmax.xlane.f32.xlu1 %v1155_v46  ;;  %v6239_v46 = vld [vmem:[%s7116_s5 + $0x98] sm:$0xff] }
 0x5ed   :  { %v6170_v47 = vpop.f32.mrf.mxu0 }
 0x5ef   :  { %v5182_v48 = vpop.f32.mrf.mxu0 }
 0x5fb   :  { %1709 = vperm.xlu1 %5536, %v4747_v50   ;;  %v6245_v50 = vld [vmem:[%s7116_s5 + $0x90] sm:$0xff] }
 0x673   :  { %v1157_v51 = vpop.xlane.xlu1 %1156 }
 0x674   :  { %v1158_v52 = vsub.f32 %v1153_v45, %v1157_v51  ;;  %v1402_v45 = vrot.slane %v5876_v21, 4 }
 0x676   :  { %v1159_v53 = vmul.f32 1.442695, %v1158_v52  ;;  %v6251_v21 = vmul.f32 %v1402_v45, %v5954_v11  ;;  %v6257_v52 = vld [vmem:[%s7116_s5 + $0x88] sm:$0xff] }
 0x677   :  { %v1710_v61 = vpop.permute.xlu1 %1709 }
 0x678   :  { %5555 = vpow2.f32 %v1159_v53  ;;  %v1712_v63 = vrot.slane %v1710_v61, 2  ;;  %v6264_v53 = vld [vmem:[%s7116_s5 + $0x80] sm:$0xff]  ;;  %v1415_v11 = vrot.slane %v6251_v21, 4 }
 0x67a   :  { %v1717_v0 = vmul.f32 %v1712_v63, %v6092_v49 }
 0x67c   :  { %v1857_v28 = vrot.slane %v1717_v0, 6 }
 0x685   :  { %v5556_v57 = vpop.eup %5555 }
 0x686   :  { %v1161_v59 = vsel %vm6163_vm12, %v5556_v57, 0.0 }
 0x687   :  { %v1162_v60 = vsel %vm1154_vm13, %v1161_v59, 0.0 }
 0x688   :  { %1163 = vadd.xlane.f32.xlu0 %v1162_v60 }
 0x69e   :  { %1598 = vperm.xlu0 %5535, %v4746_v62  }
 0x6a2   :  { %1722 = vrot.lane.b32.xlu0 %v1717_v0, %s5716_s0 }
 0x711   :  { %v1164_v1 = vpop.xlane.xlu0 %1163 }
 0x712   :  { %5557 = vrcp.f32 %v1164_v1 }
 0x719   :  { %v6183_v4 = vpop.permute.xlu0 %1598 }
 0x71a   :  { %v1711_v6 = vrot.slane %v6183_v4, 2  ;;  %v6200_v38 = vmul.f32 %v6183_v4, %v6098_v54  ;;  %v6220_v54 = vld [vmem:[%s7117_s6 + $0x68] sm:$0xff] }
 0x71c   :  { %v1713_v17 = vsel %vm754_vm9, %v1711_v6, %v1712_v63 }
 0x71d   :  { %v6188_v23 = vmul.f32 %v1713_v17, %v6088_v41 }
 0x71f   :  { %v5558_v24 = vpop.eup %5557  ;;  %1720 = vrot.lane.b32.xlu1 %v6188_v23, %s5716_s0  ;;  %v1856_v49 = vrot.slane %v6188_v23, 6 }
 0x720   :  { %v1166_v34 = vmul.f32 %v5558_v24, %v1161_v59  ;;  %v1723_v59 = vpop.permute.xlu0 %1722 }
 0x721   :  { %v6205_v41 = vsel %vm44_vm0, %v1856_v49, %v1857_v28 }
 0x722   :  { %5159 = vmatmul.mubr.msk.f32.vlgmr.msra.gmra.mxu1 %vm1168_vm14, %v1166_v34 }
 0x723   :  { %1603 = vrot.lane.b32.xlu1 %v6200_v38, %s5716_s0  ;;  %5162 = vmatpush3.msra.mxu1 %v6196_v37 }
 0x724   :  { %5163 = vmatprep.subr.mxu1 %v5712_v3  ;;  %5169 = vmatprep.mubr.msk.f32.mxu1 %vm5713_vm3, %v5712_v3 }
 0x725   :  { %5164 = vmatpush3.msra.mxu1 %v6211_v40 }
 0x726   :  { %5165 = vmatprep.subr.mxu1 %v5712_v3 }
 0x727   :  { %5166 = vmatpush3.msra.mxu1 %v6220_v54 }
 0x728   :  { %5167 = vmatprep.subr.mxu1 %v5712_v3 }
 0x729   :  { %5168 = vmatpush3.msra.mxu1 %v6229_v43 }
 0x72a   :  { %5183 = vmatprep.subr.mxu1 %v5712_v3 }
 0x791   :  { %v1721_v57 = vpop.permute.xlu1 %1720 }
 0x7e2   :  { %v1240_v48 = vpop.f32.mrf.mxu1 }
 0x7e3   :  { %5170 = vmatmul.mubr.msk.f32.vlgmr.msra.gmra.mxu1 %vm635_vm5, %v1240_v48 }
 0x7e4   :  { %5184 = vmatpush3.msra.mxu1 %v6239_v46  ;;  %v5160_v51 = vpop.f32.mrf.mxu1  ;;  %5191 = vmatprep.mubr.msk.f32.mxu1 %vm5713_vm3, %v5712_v3 }
 0x7e5   :  { %5185 = vmatprep.subr.mxu1 %v5712_v3 }
 0x7e6   :  { %5186 = vmatpush3.msra.mxu1 %v6245_v50 }
 0x7e7   :  { %5187 = vmatprep.subr.mxu1 %v5712_v3 }
 0x7e8   :  { %5188 = vmatpush3.msra.mxu1 %v6257_v52 }
 0x7e9   :  { %5189 = vmatprep.subr.mxu1 %v5712_v3 }
 0x7ea   :  { %5190 = vmatpush3.msra.mxu1 %v6264_v53 }
 0x7eb   :  { %5192 = vmatmul.mubr.msk.f32.vlgmr.msra.gmra.mxu1 %vm635_vm5, %v1415_v11  ;;  %5212 = vmatprep.subr.mxu1 %v5936_v55 }
 0x7ec   :  { %5213 = vmatpush3.msra.mxu1 %v5936_v55  ;;  %5220 = vmatprep.mubr.msk.f32.mxu1 %vm635_vm5, %v1721_v57  ;;  %v6295_v55 = vld [vmem:[%s7116_s5 + $0x78] sm:$0xff] }
 0x7ed   :  { %5214 = vmatprep.subr.mxu1 %v5972_v30  ;;  %5195 = vmatpush3.msra.mxu0 %v6295_v55 }
 0x7ee   :  { %5215 = vmatpush3.msra.mxu1 %v5972_v30  ;;  %5196 = vmatprep.subr.mxu0 %v5712_v3  ;;  %v6302_v30 = vld [vmem:[%s7116_s5 + $0x70] sm:$0xff] }
 0x7ef   :  { %5216 = vmatprep.subr.mxu1 %v5980_v31  ;;  %5197 = vmatpush3.msra.mxu0 %v6302_v30 }
 0x7f0   :  { %5217 = vmatpush3.msra.mxu1 %v5980_v31  ;;  %5201 = vmatprep.subr.mxu0 %v5712_v3 }
 0x7f1   :  { %5218 = vmatprep.subr.mxu1 %v5987_v32 }
 0x7f2   :  { %5219 = vmatpush3.msra.mxu1 %v5987_v32  ;;  %v6309_v32 = vld [vmem:[%s7117_s6 + $0xa0] ss:$0 sm:$0xff] }
 0x7f3   :  { %5221 = vmatmul.mubr.msk.f32.vlgmr.msra.gmra.mxu1 %vm635_vm5, %v1723_v59  ;;  %5234 = vmatprep.subr.mxu1 %v6031_v19 }
 0x7f4   :  { %5235 = vmatpush3.msra.mxu1 %v6031_v19 }
 0x7f5   :  { %5236 = vmatprep.subr.mxu1 %v6036_v22 }
 0x7f6   :  { %5237 = vmatpush3.msra.mxu1 %v6036_v22 }
 0x7f7   :  { %5238 = vmatprep.subr.mxu1 %v6044_v20 }
 0x7f8   :  { %5239 = vmatpush3.msra.mxu1 %v6044_v20 }
 0x7f9   :  { %5240 = vmatprep.subr.mxu1 %v6060_v26 }
 0x7fa   :  { %5241 = vmatpush3.msra.mxu1 %v6060_v26 }
 0x7fb   :  { %5252 = vmatprep.subr.mxu1 %v5712_v3 }
 0x8a3   :  { %v1321_v31 = vpop.f32.mrf.mxu1 }
 0x8a4   :  { %v1392_v60 = vadd.f32 %v6170_v47, %v1321_v31  ;;  %v1604_v47 = vpop.permute.xlu1 %1603 }
 0x8a5   :  { %v5171_v61 = vpop.f32.mrf.mxu1 }
 0x8a6   :  { %v1400_v62 = vadd.f32 %v6309_v32, %v1392_v60 }
 0x8a8   :  { %v1401_v63 = vmax.f32 %v1400_v62, 0.0 }
 0x8aa   :  { %5199 = vmatmul.mubr.msk.f32.vlgmr.msra.gmra.mxu0 %vm126_vm6, %v1401_v63 }
 0x8ab   :  { %v6314_v0 = vpop.f32.mrf.mxu1  ;;  %5202 = vmatpush3.msra.mxu0 %v5809_v9  ;;  %5209 = vmatprep.mubr.msk.f32.mxu0 %vm5713_vm3, %v5712_v3 }
 0x8ac   :  { %5203 = vmatprep.subr.mxu0 %v5712_v3 }
 0x8ad   :  { %v5193_v1 = vpop.f32.mrf.mxu1  ;;  %5204 = vmatpush3.msra.mxu0 %v5816_v10 }
 0x8ae   :  { %5205 = vmatprep.subr.mxu0 %v5712_v3 }
 0x8af   :  { %5206 = vmatpush3.msra.mxu0 %v5828_v12 }
 0x8b0   :  { %5207 = vmatprep.subr.mxu0 %v5712_v3 }
 0x8b1   :  { %5208 = vmatpush3.msra.mxu0 %v5836_v13 }
 0x8b2   :  { %5210 = vmatmul.mubr.msk.f32.vlgmr.msra.gmra.mxu0 %vm635_vm5, %v1604_v47  ;;  %5223 = vmatprep.subr.mxu0 %v5712_v3 }
 0x8b3   :  { %v5222_v9 = vpop.f32.mrf.mxu1  ;;  %5224 = vmatpush3.msra.mxu0 %v6055_v25  ;;  %5231 = vmatprep.mubr.msk.f32.mxu0 %vm5713_vm3, %v5712_v3 }
 0x8b4   :  { %v1800_v10 = vadd.f32 %v5222_v9, %v6000_v36  ;;  %5225 = vmatprep.subr.mxu0 %v5712_v3 }
 0x8b5   :  { %v1794_v12 = vpop.f32.mrf.mxu1  ;;  %5226 = vmatpush3.msra.mxu0 %v6065_v27 }
 0x8b6   :  { %v1795_v6 = vadd.f32 %v6000_v36, %v1794_v12  ;;  %5227 = vmatprep.subr.mxu0 %v5712_v3  ;;  %v1806_v13 = vrot.slane %v1800_v10, 6 }
 0x8b7   :  { %5228 = vmatpush3.msra.mxu0 %v6077_v29 }
 0x8b8   :  { %v1805_v17 = vrot.slane %v1795_v6, 6  ;;  %5229 = vmatprep.subr.mxu0 %v5712_v3 }
 0x8b9   :  { %5230 = vmatpush3.msra.mxu0 %v6084_v35 }
 0x8ba   :  { %1824 = vrot.lane.b32.xlu0 %v1805_v17, %s5714_s25  ;;  %v1807_v24 = vsel %vm44_vm0, %v1805_v17, %v1806_v13  ;;  %5245 = vmatprep.subr.mxu0 %v5712_v3  ;;  %v1810_v36 = vadd.f32 %v1805_v17, %v6011_v44 }
 0x8bb   :  { %1826 = vrot.lane.b32.xlu1 %v1807_v24, %s5714_s25  ;;  %v1811_v59 = vadd.f32 %v1807_v24, %v5949_v5 }
 0x8bc   :  { %v4752_v28 = vmul.f32 -1.442695, %v1810_v36 }
 0x8bd   :  { %v4753_v31 = vmul.f32 -1.442695, %v1811_v59 }
 0x8be   :  { %5559 = vpow2.f32 %v4752_v28 }
 0x8cb   :  { %v5560_v34 = vpop.eup %5559 }
 0x8cc   :  { %v1818_v45 = vadd.f32 1.0, %v5560_v34 }
 0x8ce   :  { %5561 = vrcp.f32 %v1818_v45 }
 0x8cf   :  { %5563 = vpow2.f32 %v4753_v31 }
 0x8db   :  { %v5562_v48 = vpop.eup %5561 }
 0x8dc   :  { %v5564_v60 = vpop.eup %5563 }
 0x8dd   :  { %v1819_v61 = vadd.f32 1.0, %v5564_v60 }
 0x8df   :  { %5565 = vrcp.f32 %v1819_v61 }
 0x8ec   :  { %v5566_v6 = vpop.eup %5565 }
 0x92c   :  { %v1825_v51 = vpop.permute.xlu0 %1824 }
 0x92d   :  { %v1830_v57 = vmul.f32 %v5562_v48, %v1825_v51  ;;  %v1827_v12 = vpop.permute.xlu1 %1826 }
 0x92e   :  { %v1831_v13 = vmul.f32 %v5566_v6, %v1827_v12  ;;  %v1861_v12 = vmul.f32 %v5562_v48, %v1856_v49  ;;  %v1703_v49 = vrot.slane %v6200_v38, 6 }
 0x92f   :  { %1834 = vrot.lane.b32.xlu1 %v1830_v57, %s5714_s25 }
 0x96a   :  { %v6345_v62 = vpop.f32.mrf.mxu0 }
 0x96c   :  { %v5200_v63 = vpop.f32.mrf.mxu0 }
 0x972   :  { %v1673_v1 = vpop.f32.mrf.mxu0 }
 0x973   :  { %v1674_v47 = vadd.f32 %v5942_v56, %v1673_v1 }
 0x974   :  { %v5211_v9 = vpop.f32.mrf.mxu0 }
 0x975   :  { %v1678_v10 = vrot.slane %v1674_v47, 6  ;;  %v1844_v47 = vsub.f32 1.0, %v5562_v48 }
 0x977   :  { %1687 = vrot.lane.b32.xlu0 %v1678_v10, %s5714_s25  ;;  %v1680_v28 = vadd.f32 %v1678_v10, %v6009_v42 }
 0x979   :  { %v4749_v34 = vmul.f32 -1.442695, %v1680_v28 }
 0x97b   :  { %1836 = vrot.lane.b32.xlu0 %v1831_v13, %s5714_s25  ;;  %v1845_v13 = vsub.f32 1.0, %v5566_v6 }
 0x9a1   :  { %v1835_v17 = vpop.permute.xlu1 %1834 }
 0x9a2   :  { %v1840_v24 = vadd.f32 %v1835_v17, %v6011_v44 }
 0x9a4   :  { %5567 = vtanh.f32 %v1840_v24 }
 0x9a5   :  { %5569 = vpow2.f32 %v4749_v34 }
 0x9b1   :  { %v5568_v36 = vpop.eup %5567 }
 0x9b2   :  { %1848 = vrot.lane.b32.xlu0 %v5568_v36, %s5716_s0  ;;  %v5570_v56 = vpop.eup %5569  ;;  %v1862_v36 = vmul.f32 %v5566_v6, %v6205_v41 }
 0x9b3   :  { %v1684_v45 = vadd.f32 1.0, %v5570_v56 }
 0x9b5   :  { %5571 = vrcp.f32 %v1684_v45 }
 0x9c2   :  { %v5572_v51 = vpop.eup %5571 }
 0x9c3   :  { %v1697_v48 = vsub.f32 1.0, %v5572_v51 }
 0x9e9   :  { %v1688_v57 = vpop.permute.xlu0 %1687 }
 0x9ea   :  { %v1690_v59 = vmul.f32 %v5572_v51, %v1688_v57 }
 0x9ec   :  { %1692 = vrot.lane.b32.xlu1 %v1690_v59, %s5714_s25  ;;  %v1705_v59 = vmul.f32 %v5572_v51, %v1703_v49 }
 0x9ed   :  { %v1837_v31 = vpop.permute.xlu0 %1836 }
 0x9ee   :  { %v1841_v60 = vadd.f32 %v1837_v31, %v5949_v5 }
 0x9f0   :  { %5573 = vtanh.f32 %v1841_v60 }
 0x9fd   :  { %v5574_v44 = vpop.eup %5573 }
 0x9fe   :  { %1850 = vrot.lane.b32.xlu1 %v5574_v44, %s5716_s0 }
 0xa24   :  { %v1849_v1 = vpop.permute.xlu0 %1848 }
 0xa25   :  { %v1854_v9 = vmul.f32 %v1849_v1, %v1844_v47 }
 0xa27   :  { %v6360_v24 = vadd.f32 %v1861_v12, %v1854_v9 }
 0xa29   :  { %v1943_v56 = vrot.slane %v6360_v24, 2 }
 0xa5e   :  { %v1693_v61 = vpop.permute.xlu1 %1692 }
 0xa5f   :  { %v1695_v63 = vadd.f32 %v1693_v61, %v6009_v42 }
 0xa61   :  { %5575 = vtanh.f32 %v1695_v63 }
 0xa6e   :  { %v5576_v10 = vpop.eup %5575 }
 0xa6f   :  { %1699 = vrot.lane.b32.xlu0 %v5576_v10, %s5716_s0 }
 0xa70   :  { %v1851_v17 = vpop.permute.xlu1 %1850 }
 0xa71   :  { %v1855_v28 = vmul.f32 %v1851_v17, %v1845_v13  ;;  %v6418_v13 = vld [vmem:[%s7116_s5 + $0xa5] ss:$0 sm:$0xff] }
 0xa72   :  { %v1485_v17 = vadd.f32 %v6418_v13, %v6314_v0 }
 0xa73   :  { %v6363_v34 = vadd.f32 %v1862_v36, %v1855_v28  ;;  %v4719_v36 = vld [vmem:[%s7116_s5 + $0xa4] ss:$0 sm:$0xff] }
 0xa74   :  { %v6427_v28 = vadd.f32 %v4719_v36, %v5995_v33 }
 0xa75   :  { %v1944_v45 = vrot.slane %v6363_v34, 2 }
 0xa77   :  { %1948 = vrot.lane.b32.xlu0 %v1944_v45, %s5716_s0  ;;  %v1945_v23 = vsel %vm754_vm9, %v1943_v56, %v1944_v45  ;;  %v1563_v56 = vadd.f32 %v6345_v62, %v6427_v28 }
 0xa78   :  { %1946 = vrot.lane.b32.xlu1 %v1945_v23, %s5716_s0 }
 0xa79   :  { %v1564_v45 = vadd.f32 %v1563_v56, %v1485_v17 }
 0xa7b   :  { %v4745_v23 = vmul.f32 -1.442695, %v1564_v45 }
 0xa7d   :  { %5577 = vpow2.f32 %v4745_v23 }
 0xa8a   :  { %v5578_v0 = vpop.eup %5577 }
 0xae1   :  { %v1700_v57 = vpop.permute.xlu0 %1699 }
 0xae2   :  { %v1702_v31 = vmul.f32 %v1700_v57, %v1697_v48 }
 0xae4   :  { %v6371_v41 = vadd.f32 %v1705_v59, %v1702_v31  ;;  %v1568_v31 = vadd.f32 1.0, %v5578_v0 }
 0xae6   :  { %v1866_v6 = vrot.slane %v6371_v41, 2 }
 0xae8   :  { %1867 = vrot.lane.b32.xlu1 %v1866_v6, %s5716_s0 }
 0xae9   :  { %v1949_v44 = vpop.permute.xlu0 %1948 }
 0xaea   :  { %v1947_v60 = vpop.permute.xlu1 %1946 }
 0xaeb   :  { %5242 = vmatprep.mubr.msk.f32.mxu1 %vm635_vm5, %v1947_v60 }
 0xaec   :  { %5243 = vmatmul.mubr.msk.f32.vlgmr.msra.gmra.mxu1 %vm635_vm5, %v1949_v44 }
 0xaed   :  { %5253 = vmatpush3.msk.msra.mxu1 %vm44_vm0, %v1949_v44  ;;  %5256 = vmatprep.mubr.msk.f32.mxu1 %vm5713_vm3, %v5712_v3 }
 0xaee   :  { %5254 = vmatprep.subr.mxu1 %v5712_v3 }
 0xaef   :  { %5255 = vmatpush3.msra.mxu1 %v1947_v60 }
 0xaf0   :  { %5259 = vmatprep.subr.mxu1 %v5712_v3 }
 0xb5a   :  { %v1868_v38 = vpop.permute.xlu1 %1867 }
 0xb5b   :  { %5232 = vmatmul.mubr.msk.f32.vlgmr.msra.gmra.mxu0 %vm635_vm5, %v1868_v38 }
 0xb5c   :  { %5249 = vmatprep.mubr.msk.f32.mxu0 %vm5713_vm3, %v5712_v3 }
 0xbac   :  { %v5244_v51 = vpop.f32.mrf.mxu1 }
 0xbad   :  { %v2026_v61 = vadd.f32 %v5244_v51, %v6115_v58 }
 0xbae   :  { %v2020_v63 = vpop.f32.mrf.mxu1 }
 0xbaf   :  { %5246 = vmatpush3.xpose.msk.msra.mxu0 %vm126_vm6, %v2026_v61  ;;  %v2021_v1 = vadd.f32 %v6115_v58, %v2020_v63 }
 0xbb0   :  { %5247 = vmatprep.subr.mxu0 %v5712_v3 }
 0xbb3   :  { %5248 = vmatpush3.xpose.msk.msra.mxu0 %vm126_vm6, %v2021_v1 }
 0xbb4   :  { %5270 = vmatprep.subr.mxu0 %v5712_v3 }
 0xc1b   :  { %v1937_v47 = vpop.f32.mrf.mxu0 }
 0xc1c   :  { %v1938_v9 = vadd.f32 %v6124_v2, %v1937_v47 }
 0xc1d   :  { %v5233_v10 = vpop.f32.mrf.mxu0 }
 0xc1e   :  { %5250 = vmatmul.mubr.msk.f32.vlgmr.msra.gmra.mxu0 %vm126_vm6, %v1938_v9 }
 0xc1f   :  { %5271 = vmatpush3.msra.mxu0 %v6132_v7  ;;  %5278 = vmatprep.mubr.msk.f32.mxu0 %vm5713_vm3, %v5712_v3 }
 0xc20   :  { %5272 = vmatprep.subr.mxu0 %v5712_v3 }
 0xc21   :  { %5273 = vmatpush3.msra.mxu0 %v6138_v8 }
 0xc22   :  { %5274 = vmatprep.subr.mxu0 %v5712_v3 }
 0xc23   :  { %5275 = vmatpush3.msra.mxu0 %v6147_v15 }
 0xc24   :  { %5276 = vmatprep.subr.mxu0 %v5712_v3 }
 0xc25   :  { %5277 = vmatpush3.msra.mxu0 %v6154_v16 }
 0xc26   :  { %5279 = vmatmul.mubr.msk.f32.vlgmr.msra.gmra.mxu0 %vm635_vm5, %v1868_v38  ;;  %5292 = vmatprep.subr.mxu0 %v5712_v3  ;;  %v4768_v38 = vld [vmem:[%s7114_s3 + $0x28] sm:$0xf] }
 0xc27   :  { %5293 = vmatpush3.msra.mxu0 %v6295_v55  ;;  %5296 = vmatprep.mubr.msk.f32.mxu0 %vm5713_vm3, %v5712_v3 }
 0xc28   :  { %5294 = vmatprep.subr.mxu0 %v5712_v3 }
 0xc29   :  { %5295 = vmatpush3.msra.mxu0 %v6302_v30 }
 0xc2a   :  { %5299 = vmatprep.subr.mxu0 %v5712_v3 }
 0xcde   :  { %v2104_v58 = vpop.f32.mrf.mxu0 }
 0xcdf   :  { %v2108_v2 = vmul.f32 1.25, %v2104_v58 }
 0xce0   :  { %v5251_v7 = vpop.f32.mrf.mxu0 }
 0xce1   :  { %v2109_v8 = vsel %vm6163_vm12, %v2108_v2, -1e+30 }
 0xce2   :  { %v2110_v15 = vsel %vm1154_vm13, %v2109_v8, -inf }
 0xce3   :  { %2111 = vmax.xlane.f32.xlu0 %v2110_v15 }
 0xce6   :  { %v6413_v16 = vpop.f32.mrf.mxu0 }
 0xce8   :  { %v5280_v12 = vpop.f32.mrf.mxu0 }
 0xcf9   :  { %1572 = vrot.lane.b32.xlu0 %v1485_v17, %s5714_s25 }
 0xd6c   :  { %v2112_v49 = vpop.xlane.xlu0 %2111 }
 0xd6d   :  { %v2113_v48 = vsub.f32 %v2109_v8, %v2112_v49 }
 0xd6f   :  { %v2114_v57 = vmul.f32 1.442695, %v2113_v48 }
 0xd70   :  { %v1573_v33 = vpop.permute.xlu0 %1572 }
 0xd71   :  { %5579 = vpow2.f32 %v2114_v57 }
 0xd72   :  { %5581 = vrcp.f32 %v1568_v31 }
 0xd7e   :  { %v5580_v59 = vpop.eup %5579 }
 0xd7f   :  { %v2116_v6 = vsel %vm6163_vm12, %v5580_v59, 0.0  ;;  %v5582_v44 = vpop.eup %5581 }
 0xd80   :  { %v2117_v60 = vsel %vm1154_vm13, %v2116_v6, 0.0  ;;  %v1575_v62 = vmul.f32 %v5582_v44, %v1573_v33  ;;  %v1582_v9 = vsub.f32 1.0, %v5582_v44 }
 0xd81   :  { %2118 = vadd.xlane.f32.xlu1 %v2117_v60 }
 0xd92   :  { %1577 = vrot.lane.b32.xlu1 %v1575_v62, %s5714_s25  ;;  %v6588_v62 = vld [vmem:[%s7116_s5 + $0xa3] ss:$0 sm:$0xff] }
 0xd96   :  { %1588 = vrot.lane.b32.xlu1 %v1415_v11, %s5715_s21  ;;  %v4767_v11 = vld [vmem:[%s7114_s3 + $0x20] sm:$0xff] }
 0xd9a   :  { %2645 = vperm.xlu1 %5536, %v4768_v38  }
 0xe0a   :  { %v2119_v51 = vpop.xlane.xlu1 %2118 }
 0xe0b   :  { %5583 = vrcp.f32 %v2119_v51 }
 0xe0e   :  { %v1578_v61 = vpop.permute.xlu1 %1577 }
 0xe0f   :  { %v1580_v63 = vadd.f32 %v1578_v61, %v1563_v56 }
 0xe11   :  { %5585 = vtanh.f32 %v1580_v63 }
 0xe18   :  { %v5584_v1 = vpop.eup %5583 }
 0xe19   :  { %v2121_v47 = vmul.f32 %v5584_v1, %v2116_v6 }
 0xe1b   :  { %5257 = vmatmul.mubr.msk.f32.vlgmr.msra.gmra.mxu1 %vm1168_vm14, %v2121_v47 }
 0xe1c   :  { %5260 = vmatpush3.msra.mxu1 %v6196_v37  ;;  %5267 = vmatprep.mubr.msk.f32.mxu1 %vm5713_vm3, %v5712_v3  ;;  %v1589_v37 = vpop.permute.xlu1 %1588 }
 0xe1d   :  { %5261 = vmatprep.subr.mxu1 %v5712_v3  ;;  %v1591_v10 = vmul.f32 %v5582_v44, %v1589_v37 }
 0xe1e   :  { %v5586_v21 = vpop.eup %5585  ;;  %5262 = vmatpush3.msra.mxu1 %v6211_v40 }
 0xe1f   :  { %1584 = vrot.lane.b32.xlu0 %v5586_v21, %s5716_s0  ;;  %5263 = vmatprep.subr.mxu1 %v5712_v3 }
 0xe20   :  { %5264 = vmatpush3.msra.mxu1 %v6220_v54  ;;  %v2646_v2 = vpop.permute.xlu1 %2645 }
 0xe21   :  { %5265 = vmatprep.subr.mxu1 %v5712_v3  ;;  %v2649_v8 = vmul.f32 %v2646_v2, %v6363_v34 }
 0xe22   :  { %5266 = vmatpush3.msra.mxu1 %v6229_v43 }
 0xe23   :  { %2531 = vperm.xlu0 %5535, %v4767_v11   ;;  %5281 = vmatprep.subr.mxu1 %v5712_v3  ;;  %v2653_v43 = vrot.slane %v2649_v8, 2  ;;  %v2793_v36 = vrot.slane %v2649_v8, 6 }
 0xe91   :  { %v1585_v40 = vpop.permute.xlu0 %1584 }
 0xe92   :  { %v1587_v58 = vmul.f32 %v1585_v40, %v1582_v9 }
 0xe94   :  { %v6456_v7 = vadd.f32 %v1591_v10, %v1587_v58 }
 0xe96   :  { %v6461_v54 = vmul.f32 %v6183_v4, %v6456_v7 }
 0xe98   :  { %2345 = vrot.lane.b32.xlu0 %v6461_v54, %s5716_s0 }
 0xe9c   :  { %2657 = vrot.lane.b32.xlu0 %v2653_v43, %s5716_s0 }
 0xe9e   :  { %v6466_v15 = vpop.permute.xlu0 %2531 }
 0xe9f   :  { %v2533_v12 = vrot.slane %v6466_v15, 6  ;;  %v6471_v17 = vmul.f32 %v6466_v15, %v6360_v24 }
 0xea1   :  { %v2652_v34 = vrot.slane %v6471_v17, 2  ;;  %v2792_v4 = vrot.slane %v6471_v17, 6  ;;  %v6478_v56 = vmul.f32 %v2533_v12, %v6371_v41  ;;  %v6502_v41 = vld [vmem:[%s7116_s5 + $0x58] sm:$0xff] }
 0xea3   :  { %v2654_v45 = vsel %vm754_vm9, %v2652_v34, %v2653_v43  ;;  %v6484_v23 = vsel %vm44_vm0, %v2792_v4, %v2793_v36  ;;  %v2537_v24 = vrot.slane %v6478_v56, 2  ;;  %v6603_v34 = vld [vmem:[%s7116_s5 + $0xa1] ss:$0 sm:$0xff] }
 0xea4   :  { %2655 = vrot.lane.b32.xlu1 %v2654_v45, %s5716_s0 }
 0xea8   :  { %2538 = vrot.lane.b32.xlu1 %v2537_v24, %s5716_s0 }
 0xedb   :  { %v2194_v49 = vpop.f32.mrf.mxu1 }
 0xedc   :  { %5268 = vmatmul.mubr.msk.f32.vlgmr.msra.gmra.mxu1 %vm635_vm5, %v2194_v49 }
 0xedd   :  { %v5258_v48 = vpop.f32.mrf.mxu1  ;;  %5282 = vmatpush3.msra.mxu1 %v6239_v46  ;;  %5289 = vmatprep.mubr.msk.f32.mxu1 %vm5713_vm3, %v5712_v3 }
 0xede   :  { %5283 = vmatprep.subr.mxu1 %v5712_v3 }
 0xedf   :  { %5284 = vmatpush3.msra.mxu1 %v6245_v50  ;;  %v6510_v50 = vld [vmem:[%s7116_s5 + $0x50] sm:$0xff] }
 0xee0   :  { %5285 = vmatprep.subr.mxu1 %v5712_v3 }
 0xee1   :  { %5286 = vmatpush3.msra.mxu1 %v6257_v52  ;;  %v6517_v52 = vld [vmem:[%s7116_s5 + $0x48] sm:$0xff] }
 0xee2   :  { %5287 = vmatprep.subr.mxu1 %v5712_v3 }
 0xee3   :  { %5288 = vmatpush3.msra.mxu1 %v6264_v53  ;;  %v6524_v53 = vld [vmem:[%s7116_s5 + $0x40] sm:$0xff] }
 0xee4   :  { %5310 = vmatprep.subr.mxu1 %v6502_v41 }
 0xf0a   :  { %v2346_v46 = vpop.permute.xlu0 %2345 }
 0xf0b   :  { %5290 = vmatmul.mubr.msk.f32.vlgmr.msra.gmra.mxu1 %vm635_vm5, %v2346_v46 }
 0xf0c   :  { %5311 = vmatpush3.msra.mxu1 %v6502_v41 }
 0xf0d   :  { %5312 = vmatprep.subr.mxu1 %v6510_v50 }
 0xf0e   :  { %5313 = vmatpush3.msra.mxu1 %v6510_v50  ;;  %v2658_v0 = vpop.permute.xlu0 %2657 }
 0xf0f   :  { %5314 = vmatprep.subr.mxu1 %v6517_v52 }
 0xf10   :  { %5315 = vmatpush3.msra.mxu1 %v6517_v52 }
 0xf11   :  { %5316 = vmatprep.subr.mxu1 %v6524_v53 }
 0xf12   :  { %5317 = vmatpush3.msra.mxu1 %v6524_v53 }
 0xf13   :  { %5332 = vmatprep.subr.mxu1 %v6031_v19 }
 0xf16   :  { %v2656_v57 = vpop.permute.xlu1 %2655 }
 0xf17   :  { %5318 = vmatprep.mubr.msk.f32.mxu1 %vm635_vm5, %v2656_v57 }
 0xf18   :  { %5319 = vmatmul.mubr.msk.f32.vlgmr.msra.gmra.mxu1 %vm635_vm5, %v2658_v0 }
 0xf19   :  { %5333 = vmatpush3.msra.mxu1 %v6031_v19 }
 0xf1a   :  { %5334 = vmatprep.subr.mxu1 %v6036_v22 }
 0xf1b   :  { %5335 = vmatpush3.msra.mxu1 %v6036_v22  ;;  %v6545_v22 = vld [vmem:[%s7116_s5 + $0x28] sm:$0xff] }
 0xf1c   :  { %5336 = vmatprep.subr.mxu1 %v6044_v20 }
 0xf1d   :  { %5337 = vmatpush3.msra.mxu1 %v6044_v20  ;;  %v6554_v20 = vld [vmem:[%s7116_s5 + $0x20] sm:$0xff] }
 0xf1e   :  { %5338 = vmatprep.subr.mxu1 %v6060_v26 }
 0xf1f   :  { %5339 = vmatpush3.msra.mxu1 %v6060_v26  ;;  %v6561_v26 = vld [vmem:[%s7116_s5 + $0x18] sm:$0xff] }
 0xf20   :  { %5350 = vmatprep.subr.mxu1 %v5712_v3 }
 0xf9c   :  { %v2267_v59 = vpop.f32.mrf.mxu1 }
 0xf9d   :  { %v2338_v31 = vadd.f32 %v6413_v16, %v2267_v59  ;;  %v6568_v16 = vld [vmem:[%s7116_s5 + $0x10] sm:$0xff] }
 0xf9e   :  { %v5269_v6 = vpop.f32.mrf.mxu1 }
 0xf9f   :  { %v2341_v19 = vadd.f32 %v6309_v32, %v2338_v31  ;;  %v2539_v32 = vpop.permute.xlu1 %2538 }
 0xfa1   :  { %v2342_v60 = vmax.f32 %v2341_v19, 0.0 }
 0xfa3   :  { %5297 = vmatmul.mubr.msk.f32.vlgmr.msra.gmra.mxu0 %vm126_vm6, %v2342_v60 }
 0xfa4   :  { %5300 = vmatpush3.msra.mxu0 %v6545_v22  ;;  %5307 = vmatprep.mubr.msk.f32.mxu0 %vm5713_vm3, %v5712_v3 }
 0xfa5   :  { %5301 = vmatprep.subr.mxu0 %v5712_v3 }
 0xfa6   :  { %5302 = vmatpush3.msra.mxu0 %v6554_v20 }
 0xfa7   :  { %5303 = vmatprep.subr.mxu0 %v5712_v3 }
 0xfa8   :  { %5304 = vmatpush3.msra.mxu0 %v6561_v26 }
 0xfa9   :  { %5305 = vmatprep.subr.mxu0 %v5712_v3 }
 0xfaa   :  { %5306 = vmatpush3.msra.mxu0 %v6568_v16 }
 0xfab   :  { %5308 = vmatmul.mubr.msk.f32.vlgmr.msra.gmra.mxu0 %vm635_vm5, %v2539_v32  ;;  %5321 = vmatprep.subr.mxu0 %v5712_v3 }
 0xfac   :  { %5322 = vmatpush3.msra.mxu0 %v6055_v25  ;;  %5329 = vmatprep.mubr.msk.f32.mxu0 %vm5713_vm3, %v5712_v3 }
 0xfad   :  { %5323 = vmatprep.subr.mxu0 %v5712_v3 }
 0xfae   :  { %5324 = vmatpush3.msra.mxu0 %v6065_v27 }
 0xfaf   :  { %5325 = vmatprep.subr.mxu0 %v5712_v3 }
 0xfb0   :  { %5326 = vmatpush3.msra.mxu0 %v6077_v29 }
 0xfb1   :  { %5327 = vmatprep.subr.mxu0 %v5712_v3 }
 0xfb2   :  { %5328 = vmatpush3.msra.mxu0 %v6084_v35 }
 0xfb3   :  { %5343 = vmatprep.subr.mxu0 %v5712_v3 }
 0xfcb   :  { %v6583_v33 = vpop.f32.mrf.mxu1 }
 0xfcd   :  { %v5291_v25 = vpop.f32.mrf.mxu1 }
 0xfd8   :  { %v5320_v44 = vpop.f32.mrf.mxu1 }
 0xfd9   :  { %v2735_v27 = vadd.f32 %v6588_v62, %v5320_v44 }
 0xfda   :  { %v2729_v38 = vpop.f32.mrf.mxu1 }
 0xfdb   :  { %v2730_v29 = vadd.f32 %v6588_v62, %v2729_v38  ;;  %v2742_v51 = vrot.slane %v2735_v27, 4 }
 0xfdd   :  { %v2741_v61 = vrot.slane %v2730_v29, 4 }
 0xfdf   :  { %2760 = vrot.lane.b32.xlu0 %v2741_v61, %s5714_s25  ;;  %v2743_v35 = vsel %vm2740_vm15, %v2741_v61, %v2742_v51  ;;  %v2746_v63 = vadd.f32 %v2741_v61, %v5949_v5 }
 0xfe0   :  { %2762 = vrot.lane.b32.xlu1 %v2743_v35, %s5714_s25  ;;  %v2747_v11 = vadd.f32 %v2743_v35, %v5956_v14 }
 0xfe1   :  { %v4773_v1 = vmul.f32 -1.442695, %v2746_v63 }
 0xfe2   :  { %v4774_v37 = vmul.f32 -1.442695, %v2747_v11 }
 0xfe3   :  { %5587 = vpow2.f32 %v4773_v1 }
 0xff0   :  { %v5588_v47 = vpop.eup %5587 }
 0xff1   :  { %v2754_v21 = vadd.f32 1.0, %v5588_v47 }
 0xff3   :  { %5589 = vrcp.f32 %v2754_v21 }
 0xff4   :  { %5591 = vpow2.f32 %v4774_v37 }
0x1000   :  { %v5590_v9 = vpop.eup %5589 }
0x1001   :  { %v5592_v58 = vpop.eup %5591  ;;  %v2780_v63 = vsub.f32 1.0, %v5590_v9  ;;  %v2797_v21 = vmul.f32 %v5590_v9, %v2792_v4  ;;  %v2638_v4 = vrot.slane %v6478_v56, 6 }
0x1002   :  { %v2755_v2 = vadd.f32 1.0, %v5592_v58 }
0x1004   :  { %5593 = vrcp.f32 %v2755_v2 }
0x1011   :  { %v5594_v46 = vpop.eup %5593 }
0x1012   :  { %v2781_v11 = vsub.f32 1.0, %v5594_v46 }
0x1051   :  { %v2761_v40 = vpop.permute.xlu0 %2760 }
0x1052   :  { %v2766_v10 = vmul.f32 %v5590_v9, %v2761_v40  ;;  %v2763_v48 = vpop.permute.xlu1 %2762 }
0x1053   :  { %v2767_v57 = vmul.f32 %v5594_v46, %v2763_v48 }
0x1054   :  { %2770 = vrot.lane.b32.xlu1 %v2766_v10, %s5714_s25  ;;  %v2798_v10 = vmul.f32 %v5594_v46, %v6484_v23 }
0x1063   :  { %v6598_v8 = vpop.f32.mrf.mxu0 }
0x1065   :  { %v5298_v43 = vpop.f32.mrf.mxu0 }
0x106b   :  { %v2608_v36 = vpop.f32.mrf.mxu0 }
0x106c   :  { %v2609_v45 = vadd.f32 %v6603_v34, %v2608_v36 }
0x106d   :  { %v5309_v24 = vpop.f32.mrf.mxu0 }
0x106e   :  { %v2613_v49 = vrot.slane %v2609_v45, 4 }
0x1070   :  { %2622 = vrot.lane.b32.xlu0 %v2613_v49, %s5714_s25  ;;  %v2615_v0 = vadd.f32 %v2613_v49, %v6009_v42 }
0x1072   :  { %v4770_v59 = vmul.f32 -1.442695, %v2615_v0 }
0x1074   :  { %2772 = vrot.lane.b32.xlu0 %v2767_v57, %s5714_s25  ;;  %5595 = vpow2.f32 %v4770_v59  ;;  %v6646_v59 = vld [vmem:[%s7117_s6 + $0x9f] ss:$0 sm:$0xff] }
0x1081   :  { %v5596_v19 = vpop.eup %5595 }
0x1082   :  { %v2619_v60 = vadd.f32 1.0, %v5596_v19 }
0x10c6   :  { %v2771_v31 = vpop.permute.xlu1 %2770 }
0x10c7   :  { %v2776_v6 = vadd.f32 %v2771_v31, %v5949_v5 }
0x10c9   :  { %5597 = vtanh.f32 %v2776_v6 }
0x10ca   :  { %5599 = vrcp.f32 %v2619_v60 }
0x10d6   :  { %v5598_v32 = vpop.eup %5597 }
0x10d7   :  { %2784 = vrot.lane.b32.xlu0 %v5598_v32, %s5716_s0  ;;  %v5600_v25 = vpop.eup %5599  ;;  %v6657_v32 = vld [vmem:[%s7117_s6 + $0x9e] ss:$0 sm:$0xff] }
0x10d8   :  { %v2632_v9 = vsub.f32 1.0, %v5600_v25  ;;  %v2640_v24 = vmul.f32 %v5600_v25, %v2638_v4 }
0x10e2   :  { %v2623_v44 = vpop.permute.xlu0 %2622 }
0x10e3   :  { %v2625_v27 = vmul.f32 %v5600_v25, %v2623_v44 }
0x10e5   :  { %2627 = vrot.lane.b32.xlu1 %v2625_v27, %s5714_s25  ;;  %v6664_v27 = vld [vmem:[%s7117_s6 + $0x58] sm:$0xff] }
0x10e6   :  { %v2773_v38 = vpop.permute.xlu0 %2772 }
0x10e7   :  { %v2777_v29 = vadd.f32 %v2773_v38, %v5956_v14  ;;  %v6673_v38 = vld [vmem:[%s7117_s6 + $0x50] sm:$0xff] }
0x10e9   :  { %5601 = vtanh.f32 %v2777_v29  ;;  %v6680_v29 = vld [vmem:[%s7117_s6 + $0x48] sm:$0xff] }
0x10f6   :  { %v5602_v51 = vpop.eup %5601 }
0x10f7   :  { %2786 = vrot.lane.b32.xlu1 %v5602_v51, %s5716_s0  ;;  %v6687_v51 = vld [vmem:[%s7117_s6 + $0x40] sm:$0xff] }
0x1149   :  { %v2785_v35 = vpop.permute.xlu0 %2784 }
0x114a   :  { %v2790_v1 = vmul.f32 %v2785_v35, %v2780_v63 }
0x114c   :  { %v6618_v40 = vadd.f32 %v2797_v21, %v2790_v1  ;;  %v2416_v21 = vadd.f32 %v6418_v13, %v6583_v33 }
0x114e   :  { %v2879_v43 = vrot.slane %v6618_v40, 4 }
0x1157   :  { %v2628_v5 = vpop.permute.xlu1 %2627 }
0x1158   :  { %v2630_v61 = vadd.f32 %v2628_v5, %v6009_v42 }
0x115a   :  { %5603 = vtanh.f32 %v2630_v61 }
0x1167   :  { %v5604_v47 = vpop.eup %5603 }
0x1168   :  { %2634 = vrot.lane.b32.xlu0 %v5604_v47, %s5716_s0 }
0x1169   :  { %v2787_v37 = vpop.permute.xlu1 %2786 }
0x116a   :  { %v2791_v58 = vmul.f32 %v2787_v37, %v2781_v11  ;;  %v2497_v11 = vrot.slane %v2416_v21, 6 }
0x116c   :  { %v6621_v2 = vadd.f32 %v2798_v10, %v2791_v58 }
0x116e   :  { %v2880_v36 = vrot.slane %v6621_v2, 4 }
0x1170   :  { %2884 = vrot.lane.b32.xlu0 %v2880_v36, %s5716_s0  ;;  %v2881_v17 = vsel %vm2740_vm15, %v2879_v43, %v2880_v36 }
0x1171   :  { %2882 = vrot.lane.b32.xlu1 %v2881_v17, %s5716_s0 }
0x11da   :  { %v2635_v45 = vpop.permute.xlu0 %2634 }
0x11db   :  { %v2637_v49 = vmul.f32 %v2635_v45, %v2632_v9 }
0x11dd   :  { %v6629_v23 = vadd.f32 %v2640_v24, %v2637_v49 }
0x11df   :  { %v2802_v48 = vrot.slane %v6629_v23, 4 }
0x11e1   :  { %2803 = vrot.lane.b32.xlu1 %v2802_v48, %s5716_s0  ;;  %v4788_v48 = vld [vmem:[%s7114_s3 + $0x30] sm:$0xff] }
0x11e2   :  { %v2885_v57 = vpop.permute.xlu0 %2884 }
0x11e3   :  { %v2883_v46 = vpop.permute.xlu1 %2882 }
0x11e4   :  { %5340 = vmatprep.mubr.msk.f32.mxu1 %vm635_vm5, %v2883_v46 }
0x11e5   :  { %5341 = vmatmul.mubr.msk.f32.vlgmr.msra.gmra.mxu1 %vm635_vm5, %v2885_v57 }
0x11e6   :  { %5351 = vmatpush3.msk.msra.mxu1 %vm44_vm0, %v2885_v57  ;;  %5354 = vmatprep.mubr.msk.f32.mxu1 %vm5713_vm3, %v5712_v3 }
0x11e7   :  { %5352 = vmatprep.subr.mxu1 %v5712_v3 }
0x11e8   :  { %5353 = vmatpush3.msra.mxu1 %v2883_v46 }
0x11e9   :  { %5357 = vmatprep.subr.mxu1 %v5712_v3 }
0x1253   :  { %v2804_v56 = vpop.permute.xlu1 %2803 }
0x1254   :  { %5330 = vmatmul.mubr.msk.f32.vlgmr.msra.gmra.mxu0 %vm635_vm5, %v2804_v56 }
0x1255   :  { %5347 = vmatprep.mubr.msk.f32.mxu0 %vm5713_vm3, %v5712_v3 }
0x12a5   :  { %v5342_v0 = vpop.f32.mrf.mxu1 }
0x12a6   :  { %v2962_v31 = vadd.f32 %v6646_v59, %v5342_v0 }
0x12a7   :  { %v2956_v6 = vpop.f32.mrf.mxu1 }
0x12a8   :  { %5344 = vmatpush3.xpose.msk.msra.mxu0 %vm126_vm6, %v2962_v31  ;;  %v2957_v19 = vadd.f32 %v6646_v59, %v2956_v6  ;;  %v6719_v6 = vld [vmem:[%s7117_s6 + $0x78] sm:$0xff] }
0x12a9   :  { %5345 = vmatprep.subr.mxu0 %v5712_v3 }
0x12ac   :  { %5346 = vmatpush3.xpose.msk.msra.mxu0 %vm126_vm6, %v2957_v19 }
0x12ad   :  { %5368 = vmatprep.subr.mxu0 %v5712_v3 }
0x1314   :  { %v2873_v60 = vpop.f32.mrf.mxu0 }
0x1315   :  { %v2874_v25 = vadd.f32 %v6657_v32, %v2873_v60  ;;  %v6728_v60 = vld [vmem:[%s7117_s6 + $0x70] sm:$0xff] }
0x1316   :  { %v5331_v44 = vpop.f32.mrf.mxu0 }
0x1317   :  { %5348 = vmatmul.mubr.msk.f32.vlgmr.msra.gmra.mxu0 %vm126_vm6, %v2874_v25  ;;  %v4789_v25 = vld [vmem:[%s7114_s3 + $0x38] sm:$0xf]  ;;  %v6739_v44 = vld [vmem:[%s7117_s6 + $0x68] sm:$0xff] }
0x1318   :  { %5369 = vmatpush3.msra.mxu0 %v6664_v27  ;;  %5376 = vmatprep.mubr.msk.f32.mxu0 %vm5713_vm3, %v5712_v3 }
0x1319   :  { %5370 = vmatprep.subr.mxu0 %v5712_v3 }
0x131a   :  { %5371 = vmatpush3.msra.mxu0 %v6673_v38 }
0x131b   :  { %5372 = vmatprep.subr.mxu0 %v5712_v3 }
0x131c   :  { %5373 = vmatpush3.msra.mxu0 %v6680_v29 }
0x131d   :  { %5374 = vmatprep.subr.mxu0 %v5712_v3 }
0x131e   :  { %5375 = vmatpush3.msra.mxu0 %v6687_v51 }
0x131f   :  { %5377 = vmatmul.mubr.msk.f32.vlgmr.msra.gmra.mxu0 %vm635_vm5, %v2804_v56  ;;  %5390 = vmatprep.subr.mxu0 %v5712_v3 }
0x1320   :  { %5391 = vmatpush3.msra.mxu0 %v6295_v55  ;;  %5394 = vmatprep.mubr.msk.f32.mxu0 %vm5713_vm3, %v5712_v3 }
0x1321   :  { %5392 = vmatprep.subr.mxu0 %v5712_v3 }
0x1322   :  { %5393 = vmatpush3.msra.mxu0 %v6302_v30  ;;  %v2493_v30 = vrot.slane %v6598_v8, 6 }
0x1323   :  { %5397 = vmatprep.subr.mxu0 %v5712_v3 }
0x1324   :  { %v2495_v37 = vadd.f32 %v2493_v30, %v6427_v28 }
0x1326   :  { %v2499_v10 = vadd.f32 %v2497_v11, %v2495_v37 }
0x1328   :  { %v4766_v58 = vmul.f32 -1.442695, %v2499_v10 }
0x132a   :  { %5605 = vpow2.f32 %v4766_v58 }
0x1337   :  { %v5606_v4 = vpop.eup %5605 }
0x1338   :  { %v2503_v45 = vadd.f32 1.0, %v5606_v4 }
0x13d7   :  { %v3040_v5 = vpop.f32.mrf.mxu0 }
0x13d8   :  { %v3044_v61 = vmul.f32 1.25, %v3040_v5  ;;  %v6746_v5 = vld [vmem:[%s7117_s6 + $0x60] sm:$0xff] }
0x13d9   :  { %v5349_v35 = vpop.f32.mrf.mxu0 }
0x13da   :  { %v3045_v63 = vsel %vm6163_vm12, %v3044_v61, -1e+30  ;;  %v2522_v61 = vrot.slane %v6461_v54, 6 }
0x13db   :  { %v3046_v1 = vsel %vm1154_vm13, %v3045_v63, -inf }
0x13dc   :  { %3047 = vmax.xlane.f32.xlu0 %v3046_v1 }
0x13df   :  { %v6701_v47 = vpop.f32.mrf.mxu0 }
0x13e1   :  { %v5378_v55 = vpop.f32.mrf.mxu0 }
0x13f2   :  { %2506 = vrot.lane.b32.xlu0 %v2497_v11, %s5714_s25 }
0x1465   :  { %v3048_v43 = vpop.xlane.xlu0 %3047 }
0x1466   :  { %v3049_v36 = vsub.f32 %v3045_v63, %v3048_v43 }
0x1468   :  { %v3050_v17 = vmul.f32 1.442695, %v3049_v36 }
0x1469   :  { %v2507_v8 = vpop.permute.xlu0 %2506 }
0x146a   :  { %5607 = vpow2.f32 %v3050_v17 }
0x146b   :  { %5609 = vrcp.f32 %v2503_v45 }
0x1477   :  { %v5608_v9 = vpop.eup %5607 }
0x1478   :  { %v3052_v13 = vsel %vm6163_vm12, %v5608_v9, 0.0  ;;  %v5610_v24 = vpop.eup %5609 }
0x1479   :  { %v3053_v33 = vsel %vm1154_vm13, %v3052_v13, 0.0  ;;  %v2509_v49 = vmul.f32 %v5610_v24, %v2507_v8  ;;  %v2516_v35 = vsub.f32 1.0, %v5610_v24  ;;  %v2524_v1 = vmul.f32 %v5610_v24, %v2522_v61  ;;  %v6790_v24 = vld [vmem:[%s7116_s5 + $0x98] sm:$0xff]  ;;  %v6844_v61 = vld [vmem:[%s7117_s6 + $0xa0] ss:$0 sm:$0xff] }
0x147a   :  { %3054 = vadd.xlane.f32.xlu1 %v3053_v33 }
0x148b   :  { %2511 = vrot.lane.b32.xlu1 %v2509_v49, %s5714_s25  ;;  %v6799_v49 = vld [vmem:[%s7116_s5 + $0x90] sm:$0xff] }
0x148f   :  { %3468 = vperm.xlu1 %5536, %v4788_v48   ;;  %v6806_v48 = vld [vmem:[%s7116_s5 + $0x88] sm:$0xff] }
0x1503   :  { %v3055_v46 = vpop.xlane.xlu1 %3054 }
0x1504   :  { %5611 = vrcp.f32 %v3055_v46  ;;  %v6813_v46 = vld [vmem:[%s7116_s5 + $0x80] sm:$0xff] }
0x1507   :  { %v2512_v57 = vpop.permute.xlu1 %2511 }
0x1508   :  { %v2514_v56 = vadd.f32 %v2512_v57, %v2495_v37 }
0x150a   :  { %5613 = vtanh.f32 %v2514_v56  ;;  %v5677_v56 = vld [vmem:[%s7117_s6 + $0x38] sm:$0xff] }
0x150b   :  { %v6759_v37 = vpop.permute.xlu1 %3468 }
0x150c   :  { %v3583_v10 = vrot.slane %v6759_v37, 6  ;;  %v3470_v36 = vrot.slane %v6759_v37, 4 }
0x150e   :  { %v6764_v43 = vmul.f32 %v3583_v10, %v6618_v40 }
0x1510   :  { %v3731_v4 = vrot.slane %v6764_v43, 6 }
0x1511   :  { %v5612_v0 = vpop.eup %5611 }
0x1512   :  { %v3057_v31 = vmul.f32 %v5612_v0, %v3052_v13  ;;  %v6774_v13 = vmul.f32 %v3470_v36, %v6629_v23 }
0x1514   :  { %5355 = vmatmul.mubr.msk.f32.vlgmr.msra.gmra.mxu1 %vm1168_vm14, %v3057_v31 }
0x1515   :  { %5358 = vmatpush3.msra.mxu1 %v6719_v6  ;;  %5365 = vmatprep.mubr.msk.f32.mxu1 %vm5713_vm3, %v5712_v3 }
0x1516   :  { %5359 = vmatprep.subr.mxu1 %v5712_v3 }
0x1517   :  { %v5614_v19 = vpop.eup %5613  ;;  %5360 = vmatpush3.msra.mxu1 %v6728_v60 }
0x1518   :  { %2518 = vrot.lane.b32.xlu0 %v5614_v19, %s5716_s0  ;;  %5361 = vmatprep.subr.mxu1 %v5712_v3 }
0x1519   :  { %5362 = vmatpush3.msra.mxu1 %v6739_v44 }
0x151a   :  { %5363 = vmatprep.subr.mxu1 %v5712_v3 }
0x151b   :  { %5364 = vmatpush3.msra.mxu1 %v6746_v5 }
0x151c   :  { %3581 = vperm.xlu0 %5535, %v4789_v25   ;;  %5379 = vmatprep.subr.mxu1 %v5712_v3 }
0x158a   :  { %v2519_v63 = vpop.permute.xlu0 %2518 }
0x158b   :  { %v2521_v55 = vmul.f32 %v2519_v63, %v2516_v35 }
0x158d   :  { %v6751_v21 = vadd.f32 %v2524_v1, %v2521_v55 }
0x158f   :  { %v6756_v11 = vmul.f32 %v2533_v12, %v6751_v21  ;;  %v3592_v12 = vrot.slane %v6764_v43, 4 }
0x1591   :  { %v3281_v30 = vrot.slane %v6756_v11, 2 }
0x1593   :  { %3282 = vrot.lane.b32.xlu1 %v3281_v30, %s5716_s0 }
0x1597   :  { %v3582_v54 = vpop.permute.xlu0 %3581 }
0x1598   :  { %v3584_v58 = vrot.slane %v3582_v54, 6 }
0x159a   :  { %v3585_v17 = vsel %vm44_vm0, %v3583_v10, %v3584_v58 }
0x159b   :  { %v3589_v15 = vmul.f32 %v3585_v17, %v6621_v2  ;;  %v3474_v2 = vrot.slane %v6774_v13, 4 }
0x159d   :  { %v3593_v9 = vrot.slane %v3589_v15, 4  ;;  %v3732_v45 = vrot.slane %v3589_v15, 6 }
0x159f   :  { %3597 = vrot.lane.b32.xlu1 %v3593_v9, %s5716_s0  ;;  %v3594_v40 = vsel %vm2740_vm15, %v3592_v12, %v3593_v9  ;;  %v6781_v33 = vsel %vm44_vm0, %v3731_v4, %v3732_v45 }
0x15a0   :  { %3595 = vrot.lane.b32.xlu0 %v3594_v40, %s5716_s0 }
0x15a4   :  { %3475 = vrot.lane.b32.xlu0 %v3474_v2, %s5716_s0 }
0x15d4   :  { %v3130_v8 = vpop.f32.mrf.mxu1 }
0x15d5   :  { %5366 = vmatmul.mubr.msk.f32.vlgmr.msra.gmra.mxu1 %vm635_vm5, %v3130_v8 }
0x15d6   :  { %v5356_v23 = vpop.f32.mrf.mxu1  ;;  %5380 = vmatpush3.msra.mxu1 %v6790_v24  ;;  %5387 = vmatprep.mubr.msk.f32.mxu1 %vm5713_vm3, %v5712_v3 }
0x15d7   :  { %5381 = vmatprep.subr.mxu1 %v5712_v3 }
0x15d8   :  { %5382 = vmatpush3.msra.mxu1 %v6799_v49 }
0x15d9   :  { %5383 = vmatprep.subr.mxu1 %v5712_v3 }
0x15da   :  { %5384 = vmatpush3.msra.mxu1 %v6806_v48 }
0x15db   :  { %5385 = vmatprep.subr.mxu1 %v5712_v3 }
0x15dc   :  { %5386 = vmatpush3.msra.mxu1 %v6813_v46 }
0x15dd   :  { %5408 = vmatprep.subr.mxu1 %v6502_v41 }
0x1605   :  { %v3283_v57 = vpop.permute.xlu1 %3282 }
0x1606   :  { %5388 = vmatmul.mubr.msk.f32.vlgmr.msra.gmra.mxu1 %vm635_vm5, %v3283_v57 }
0x1607   :  { %5409 = vmatpush3.msra.mxu1 %v6502_v41  ;;  %v5678_v41 = vld [vmem:[%s7117_s6 + $0x30] sm:$0xff] }
0x1608   :  { %5410 = vmatprep.subr.mxu1 %v6510_v50 }
0x1609   :  { %5411 = vmatpush3.msra.mxu1 %v6510_v50  ;;  %v5679_v50 = vld [vmem:[%s7117_s6 + $0x28] sm:$0xff] }
0x160a   :  { %5412 = vmatprep.subr.mxu1 %v6517_v52 }
0x160b   :  { %5413 = vmatpush3.msra.mxu1 %v6517_v52  ;;  %v5680_v52 = vld [vmem:[%s7117_s6 + $0x20] sm:$0xff] }
0x160c   :  { %5414 = vmatprep.subr.mxu1 %v6524_v53 }
0x160d   :  { %5415 = vmatpush3.msra.mxu1 %v6524_v53 }
0x160e   :  { %5430 = vmatprep.subr.mxu1 %v5677_v56 }
0x1611   :  { %v3598_v31 = vpop.permute.xlu1 %3597 }
0x1612   :  { %v3596_v0 = vpop.permute.xlu0 %3595 }
0x1613   :  { %5416 = vmatprep.mubr.msk.f32.mxu1 %vm635_vm5, %v3596_v0 }
0x1614   :  { %5417 = vmatmul.mubr.msk.f32.vlgmr.msra.gmra.mxu1 %vm635_vm5, %v3598_v31 }
0x1615   :  { %5431 = vmatpush3.msra.mxu1 %v5677_v56 }
0x1616   :  { %5432 = vmatprep.subr.mxu1 %v5678_v41 }
0x1617   :  { %5433 = vmatpush3.msra.mxu1 %v5678_v41 }
0x1618   :  { %5434 = vmatprep.subr.mxu1 %v5679_v50 }
0x1619   :  { %5435 = vmatpush3.msra.mxu1 %v5679_v50 }
0x161a   :  { %5436 = vmatprep.subr.mxu1 %v5680_v52 }
0x161b   :  { %5437 = vmatpush3.msra.mxu1 %v5680_v52 }
0x161c   :  { %5448 = vmatprep.subr.mxu1 %v5712_v3 }
0x1695   :  { %v3203_v53 = vpop.f32.mrf.mxu1 }
0x1696   :  { %v3274_v19 = vadd.f32 %v6701_v47, %v3203_v53  ;;  %v3476_v47 = vpop.permute.xlu0 %3475 }
0x1697   :  { %v5367_v25 = vpop.f32.mrf.mxu1 }
0x1698   :  { %v3277_v35 = vadd.f32 %v6844_v61, %v3274_v19 }
0x169a   :  { %v3278_v63 = vmax.f32 %v3277_v35, 0.0 }
0x169c   :  { %5395 = vmatmul.mubr.msk.f32.vlgmr.msra.gmra.mxu0 %vm126_vm6, %v3278_v63 }
0x169d   :  { %5398 = vmatpush3.msra.mxu0 %v6545_v22  ;;  %5405 = vmatprep.mubr.msk.f32.mxu0 %vm5713_vm3, %v5712_v3  ;;  %v5682_v22 = vld [vmem:[%s7117_s6 + $0x18] sm:$0xff] }
0x169e   :  { %5399 = vmatprep.subr.mxu0 %v5712_v3 }
0x169f   :  { %5400 = vmatpush3.msra.mxu0 %v6554_v20  ;;  %v5683_v20 = vld [vmem:[%s7117_s6 + $0x10] sm:$0xff] }
0x16a0   :  { %5401 = vmatprep.subr.mxu0 %v5712_v3 }
0x16a1   :  { %5402 = vmatpush3.msra.mxu0 %v6561_v26  ;;  %v5684_v26 = vld [vmem:[%s7117_s6 + $0x8] sm:$0xff] }
0x16a2   :  { %5403 = vmatprep.subr.mxu0 %v5712_v3 }
0x16a3   :  { %5404 = vmatpush3.msra.mxu0 %v6568_v16  ;;  %v5685_v16 = vld [vmem:[%s7117_s6] sm:$0xff] }
0x16a4   :  { %5406 = vmatmul.mubr.msk.f32.vlgmr.msra.gmra.mxu0 %vm635_vm5, %v3476_v47  ;;  %5419 = vmatprep.subr.mxu0 %v5712_v3 }
0x16a5   :  { %5420 = vmatpush3.msra.mxu0 %v5682_v22  ;;  %5427 = vmatprep.mubr.msk.f32.mxu0 %vm5713_vm3, %v5712_v3 }
0x16a6   :  { %5421 = vmatprep.subr.mxu0 %v5712_v3 }
0x16a7   :  { %5422 = vmatpush3.msra.mxu0 %v5683_v20 }
0x16a8   :  { %5423 = vmatprep.subr.mxu0 %v5712_v3 }
0x16a9   :  { %5424 = vmatpush3.msra.mxu0 %v5684_v26 }
0x16aa   :  { %5425 = vmatprep.subr.mxu0 %v5712_v3 }
0x16ab   :  { %5426 = vmatpush3.msra.mxu0 %v5685_v16 }
0x16ac   :  { %5441 = vmatprep.subr.mxu0 %v5712_v3 }
0x16c6   :  { %v6877_v1 = vpop.f32.mrf.mxu1 }
0x16c8   :  { %v5389_v55 = vpop.f32.mrf.mxu1 }
0x16d4   :  { %v5418_v30 = vpop.f32.mrf.mxu1 }
0x16d5   :  { %v3675_v10 = vadd.f32 %v6588_v62, %v5418_v30 }
0x16d6   :  { %v3669_v54 = vpop.f32.mrf.mxu1 }
0x16d7   :  { %v3670_v58 = vadd.f32 %v6588_v62, %v3669_v54  ;;  %v3681_v17 = vrot.slane %v3675_v10, 2 }
0x16d9   :  { %v3680_v15 = vrot.slane %v3670_v58, 2 }
0x16db   :  { %3699 = vrot.lane.b32.xlu1 %v3680_v15, %s5714_s25  ;;  %v3682_v12 = vsel %vm754_vm9, %v3680_v15, %v3681_v17  ;;  %v3685_v9 = vadd.f32 %v3680_v15, %v5956_v14 }
0x16dc   :  { %3701 = vrot.lane.b32.xlu0 %v3682_v12, %s5714_s25  ;;  %v3686_v8 = vadd.f32 %v3682_v12, %v5959_v18 }
0x16dd   :  { %v4794_v45 = vmul.f32 -1.442695, %v3685_v9 }
0x16de   :  { %v4795_v23 = vmul.f32 -1.442695, %v3686_v8 }
0x16df   :  { %5615 = vpow2.f32 %v4794_v45 }
0x16ec   :  { %v5616_v40 = vpop.eup %5615 }
0x16ed   :  { %v3693_v2 = vadd.f32 1.0, %v5616_v40 }
0x16ef   :  { %5617 = vrcp.f32 %v3693_v2 }
0x16f0   :  { %5619 = vpow2.f32 %v4795_v23 }
0x16fc   :  { %v5618_v62 = vpop.eup %5617 }
0x16fd   :  { %v5620_v0 = vpop.eup %5619  ;;  %v3719_v40 = vsub.f32 1.0, %v5618_v62  ;;  %v3736_v23 = vmul.f32 %v5618_v62, %v3731_v4  ;;  %v3575_v4 = vrot.slane %v6774_v13, 6 }
0x16fe   :  { %v3694_v31 = vadd.f32 1.0, %v5620_v0 }
0x1700   :  { %5621 = vrcp.f32 %v3694_v31 }
0x170d   :  { %v5622_v63 = vpop.eup %5621 }
0x170e   :  { %v3737_v0 = vmul.f32 %v5622_v63, %v6781_v33 }
0x174d   :  { %v3700_v57 = vpop.permute.xlu1 %3699 }
0x174e   :  { %v3705_v56 = vmul.f32 %v5618_v62, %v3700_v57  ;;  %v3702_v35 = vpop.permute.xlu0 %3701  ;;  %v3720_v57 = vsub.f32 1.0, %v5622_v63 }
0x174f   :  { %v3706_v47 = vmul.f32 %v5622_v63, %v3702_v35 }
0x1750   :  { %3709 = vrot.lane.b32.xlu0 %v3705_v56, %s5714_s25 }
0x175c   :  { %v6887_v41 = vpop.f32.mrf.mxu0 }
0x175e   :  { %v5396_v50 = vpop.f32.mrf.mxu0 }
0x1764   :  { %v3545_v52 = vpop.f32.mrf.mxu0 }
0x1765   :  { %v3546_v53 = vadd.f32 %v6603_v34, %v3545_v52 }
0x1766   :  { %v5407_v19 = vpop.f32.mrf.mxu0 }
0x1767   :  { %v3550_v25 = vrot.slane %v3546_v53, 2 }
0x1769   :  { %3559 = vrot.lane.b32.xlu1 %v3550_v25, %s5714_s25  ;;  %v3552_v22 = vadd.f32 %v3550_v25, %v6009_v42 }
0x176b   :  { %v4791_v20 = vmul.f32 -1.442695, %v3552_v22 }
0x176d   :  { %3711 = vrot.lane.b32.xlu1 %v3706_v47, %s5714_s25  ;;  %5623 = vpow2.f32 %v4791_v20 }
0x177a   :  { %v5624_v55 = vpop.eup %5623 }
0x177b   :  { %v3556_v30 = vadd.f32 1.0, %v5624_v55 }
0x17c2   :  { %v3710_v26 = vpop.permute.xlu0 %3709 }
0x17c3   :  { %v3715_v16 = vadd.f32 %v3710_v26, %v5956_v14 }
0x17c5   :  { %5625 = vtanh.f32 %v3715_v16 }
0x17c6   :  { %5627 = vrcp.f32 %v3556_v30 }
0x17d2   :  { %v5626_v34 = vpop.eup %5625 }
0x17d3   :  { %3723 = vrot.lane.b32.xlu1 %v5626_v34, %s5716_s0  ;;  %v5628_v10 = vpop.eup %5627 }
0x17d4   :  { %v3569_v62 = vsub.f32 1.0, %v5628_v10  ;;  %v3577_v19 = vmul.f32 %v5628_v10, %v3575_v4 }
0x17db   :  { %v3560_v54 = vpop.permute.xlu1 %3559 }
0x17dc   :  { %v3562_v58 = vmul.f32 %v5628_v10, %v3560_v54 }
0x17de   :  { %3564 = vrot.lane.b32.xlu0 %v3562_v58, %s5714_s25 }
0x17df   :  { %v3712_v17 = vpop.permute.xlu1 %3711 }
0x17e0   :  { %v3716_v15 = vadd.f32 %v3712_v17, %v5959_v18 }
0x17e2   :  { %5629 = vtanh.f32 %v3716_v15 }
0x17ef   :  { %v5630_v12 = vpop.eup %5629 }
0x17f0   :  { %3725 = vrot.lane.b32.xlu0 %v5630_v12, %s5716_s0 }
0x1845   :  { %v3724_v45 = vpop.permute.xlu1 %3723 }
0x1846   :  { %v3729_v2 = vmul.f32 %v3724_v45, %v3719_v40  ;;  %v6967_v40 = vld [vmem:[%s7116_s5 + $0xa5] ss:$0 sm:$0xff] }
0x1848   :  { %v6902_v18 = vadd.f32 %v3736_v23, %v3729_v2  ;;  %v3353_v2 = vadd.f32 %v6967_v40, %v6877_v1  ;;  %v3430_v23 = vrot.slane %v6887_v41, 4 }
0x1850   :  { %v3565_v14 = vpop.permute.xlu0 %3564 }
0x1851   :  { %v3567_v9 = vadd.f32 %v3565_v14, %v6009_v42  ;;  %v3818_v42 = vrot.slane %v6902_v18, 6 }
0x1853   :  { %5631 = vtanh.f32 %v3567_v9 }
0x1860   :  { %v5632_v8 = vpop.eup %5631 }
0x1861   :  { %3571 = vrot.lane.b32.xlu1 %v5632_v8, %s5716_s0  ;;  %v3434_v8 = vrot.slane %v3353_v2, 4 }
0x1862   :  { %v3726_v56 = vpop.permute.xlu0 %3725 }
0x1863   :  { %v3730_v31 = vmul.f32 %v3726_v56, %v3720_v57  ;;  %v3432_v57 = vadd.f32 %v3430_v23, %v6427_v28 }
0x1865   :  { %v6905_v50 = vadd.f32 %v3737_v0, %v3730_v31  ;;  %v3436_v39 = vadd.f32 %v3434_v8, %v3432_v57 }
0x1867   :  { %v3819_v52 = vrot.slane %v6905_v50, 6  ;;  %v4787_v56 = vmul.f32 -1.442695, %v3436_v39 }
0x1869   :  { %3823 = vrot.lane.b32.xlu1 %v3819_v52, %s5716_s0  ;;  %v3820_v43 = vsel %vm44_vm0, %v3818_v42, %v3819_v52 }
0x186a   :  { %3821 = vrot.lane.b32.xlu0 %v3820_v43, %s5716_s0 }
0x18d3   :  { %v3572_v53 = vpop.permute.xlu1 %3571 }
0x18d4   :  { %v3574_v25 = vmul.f32 %v3572_v53, %v3569_v62 }
0x18d6   :  { %v6913_v33 = vadd.f32 %v3577_v19, %v3574_v25 }
0x18d8   :  { %v3741_v35 = vrot.slane %v6913_v33, 6 }
0x18da   :  { %3742 = vrot.lane.b32.xlu0 %v3741_v35, %s5716_s0 }
0x18db   :  { %v3824_v47 = vpop.permute.xlu1 %3823 }
0x18dc   :  { %v3822_v63 = vpop.permute.xlu0 %3821 }
0x18dd   :  { %5438 = vmatprep.mubr.msk.f32.mxu1 %vm635_vm5, %v3822_v63 }
0x18de   :  { %5439 = vmatmul.mubr.msk.f32.vlgmr.msra.gmra.mxu1 %vm635_vm5, %v3824_v47 }
0x18df   :  { %5449 = vmatpush3.msk.msra.mxu1 %vm44_vm0, %v3824_v47  ;;  %5452 = vmatprep.mubr.msk.f32.mxu1 %vm5713_vm3, %v5712_v3 }
0x18e0   :  { %5450 = vmatprep.subr.mxu1 %v5712_v3 }
0x18e1   :  { %5451 = vmatpush3.msra.mxu1 %v3822_v63 }
0x18e2   :  { %5455 = vmatprep.subr.mxu1 %v5712_v3 }
0x194c   :  { %v3743_v13 = vpop.permute.xlu0 %3742 }
0x194d   :  { %5428 = vmatmul.mubr.msk.f32.vlgmr.msra.gmra.mxu0 %vm635_vm5, %v3743_v13 }
0x194e   :  { %5445 = vmatprep.mubr.msk.f32.mxu0 %vm5713_vm3, %v5712_v3 }
0x199e   :  { %v5440_v22 = vpop.f32.mrf.mxu1 }
0x199f   :  { %v3901_v20 = vadd.f32 %v6646_v59, %v5440_v22 }
0x19a0   :  { %v3895_v26 = vpop.f32.mrf.mxu1 }
0x19a1   :  { %5442 = vmatpush3.xpose.msk.msra.mxu0 %vm126_vm6, %v3901_v20  ;;  %v3896_v16 = vadd.f32 %v6646_v59, %v3895_v26  ;;  %v5686_v59 = vld [vmem:[%s7116_s5 + $0x78] sm:$0xff] }
0x19a2   :  { %5443 = vmatprep.subr.mxu0 %v5712_v3 }
0x19a5   :  { %5444 = vmatpush3.xpose.msk.msra.mxu0 %vm126_vm6, %v3896_v16 }
0x19a6   :  { %5466 = vmatprep.subr.mxu0 %v5712_v3 }
0x1a0d   :  { %v3812_v55 = vpop.f32.mrf.mxu0 }
0x1a0e   :  { %v3813_v30 = vadd.f32 %v6657_v32, %v3812_v55  ;;  %v5687_v32 = vld [vmem:[%s7116_s5 + $0x70] sm:$0xff] }
0x1a0f   :  { %v5429_v34 = vpop.f32.mrf.mxu0 }
0x1a10   :  { %5446 = vmatmul.mubr.msk.f32.vlgmr.msra.gmra.mxu0 %vm126_vm6, %v3813_v30 }
0x1a11   :  { %5467 = vmatpush3.msra.mxu0 %v6664_v27  ;;  %5474 = vmatprep.mubr.msk.f32.mxu0 %vm5713_vm3, %v5712_v3 }
0x1a12   :  { %5468 = vmatprep.subr.mxu0 %v5712_v3 }
0x1a13   :  { %5469 = vmatpush3.msra.mxu0 %v6673_v38 }
0x1a14   :  { %5470 = vmatprep.subr.mxu0 %v5712_v3 }
0x1a15   :  { %5471 = vmatpush3.msra.mxu0 %v6680_v29 }
0x1a16   :  { %5472 = vmatprep.subr.mxu0 %v5712_v3 }
0x1a17   :  { %5473 = vmatpush3.msra.mxu0 %v6687_v51 }
0x1a18   :  { %5475 = vmatmul.mubr.msk.f32.vlgmr.msra.gmra.mxu0 %vm635_vm5, %v3743_v13  ;;  %5488 = vmatprep.subr.mxu0 %v5712_v3 }
0x1a19   :  { %5489 = vmatpush3.msra.mxu0 %v5686_v59  ;;  %5492 = vmatprep.mubr.msk.f32.mxu0 %vm5713_vm3, %v5712_v3 }
0x1a1a   :  { %5490 = vmatprep.subr.mxu0 %v5712_v3 }
0x1a1b   :  { %5491 = vmatpush3.msra.mxu0 %v5687_v32 }
0x1a1c   :  { %5495 = vmatprep.subr.mxu0 %v5712_v3 }
0x1ad0   :  { %v3979_v27 = vpop.f32.mrf.mxu0 }
0x1ad1   :  { %v3983_v38 = vmul.f32 1.25, %v3979_v27 }
0x1ad2   :  { %v5447_v29 = vpop.f32.mrf.mxu0 }
0x1ad3   :  { %v3984_v51 = vsel %vm6163_vm12, %v3983_v38, -1e+30 }
0x1ad4   :  { %v3985_v10 = vsel %vm1154_vm13, %v3984_v51, -inf }
0x1ad5   :  { %3986 = vmax.xlane.f32.xlu1 %v3985_v10 }
0x1ad8   :  { %v6959_v54 = vpop.f32.mrf.mxu0 }
0x1ada   :  { %v5476_v58 = vpop.f32.mrf.mxu0 }
0x1b5e   :  { %v3987_v17 = vpop.xlane.xlu1 %3986 }
0x1b5f   :  { %v3988_v15 = vsub.f32 %v3984_v51, %v3987_v17 }
0x1b61   :  { %v3989_v12 = vmul.f32 1.442695, %v3988_v15 }
0x1b63   :  { %5633 = vpow2.f32 %v3989_v12 }
0x1b64   :  { %5635 = vpow2.f32 %v4787_v56 }
0x1b70   :  { %v5634_v14 = vpop.eup %5633 }
0x1b71   :  { %v3991_v9 = vsel %vm6163_vm12, %v5634_v14, 0.0  ;;  %v5636_v0 = vpop.eup %5635  ;;  %v4407_v14 = vld [vmem:[%s7118_s7 + $0x10] sm:$0xff] }
0x1b72   :  { %v3992_v45 = vsel %vm1154_vm13, %v3991_v9, 0.0  ;;  %v3440_v31 = vadd.f32 1.0, %v5636_v0 }
0x1b73   :  { %3993 = vadd.xlane.f32.xlu0 %v3992_v45  ;;  %v4405_v45 = vld [vmem:[%s7118_s7] sm:$0xff] }
0x1b74   :  { %5637 = vrcp.f32 %v3440_v31  ;;  %v4492_v31 = vld [vmem:[%s7118_s7 + $0x30] sm:$0xff] }
0x1b81   :  { %v5638_v52 = vpop.eup %5637 }
0x1b89   :  { %3443 = vrot.lane.b32.xlu0 %v3434_v8, %s5714_s25 }
0x1bfc   :  { %v3994_v42 = vpop.xlane.xlu0 %3993 }
0x1bfd   :  { %5639 = vrcp.f32 %v3994_v42  ;;  %v4491_v42 = vld [vmem:[%s7118_s7 + $0x28] sm:$0xff] }
0x1c00   :  { %v3444_v43 = vpop.permute.xlu0 %3443 }
0x1c01   :  { %v3446_v4 = vmul.f32 %v5638_v52, %v3444_v43  ;;  %v4809_v43 = vld [vmem:[%s7118_s7 + $0x60] ss:$0 sm:$0xff] }
0x1c03   :  { %3448 = vrot.lane.b32.xlu1 %v3446_v4, %s5714_s25 }
0x1c0a   :  { %v5640_v1 = vpop.eup %5639 }
0x1c0b   :  { %v3996_v62 = vmul.f32 %v5640_v1, %v3991_v9  ;;  %v4406_v9 = vld [vmem:[%s7118_s7 + $0x8] sm:$0xff] }
0x1c0d   :  { %5453 = vmatmul.mubr.msk.f32.vlgmr.msra.gmra.mxu1 %vm1168_vm14, %v3996_v62 }
0x1c0e   :  { %5456 = vmatpush3.msra.mxu1 %v6719_v6  ;;  %5463 = vmatprep.mubr.msk.f32.mxu1 %vm5713_vm3, %v5712_v3 }
0x1c0f   :  { %5457 = vmatprep.subr.mxu1 %v5712_v3 }
0x1c10   :  { %5458 = vmatpush3.msra.mxu1 %v6728_v60 }
0x1c11   :  { %5459 = vmatprep.subr.mxu1 %v5712_v3 }
0x1c12   :  { %5460 = vmatpush3.msra.mxu1 %v6739_v44  ;;  %v3453_v44 = vsub.f32 1.0, %v5638_v52 }
0x1c13   :  { %5461 = vmatprep.subr.mxu1 %v5712_v3 }
0x1c14   :  { %5462 = vmatpush3.msra.mxu1 %v6746_v5  ;;  %v3459_v5 = vrot.slane %v6756_v11, 6 }
0x1c15   :  { %5477 = vmatprep.subr.mxu1 %v5712_v3 }
0x1c16   :  { %v3461_v25 = vmul.f32 %v5638_v52, %v3459_v5  ;;  %v4490_v52 = vld [vmem:[%s7118_s7 + $0x20] sm:$0xff] }
0x1c75   :  { %v3449_v41 = vpop.permute.xlu1 %3448 }
0x1c76   :  { %v3451_v53 = vadd.f32 %v3449_v41, %v3432_v57 }
0x1c78   :  { %5641 = vtanh.f32 %v3451_v53  ;;  %v4576_v53 = vld [vmem:[%s7118_s7 + $0x58] sm:$0xff] }
0x1c85   :  { %v5642_v6 = vpop.eup %5641 }
0x1c86   :  { %3455 = vrot.lane.b32.xlu1 %v5642_v6, %s5716_s0  ;;  %v4575_v6 = vld [vmem:[%s7118_s7 + $0x50] sm:$0xff] }
0x1ccd   :  { %v4069_v19 = vpop.f32.mrf.mxu1 }
0x1cce   :  { %5464 = vmatmul.mubr.msk.f32.vlgmr.msra.gmra.mxu1 %vm635_vm5, %v4069_v19  ;;  %v4574_v19 = vld [vmem:[%s7118_s7 + $0x48] sm:$0xff] }
0x1ccf   :  { %v5454_v60 = vpop.f32.mrf.mxu1  ;;  %5478 = vmatpush3.msra.mxu1 %v6790_v24  ;;  %5485 = vmatprep.mubr.msk.f32.mxu1 %vm5713_vm3, %v5712_v3 }
0x1cd0   :  { %5479 = vmatprep.subr.mxu1 %v5712_v3  ;;  %v4573_v60 = vld [vmem:[%s7118_s7 + $0x40] sm:$0xff] }
0x1cd1   :  { %5480 = vmatpush3.msra.mxu1 %v6799_v49  ;;  %v4402_v49 = vsel %vm44_vm0, %v6456_v7, %v6751_v21  ;;  %vm4661_vm0 = vcmask 261126  }
0x1cd2   :  { %5481 = vmatprep.subr.mxu1 %v5712_v3 }
0x1cd3   :  { %5482 = vmatpush3.msra.mxu1 %v6806_v48 }
0x1cd4   :  { %5483 = vmatprep.subr.mxu1 %v5712_v3 }
0x1cd5   :  { %5484 = vmatpush3.msra.mxu1 %v6813_v46 }
0x1cd6   :  { %5506 = vmatprep.subr.mxu1 %v5712_v3 }
0x1cf8   :  { %v3456_v24 = vpop.permute.xlu1 %3455 }
0x1cf9   :  { %v3458_v35 = vmul.f32 %v3456_v24, %v3453_v44  ;;  %v4811_v44 = vld [vmem:[%s7118_s7 + $0x61] ss:$0 sm:$0xff] }
0x1cfb   :  { %v3462_v63 = vadd.f32 %v3461_v25, %v3458_v35 }
0x1cfd   :  { %v4218_v48 = vmul.f32 %v3470_v36, %v3462_v63  ;;  %v4403_v47 = vsel %vm2740_vm15, %v4402_v49, %v3462_v63 }
0x1cff   :  { %v4220_v13 = vrot.slane %v4218_v48, 4  ;;  %v4398_v29 = vrot.slane %v4218_v48, 6 }
0x1d01   :  { %4221 = vrot.lane.b32.xlu0 %v4220_v13, %s5716_s0 }
0x1d73   :  { %v4222_v46 = vpop.permute.xlu0 %4221 }
0x1d74   :  { %5486 = vmatmul.mubr.msk.f32.vlgmr.msra.gmra.mxu1 %vm635_vm5, %v4222_v46 }
0x1d75   :  { %5514 = vmatprep.mubr.msk.f32.mxu1 %vm5713_vm3, %v5712_v3 }
0x1d8e   :  { %v4142_v11 = vpop.f32.mrf.mxu1 }
0x1d8f   :  { %v4213_v22 = vadd.f32 %v6959_v54, %v4142_v11 }
0x1d90   :  { %v5465_v20 = vpop.f32.mrf.mxu1 }
0x1d91   :  { %v4216_v7 = vadd.f32 %v6844_v61, %v4213_v22 }
0x1d93   :  { %v4217_v21 = vmax.f32 %v4216_v7, 0.0 }
0x1d95   :  { %5493 = vmatmul.mubr.msk.f32.vlgmr.msra.gmra.mxu0 %vm126_vm6, %v4217_v21 }
0x1d96   :  { %5503 = vmatprep.mubr.msk.f32.mxu0 %vm5713_vm3, %v5712_v3 }
0x1e34   :  { %v4291_v37 = vpop.f32.mrf.mxu1 }
0x1e35   :  { %v4292_v36 = vadd.f32 %v6967_v40, %v4291_v37 }
0x1e36   :  { %v5487_v26 = vpop.f32.mrf.mxu1 }
0x1e37   :  { %v4373_v16 = vrot.slane %v4292_v36, 2 }
0x1e39   :  { %4382 = vrot.lane.b32.xlu1 %v4373_v16, %s5714_s25 }
0x1e55   :  { %v4364_v55 = vpop.f32.mrf.mxu0 }
0x1e56   :  { %v4369_v30 = vrot.slane %v4364_v55, 2 }
0x1e57   :  { %v5494_v34 = vpop.f32.mrf.mxu0 }
0x1e58   :  { %v4371_v59 = vadd.f32 %v4369_v30, %v6427_v28  ;;  %v4408_v28 = vld [vmem:[%s7118_s7 + $0x18] sm:$0xff] }
0x1e59   :  { %5496 = vmatpush3.msra.mxu0 %v4408_v28 }
0x1e5a   :  { %v4375_v32 = vadd.f32 %v4373_v16, %v4371_v59  ;;  %5497 = vmatprep.subr.mxu0 %v5712_v3 }
0x1e5b   :  { %5498 = vmatpush3.msra.mxu0 %v4407_v14 }
0x1e5c   :  { %v4808_v61 = vmul.f32 -1.442695, %v4375_v32  ;;  %5499 = vmatprep.subr.mxu0 %v5712_v3 }
0x1e5d   :  { %5500 = vmatpush3.msra.mxu0 %v4406_v9 }
0x1e5e   :  { %5643 = vpow2.f32 %v4808_v61  ;;  %5501 = vmatprep.subr.mxu0 %v5712_v3 }
0x1e5f   :  { %5502 = vmatpush3.msra.mxu0 %v4405_v45 }
0x1e60   :  { %5517 = vmatprep.subr.mxu0 %v5712_v3 }
0x1e6b   :  { %v5644_v27 = vpop.eup %5643 }
0x1e6c   :  { %v4379_v38 = vadd.f32 1.0, %v5644_v27 }
0x1e6e   :  { %5645 = vrcp.f32 %v4379_v38 }
0x1e7b   :  { %v5646_v51 = vpop.eup %5645 }
0x1e7c   :  { %v4400_v10 = vmul.f32 %v5646_v51, %v4398_v29  ;;  %v4392_v40 = vsub.f32 1.0, %v5646_v51 }
0x1eab   :  { %v4383_v54 = vpop.permute.xlu1 %4382 }
0x1eac   :  { %v4385_v58 = vmul.f32 %v5646_v51, %v4383_v54 }
0x1eae   :  { %4387 = vrot.lane.b32.xlu0 %v4385_v58, %s5714_s25 }
0x1f20   :  { %v4388_v17 = vpop.permute.xlu0 %4387 }
0x1f21   :  { %v4390_v15 = vadd.f32 %v4388_v17, %v4371_v59 }
0x1f23   :  { %5647 = vtanh.f32 %v4390_v15 }
0x1f30   :  { %v5648_v12 = vpop.eup %5647 }
0x1f31   :  { %4394 = vrot.lane.b32.xlu1 %v5648_v12, %s5716_s0 }
0x1f35   :  { %4658 = vrot.lane.b32.xlu1 %v6913_v33, %s5716_s0 }
0x1f39   :  { %4665 = vrot.lane.b32.xlu1 %v6905_v50, %s5716_s0 }
0x1fa3   :  { %v4395_v2 = vpop.permute.xlu1 %4394 }
0x1fa4   :  { %v4397_v8 = vmul.f32 %v4395_v2, %v4392_v40 }
0x1fa6   :  { %v4401_v33 = vadd.f32 %v4400_v10, %v4397_v8 }
0x1fa7   :  { %v4659_v23 = vpop.permute.xlu1 %4658 }
0x1fa8   :  { %4662 = vst.msk [vmem:[%s7121_s10 - $0x6] sm:$0xc0] %vm4661_vm0, %v4659_v23  ;;  %v4404_v57 = vsel %vm754_vm9, %v4403_v47, %v4401_v33 }
0x1fa9   :  { %4415 = vrot.lane.b32.xlu0 %v4404_v57, %s5716_s0 }
0x1fab   :  { %v4666_v39 = vpop.permute.xlu1 %4665 }
0x1fac   :  { %4670 = vst.msk [vmem:[%s7121_s10 + $0x4] sm:$0xff] %vm635_vm5, %v4666_v39 }
0x1fad   :  { %4663 = vrot.lane.b32.xlu0 %v6902_v18, %s5716_s0  ;;  %v4493_v18 = vld [vmem:[%s7118_s7 + $0x38] sm:$0xff] }
0x1fae   :  { %5507 = vmatpush3.msra.mxu1 %v4493_v18 }
0x1faf   :  { %5508 = vmatprep.subr.mxu1 %v5712_v3 }
0x1fb0   :  { %5509 = vmatpush3.msra.mxu1 %v4492_v31 }
0x1fb1   :  { %4672 = vrot.lane.b32.xlu0 %v4401_v33, %s5716_s0  ;;  %5510 = vmatprep.subr.mxu1 %v5712_v3 }
0x1fb2   :  { %5511 = vmatpush3.msra.mxu1 %v4491_v42 }
0x1fb3   :  { %5512 = vmatprep.subr.mxu1 %v5712_v3 }
0x1fb4   :  { %5513 = vmatpush3.msra.mxu1 %v4490_v52 }
0x201b   :  { %v4416_v50 = vpop.permute.xlu0 %4415 }
0x201c   :  { %5504 = vmatmul.mubr.msk.f32.vlgmr.msra.gmra.mxu0 %vm635_vm5, %v4416_v50 }
0x201d   :  { %5525 = vmatprep.mubr.msk.f32.mxu0 %vm5713_vm3, %v5712_v3  ;;  %5518 = vmatpush3.msra.mxu0 %v4576_v53 }
0x201e   :  { %5519 = vmatprep.subr.mxu0 %v5712_v3 }
0x201f   :  { %v4664_v56 = vpop.permute.xlu0 %4663  ;;  %5520 = vmatpush3.msra.mxu0 %v4575_v6 }
0x2020   :  { %4669 = vst.msk [vmem:[%s7121_s10 - $0x4] sm:$0xc0] %vm4661_vm0, %v4664_v56  ;;  %5521 = vmatprep.subr.mxu0 %v5712_v3 }
0x2021   :  { %5522 = vmatpush3.msra.mxu0 %v4574_v19 }
0x2022   :  { %5523 = vmatprep.subr.mxu0 %v5712_v3 }
0x2023   :  { %v4673_v0 = vpop.permute.xlu0 %4672  ;;  %5524 = vmatpush3.msra.mxu0 %v4573_v60 }
0x2024   :  { %4675 = vst.msk [vmem:[%s7121_s10 + $0x6] sm:$0xc0] %vm4661_vm0, %v4673_v0 }
0x20dc   :  { %v4485_v4 = vpop.f32.mrf.mxu0 }
0x20dd   :  { %v4486_v1 = vadd.f32 %v4809_v43, %v4485_v4 }
0x20de   :  { %v5505_v62 = vpop.f32.mrf.mxu0 }
0x20df   :  { %5649 = vtanh.f32 %v4486_v1 }
0x20ec   :  { %v5650_v41 = vpop.eup %5649 }
0x20ed   :  { %5515 = vmatmul.mubr.msk.f32.vlgmr.msra.gmra.mxu1 %vm635_vm5, %v5650_v41 }
0x21ad   :  { %v4568_v5 = vpop.f32.mrf.mxu1 }
0x21ae   :  { %v4569_v24 = vadd.f32 %v4811_v44, %v4568_v5 }
0x21af   :  { %v5516_v25 = vpop.f32.mrf.mxu1 }
0x21b0   :  { %5651 = vtanh.f32 %v4569_v24 }
0x21bd   :  { %v5652_v35 = vpop.eup %5651 }
0x21be   :  { %4655 = vst.msk [vmem:[#allocation2] sm:$0xff] %vm635_vm5, %v5652_v35  ;;  %5526 = vmatmul.mubr.msk.f32.vlgmr.msra.gmra.mxu0 %vm635_vm5, %v5652_v35 }
0x21bf   :  { %5700 = shalt.err (!%p5697_p4)
}
0x21c0   :  { %4685 = dma.vmem_to_hbm [thread:$0]  %s4683_s12, 128, %s7119_s8, [#allocation3]   ;;  %v4813_v3 = vld [vmem:[%s7118_s7 + $0x62] ss:$0 sm:$0xff]  ;;  %vm4656_vm1 = vcmask 7168  }
0x227e   :  { %v4651_v63 = vpop.f32.mrf.mxu0 }
0x227f   :  { %v4652_v49 = vadd.f32 %v4813_v3, %v4651_v63 }
0x2280   :  { %v5527_v48 = vpop.f32.mrf.mxu0 }
0x2281   :  { %4657 = vst.msk [vmem:[%s7120_s9] sm:$0xff] %vm4656_vm1, %v4652_v49 }
0x2282   :  { %5709 = dma.done.wait [#allocation3], 128  }
0x2283   :  { %5710 = vsyncadd [#allocation3], 4294967168 }
0x2284   :  { %4697 = vsyncpa [#allocation3], 1 }

</bundles_post_ra>
